<compile_context>
chip_gen: v6e
topology: v6e:2x2x1
jax: 0.10.0
libtpu: 0.0.40
codegen_flags: <defaults>
</compile_context>

<pallas_src>
import functools
import math

import numpy as np
import jax
import jax.numpy as jnp
from jax import lax
from jax.experimental import pallas as pl
from jax.experimental.pallas import tpu as pltpu


def _gru_chunk_kernel(len_sref, x_ref, wih_ref, whh_ref, bpre_ref, bhn_ref,
                      h0_ref, lenv_ref, out_ref, hfin_ref, *, Tc, H):
    """One grid step == one chunk of Tc timesteps (time axis is 'arbitrary')."""
    c = pl.program_id(0)
    B = x_ref.shape[0]
    E = x_ref.shape[2]

    # Initialize the resident hidden-state carry from h0 on the first chunk.
    @pl.when(c == 0)
    def _():
        hfin_ref[...] = h0_ref[...]

    # ---- fused input projection (off the serial h-chain): one MXU matmul ----
    # (B*Tc, E) @ (E, 3H) + merged input-side biases; f32 accumulation.
    xc = x_ref[...].reshape(B * Tc, E)
    pre = jnp.dot(xc, wih_ref[...], preferred_element_type=jnp.float32)
    pre = (pre + bpre_ref[...]).reshape(B, Tc, 3 * H)

    whh = whh_ref[...]                 # (H, 3H) resident recurrent weights
    mdt = whh.dtype                    # MXU operand dtype (f32 or bf16)
    bhn = bhn_ref[...]                 # (1, H) recurrent bias of the n-gate
    lens = lenv_ref[...]               # (B, 1) int32 sequence lengths (vector)
    h_in = hfin_ref[...]               # (B, H) f32 carry (resident output)
    t_base = c * Tc

    # Scalar chunk-level gate from SMEM lengths: skip masking entirely when
    # every sequence fully covers this chunk.
    min_len = len_sref[0]
    for b in range(1, B):
        min_len = jnp.minimum(min_len, len_sref[b])
    chunk_fully_valid = min_len >= t_base + Tc

    def run_chunk(masked):
        h = h_in
        for i in range(Tc):            # static unroll over the time chunk
            pg = pre[:, i, :]          # (B, 3H) precomputed input pre-gates
            hg = jnp.dot(h.astype(mdt), whh,
                         preferred_element_type=jnp.float32)       # (B, 3H)
            r = jax.nn.sigmoid(pg[:, 0 * H:1 * H] + hg[:, 0 * H:1 * H])
            z = jax.nn.sigmoid(pg[:, 1 * H:2 * H] + hg[:, 1 * H:2 * H])
            n = jnp.tanh(pg[:, 2 * H:3 * H] + r * (hg[:, 2 * H:3 * H] + bhn))
            h_new = (1.0 - z) * n + z * h
            if masked:
                # Packed-sequence masking: zero past length, hold last valid h.
                valid = (t_base + i) < lens                         # (B, 1)
                out_ref[:, i * H:(i + 1) * H] = (
                    jnp.where(valid, h_new, 0.0).astype(out_ref.dtype))
                h = jnp.where(valid, h_new, h)
            else:
                out_ref[:, i * H:(i + 1) * H] = h_new.astype(out_ref.dtype)
                h = h_new
        hfin_ref[...] = h.astype(hfin_ref.dtype)   # once per chunk

    @pl.when(chunk_fully_valid)
    def _():
        run_chunk(masked=False)

    @pl.when(jnp.logical_not(chunk_fully_valid))
    def _():
        run_chunk(masked=True)


def gru_pallas(x_btE, enc_len, params, h0=None, time_chunk=8,
               mxu_dtype=jnp.float32):
    """x_btE: (B, T, E), enc_len: (B,) int -> (output (B,T,H), hidden (1,B,H))."""
    B, T, E = x_btE.shape
    H = params["w_hh_t"].shape[0]

    if B == 1:
        # PyTorch forward() bypasses packing (and any provided hidden) when B==1.
        enc_len = jnp.full((B,), T, dtype=jnp.int32)
        h0 = None

    if h0 is None:
        h0 = jnp.zeros((B, H), jnp.float32)
    else:
        h0 = jnp.asarray(h0).reshape(B, H).astype(jnp.float32)

    # ---- time chunking: Tc timesteps per grid step ---------------------------
    if T <= time_chunk:
        Tc, n_chunks = T, 1
    else:
        # Tc must keep the (B, Tc, E) x-block sublane-tiled (mult of 8) and the
        # (B, Tc*H) output block lane-dense (Tc*H mult of 128) when chunked.
        lane_step = 128 // math.gcd(H, 128)
        step = 8 * lane_step // math.gcd(8, lane_step)          # lcm(8, lane_step)
        Tc = max(step, (time_chunk // step) * step)
        n_chunks = pl.cdiv(T, Tc)
    T_pad = n_chunks * Tc

    mdt = jnp.dtype(mxu_dtype)
    x = x_btE.astype(mdt)                         # batch-first; NO transpose
    if T_pad != T:
        # padded steps have t >= enc_len for every b -> output 0, hidden held.
        x = jnp.pad(x, ((0, 0), (0, T_pad - T), (0, 0)))
    w_ih = params["w_ih_t"].astype(mdt)           # (E, 3H)
    w_hh = params["w_hh_t"].astype(mdt)           # (H, 3H)

    lens = enc_len.astype(jnp.int32)              # (B,)  -> SMEM scalar prefetch
    lens_vec = lens.reshape(B, 1)                 # (B,1) -> VMEM mask operand

    kernel = functools.partial(_gru_chunk_kernel, Tc=Tc, H=H)

    out_flat, h_fin = pl.pallas_call(
        kernel,
        out_shape=(jax.ShapeDtypeStruct((B, T_pad * H), jnp.float32),
                   jax.ShapeDtypeStruct((B, H), jnp.float32)),
        grid_spec=pltpu.PrefetchScalarGridSpec(
            num_scalar_prefetch=1,
            grid=(n_chunks,),
            in_specs=[
                pl.BlockSpec((B, Tc, E), lambda c, L: (0, c, 0)),   # x chunk
                pl.BlockSpec((E, 3 * H), lambda c, L: (0, 0)),      # W_ih (resident)
                pl.BlockSpec((H, 3 * H), lambda c, L: (0, 0)),      # W_hh (resident)
                pl.BlockSpec((1, 3 * H), lambda c, L: (0, 0)),      # merged input biases
                pl.BlockSpec((1, H), lambda c, L: (0, 0)),          # b_hn
                pl.BlockSpec((B, H), lambda c, L: (0, 0)),          # h0
                pl.BlockSpec((B, 1), lambda c, L: (0, 0)),          # lengths (vector)
            ],
            out_specs=[
                pl.BlockSpec((B, Tc * H), lambda c, L: (0, c)),     # lane-dense output
                pl.BlockSpec((B, H), lambda c, L: (0, 0)),          # final hidden (resident)
            ],
        ),
        compiler_params=pltpu.CompilerParams(
            dimension_semantics=("arbitrary",)),
    )(lens, x, w_ih, w_hh, params["b_pre"], params["b_hn"], h0, lens_vec)

    output = out_flat.reshape(B, T_pad, H)        # free: row-major compatible
    if T_pad != T:
        output = output[:, :T, :]
    hidden = h_fin[None, :, :]                    # (1, B, H) like nn.GRU
    return output, hidden


def init_gru_params(key, embedding_dim, hidden_size):
    """Deterministic init matching nn.GRU shapes; weights stored concatenated/transposed."""
    k = 1.0 / np.sqrt(hidden_size)
    keys = jax.random.split(key, 4)
    w_ih = jax.random.uniform(keys[0], (3 * hidden_size, embedding_dim),
                              minval=-k, maxval=k, dtype=jnp.float32)
    w_hh = jax.random.uniform(keys[1], (3 * hidden_size, hidden_size),
                              minval=-k, maxval=k, dtype=jnp.float32)
    b_ih = jax.random.uniform(keys[2], (3 * hidden_size,), minval=-k, maxval=k,
                              dtype=jnp.float32)
    b_hh = jax.random.uniform(keys[3], (3 * hidden_size,), minval=-k, maxval=k,
                              dtype=jnp.float32)
    H = hidden_size
    # b_ir+b_hr and b_iz+b_hz merge into the fused input projection; only b_hn
    # must stay separate (it sits inside r * (.)).
    b_pre = jnp.concatenate([b_ih[0:H] + b_hh[0:H],
                             b_ih[H:2 * H] + b_hh[H:2 * H],
                             b_ih[2 * H:3 * H]]).reshape(1, 3 * H)
    params = {
        "w_ih_t": w_ih.T,                          # (E, 3H), columns = [r | z | n]
        "w_hh_t": w_hh.T,                          # (H, 3H), columns = [r | z | n]
        "b_pre": b_pre,                            # (1, 3H)
        "b_hn": b_hh[2 * H:3 * H].reshape(1, H),   # (1, H)
    }
    return params, (w_ih, w_hh, b_ih, b_hh)


def gru_reference(x, enc_len, w_ih, w_hh, b_ih, b_hh, hidden_size):
    """Pure-JAX reference of the packed-sequence GRU (for validation)."""
    B, T, E = x.shape
    H = hidden_size

    def step(h, xt_t):
        xt, t = xt_t
        gi = xt @ w_ih.T + b_ih
        gh = h @ w_hh.T + b_hh
        r = jax.nn.sigmoid(gi[:, :H] + gh[:, :H])
        z = jax.nn.sigmoid(gi[:, H:2 * H] + gh[:, H:2 * H])
        n = jnp.tanh(gi[:, 2 * H:] + r * gh[:, 2 * H:])
        h_new = (1 - z) * n + z * h
        valid = (t < enc_len).astype(jnp.float32)[:, None]
        out = h_new * valid
        h = valid * h_new + (1 - valid) * h
        return h, out

    h0 = jnp.zeros((B, H), jnp.float32)
    ts = jnp.arange(T)
    h_fin, outs = lax.scan(step, h0, (jnp.transpose(x, (1, 0, 2)), ts))
    return jnp.transpose(outs, (1, 0, 2)), h_fin[None]


if __name__ == "__main__":
    embedding_dim, hidden_size = 16, 32
    batch_size = 4
    dropout = 0.1   # no-op for a 1-layer nn.GRU; ignored

    key = jax.random.PRNGKey(0)
    kp, kx1, kx2, kx3 = jax.random.split(key, 4)
    params, (w_ih, w_hh, b_ih, b_hh) = init_gru_params(kp, embedding_dim, hidden_size)

    run_f32 = jax.jit(functools.partial(gru_pallas, params=params))
    run_bf16 = jax.jit(functools.partial(gru_pallas, params=params,
                                         mxu_dtype=jnp.bfloat16))

    # --- case 1: B=4, T=8 (single chunk, masked path) -------------------------
    x1 = jax.random.normal(kx1, (batch_size, 8, embedding_dim), dtype=jnp.float32)
    len1 = jnp.array([8, 5, 3, 6], dtype=jnp.int32)
    out1, hid1 = run_f32(x1, len1)
    jax.block_until_ready((out1, hid1))
    ref_o, ref_h = gru_reference(x1, len1, w_ih, w_hh, b_ih, b_hh, hidden_size)
    np.testing.assert_allclose(np.asarray(out1), np.asarray(ref_o), rtol=2e-5, atol=2e-5)
    np.testing.assert_allclose(np.asarray(hid1), np.asarray(ref_h), rtol=2e-5, atol=2e-5)
    assert out1.shape == (batch_size, 8, hidden_size)
    assert hid1.shape == (1, batch_size, hidden_size)

    # --- case 2: B=4, T=16 (two chunks: fully-valid fast path + masked path) --
    x2 = jax.random.normal(kx2, (batch_size, 16, embedding_dim), dtype=jnp.float32)
    len2 = jnp.array([16, 12, 9, 14], dtype=jnp.int32)
    out2, hid2 = run_f32(x2, len2)
    jax.block_until_ready((out2, hid2))
    ref_o, ref_h = gru_reference(x2, len2, w_ih, w_hh, b_ih, b_hh, hidden_size)
    np.testing.assert_allclose(np.asarray(out2), np.asarray(ref_o), rtol=2e-5, atol=2e-5)
    np.testing.assert_allclose(np.asarray(hid2), np.asarray(ref_h), rtol=2e-5, atol=2e-5)

    # --- case 3: batch == 1 fast path (packing skipped, full sequence run) ----
    x3 = jax.random.normal(kx3, (1, 8, embedding_dim), dtype=jnp.float32)
    out3, hid3 = run_f32(x3, jnp.array([5], dtype=jnp.int32))   # length ignored, like PyTorch
    jax.block_until_ready((out3, hid3))
    ref_o, ref_h = gru_reference(x3, jnp.array([8], dtype=jnp.int32),
                                 w_ih, w_hh, b_ih, b_hh, hidden_size)
    np.testing.assert_allclose(np.asarray(out3), np.asarray(ref_o), rtol=2e-5, atol=2e-5)
    np.testing.assert_allclose(np.asarray(hid3), np.asarray(ref_h), rtol=2e-5, atol=2e-5)

    # --- case 4: bf16 MXU operands (v6e/v7x path), f32 accumulate, loose tol ---
    out4, hid4 = run_bf16(x1, len1)
    jax.block_until_ready((out4, hid4))
    ref_o, ref_h = gru_reference(x1, len1, w_ih, w_hh, b_ih, b_hh, hidden_size)
    np.testing.assert_allclose(np.asarray(out4), np.asarray(ref_o), rtol=3e-2, atol=3e-2)
    np.testing.assert_allclose(np.asarray(hid4), np.asarray(ref_h), rtol=3e-2, atol=3e-2)

    print("KERNEL_OK")
</pallas_src>

<mosaic_0001>
module attributes {stable_mosaic.version = 11 : i64} {
  func.func @_gru_chunk_kernel(%arg0: i32, %arg1: memref<4xi32, #tpu.memory_space<smem>>, %arg2: memref<4x8x16xf32, #tpu.memory_space<vmem>>, %arg3: memref<16x96xf32, #tpu.memory_space<vmem>>, %arg4: memref<32x96xf32, #tpu.memory_space<vmem>>, %arg5: memref<1x96xf32, #tpu.memory_space<vmem>>, %arg6: memref<1x32xf32, #tpu.memory_space<vmem>>, %arg7: memref<4x32xf32, #tpu.memory_space<vmem>>, %arg8: memref<4x1xi32, #tpu.memory_space<vmem>>, %arg9: memref<4x256xf32, #tpu.memory_space<vmem>>, %arg10: memref<4x32xf32, #tpu.memory_space<vmem>>) attributes {dimension_semantics = [#tpu.dimension_semantics<arbitrary>], iteration_bounds = array<i64: 1>, scalar_prefetch = 1 : i64, scratch_operands = 0 : i64, tpu.core_type = #tpu.core_type<tc>, window_params = [{transform_indices = @transform_0, window_bounds = array<i64: 4, 8, 16>}, {pipeline_mode = #tpu.pipeline_mode<synchronous>, transform_indices = @transform_1, window_bounds = array<i64: 16, 96>}, {pipeline_mode = #tpu.pipeline_mode<synchronous>, transform_indices = @transform_2, window_bounds = array<i64: 32, 96>}, {pipeline_mode = #tpu.pipeline_mode<synchronous>, transform_indices = @transform_3, window_bounds = array<i64: 1, 96>}, {pipeline_mode = #tpu.pipeline_mode<synchronous>, transform_indices = @transform_4, window_bounds = array<i64: 1, 32>}, {pipeline_mode = #tpu.pipeline_mode<synchronous>, transform_indices = @transform_5, window_bounds = array<i64: 4, 32>}, {pipeline_mode = #tpu.pipeline_mode<synchronous>, transform_indices = @transform_6, window_bounds = array<i64: 4, 1>}, {transform_indices = @transform_7, window_bounds = array<i64: 4, 256>}, {pipeline_mode = #tpu.pipeline_mode<synchronous>, transform_indices = @transform_8, window_bounds = array<i64: 4, 32>}]} {
    %c0_i32 = arith.constant 0 : i32
    %0 = arith.cmpi eq, %arg0, %c0_i32 : i32
    %1 = arith.extui %0 : i1 to i32
    %c0_i32_0 = arith.constant 0 : i32
    %2 = arith.cmpi ne, %1, %c0_i32_0 : i32
    scf.if %2 {
      %c0_19 = arith.constant 0 : index
      %c0_20 = arith.constant 0 : index
      %30 = vector.load %arg7[%c0_19, %c0_20] : memref<4x32xf32, #tpu.memory_space<vmem>>, vector<4x32xf32>
      %c0_21 = arith.constant 0 : index
      %c0_22 = arith.constant 0 : index
      %31 = vector.load %arg10[%c0_21, %c0_22] : memref<4x32xf32, #tpu.memory_space<vmem>>, vector<4x32xf32>
      tpu.vector_store %arg10[%c0_21, %c0_22], %30 {strides = array<i32>} : memref<4x32xf32, #tpu.memory_space<vmem>>, vector<4x32xf32>,
    } else {
    }
    %c0 = arith.constant 0 : index
    %c0_1 = arith.constant 0 : index
    %c0_2 = arith.constant 0 : index
    %3 = vector.load %arg2[%c0, %c0_1, %c0_2] : memref<4x8x16xf32, #tpu.memory_space<vmem>>, vector<4x8x16xf32>
    %4 = vector.shape_cast %3 : vector<4x8x16xf32> to vector<32x16xf32>
    %c0_3 = arith.constant 0 : index
    %c0_4 = arith.constant 0 : index
    %5 = vector.load %arg3[%c0_3, %c0_4] : memref<16x96xf32, #tpu.memory_space<vmem>>, vector<16x96xf32>
    %cst = arith.constant dense<0.000000e+00> : vector<32x96xf32>
    %6 = tpu.matmul %4, %5, %cst {dimension_numbers = #tpu.dot_dimension_numbers<[1], [0], [0], [1], [0, 0, 1, 1], [], []>} : vector<32x16xf32>, vector<16x96xf32>, vector<32x96xf32> -> vector<32x96xf32>
    %c0_5 = arith.constant 0 : index
    %c0_6 = arith.constant 0 : index
    %7 = vector.load %arg5[%c0_5, %c0_6] : memref<1x96xf32, #tpu.memory_space<vmem>>, vector<1x96xf32>
    %8 = vector.broadcast %7 : vector<1x96xf32> to vector<32x96xf32>
    %9 = arith.addf %6, %8 : vector<32x96xf32>
    %10 = vector.shape_cast %9 : vector<32x96xf32> to vector<4x8x96xf32>
    %c0_7 = arith.constant 0 : index
    %c0_8 = arith.constant 0 : index
    %11 = vector.load %arg4[%c0_7, %c0_8] : memref<32x96xf32, #tpu.memory_space<vmem>>, vector<32x96xf32>
    %c0_9 = arith.constant 0 : index
    %c0_10 = arith.constant 0 : index
    %12 = vector.load %arg6[%c0_9, %c0_10] : memref<1x32xf32, #tpu.memory_space<vmem>>, vector<1x32xf32>
    %c0_11 = arith.constant 0 : index
    %c0_12 = arith.constant 0 : index
    %13 = vector.load %arg8[%c0_11, %c0_12] : memref<4x1xi32, #tpu.memory_space<vmem>>, vector<4x1xi32>
    %c0_13 = arith.constant 0 : index
    %c0_14 = arith.constant 0 : index
    %14 = vector.load %arg10[%c0_13, %c0_14] : memref<4x32xf32, #tpu.memory_space<vmem>>, vector<4x32xf32>
    %c8_i32 = arith.constant 8 : i32
    %15 = arith.muli %arg0, %c8_i32 : i32
    %c0_15 = arith.constant 0 : index
    %16 = memref.load %arg1[%c0_15] : memref<4xi32, #tpu.memory_space<smem>>
    %c1 = arith.constant 1 : index
    %17 = memref.load %arg1[%c1] : memref<4xi32, #tpu.memory_space<smem>>
    %18 = arith.minsi %16, %17 : i32
    %c2 = arith.constant 2 : index
    %19 = memref.load %arg1[%c2] : memref<4xi32, #tpu.memory_space<smem>>
    %20 = arith.minsi %18, %19 : i32
    %c3 = arith.constant 3 : index
    %21 = memref.load %arg1[%c3] : memref<4xi32, #tpu.memory_space<smem>>
    %22 = arith.minsi %20, %21 : i32
    %c8_i32_16 = arith.constant 8 : i32
    %23 = arith.addi %15, %c8_i32_16 : i32
    %24 = arith.cmpi sge, %22, %23 : i32
    %25 = arith.extui %24 : i1 to i32
    %c0_i32_17 = arith.constant 0 : i32
    %26 = arith.cmpi ne, %25, %c0_i32_17 : i32
    scf.if %26 {
      %30 = vector.extract_strided_slice %10 {offsets = [0, 0, 0], sizes = [4, 1, 96], strides = [1, 1, 1]} : vector<4x8x96xf32> to vector<4x1x96xf32>
      %31 = vector.shape_cast %30 : vector<4x1x96xf32> to vector<4x96xf32>
      %cst_19 = arith.constant dense<0.000000e+00> : vector<4x96xf32>
      %32 = tpu.matmul %14, %11, %cst_19 {dimension_numbers = #tpu.dot_dimension_numbers<[1], [0], [0], [1], [0, 0, 1, 1], [], []>} : vector<4x32xf32>, vector<32x96xf32>, vector<4x96xf32> -> vector<4x96xf32>
      %33 = vector.extract_strided_slice %31 {offsets = [0, 0], sizes = [4, 32], strides = [1, 1]} : vector<4x96xf32> to vector<4x32xf32>
      %34 = vector.extract_strided_slice %32 {offsets = [0, 0], sizes = [4, 32], strides = [1, 1]} : vector<4x96xf32> to vector<4x32xf32>
      %35 = arith.addf %33, %34 : vector<4x32xf32>
      %36 = arith.negf %35 : vector<4x32xf32>
      %37 = math.exp %36 : vector<4x32xf32>
      %cst_20 = arith.constant 1.000000e+00 : f32
      %38 = vector.broadcast %cst_20 : f32 to vector<4x32xf32>
      %39 = arith.addf %38, %37 : vector<4x32xf32>
      %40 = arith.divf %38, %39 : vector<4x32xf32>
      %41 = vector.extract_strided_slice %31 {offsets = [0, 32], sizes = [4, 32], strides = [1, 1]} : vector<4x96xf32> to vector<4x32xf32>
      %42 = vector.extract_strided_slice %32 {offsets = [0, 32], sizes = [4, 32], strides = [1, 1]} : vector<4x96xf32> to vector<4x32xf32>
      %43 = arith.addf %41, %42 : vector<4x32xf32>
      %44 = arith.negf %43 : vector<4x32xf32>
      %45 = math.exp %44 : vector<4x32xf32>
      %cst_21 = arith.constant 1.000000e+00 : f32
      %46 = vector.broadcast %cst_21 : f32 to vector<4x32xf32>
      %47 = arith.addf %46, %45 : vector<4x32xf32>
      %48 = arith.divf %46, %47 : vector<4x32xf32>
      %49 = vector.extract_strided_slice %31 {offsets = [0, 64], sizes = [4, 32], strides = [1, 1]} : vector<4x96xf32> to vector<4x32xf32>
      %50 = vector.extract_strided_slice %32 {offsets = [0, 64], sizes = [4, 32], strides = [1, 1]} : vector<4x96xf32> to vector<4x32xf32>
      %51 = vector.broadcast %12 : vector<1x32xf32> to vector<4x32xf32>
      %52 = arith.addf %50, %51 : vector<4x32xf32>
      %53 = arith.mulf %40, %52 : vector<4x32xf32>
      %54 = arith.addf %49, %53 : vector<4x32xf32>
      %55 = math.tanh %54 : vector<4x32xf32>
      %cst_22 = arith.constant 1.000000e+00 : f32
      %56 = vector.broadcast %cst_22 : f32 to vector<4x32xf32>
      %57 = arith.subf %56, %48 : vector<4x32xf32>
      %58 = arith.mulf %57, %55 : vector<4x32xf32>
      %59 = arith.mulf %48, %14 : vector<4x32xf32>
      %60 = arith.addf %58, %59 : vector<4x32xf32>
      %c0_23 = arith.constant 0 : index
      %c0_24 = arith.constant 0 : index
      %61 = vector.load %arg9[%c0_23, %c0_24] : memref<4x256xf32, #tpu.memory_space<vmem>>, vector<4x32xf32>
      tpu.vector_store %arg9[%c0_23, %c0_24], %60 {strides = array<i32>} : memref<4x256xf32, #tpu.memory_space<vmem>>, vector<4x32xf32>,
      %62 = vector.extract_strided_slice %10 {offsets = [0, 1, 0], sizes = [4, 1, 96], strides = [1, 1, 1]} : vector<4x8x96xf32> to vector<4x1x96xf32>
      %63 = vector.shape_cast %62 : vector<4x1x96xf32> to vector<4x96xf32>
      %cst_25 = arith.constant dense<0.000000e+00> : vector<4x96xf32>
      %64 = tpu.matmul %60, %11, %cst_25 {dimension_numbers = #tpu.dot_dimension_numbers<[1], [0], [0], [1], [0, 0, 1, 1], [], []>} : vector<4x32xf32>, vector<32x96xf32>, vector<4x96xf32> -> vector<4x96xf32>
      %65 = vector.extract_strided_slice %63 {offsets = [0, 0], sizes = [4, 32], strides = [1, 1]} : vector<4x96xf32> to vector<4x32xf32>
      %66 = vector.extract_strided_slice %64 {offsets = [0, 0], sizes = [4, 32], strides = [1, 1]} : vector<4x96xf32> to vector<4x32xf32>
      %67 = arith.addf %65, %66 : vector<4x32xf32>
      %68 = arith.negf %67 : vector<4x32xf32>
      %69 = math.exp %68 : vector<4x32xf32>
      %cst_26 = arith.constant 1.000000e+00 : f32
      %70 = vector.broadcast %cst_26 : f32 to vector<4x32xf32>
      %71 = arith.addf %70, %69 : vector<4x32xf32>
      %72 = arith.divf %70, %71 : vector<4x32xf32>
      %73 = vector.extract_strided_slice %63 {offsets = [0, 32], sizes = [4, 32], strides = [1, 1]} : vector<4x96xf32> to vector<4x32xf32>
      %74 = vector.extract_strided_slice %64 {offsets = [0, 32], sizes = [4, 32], strides = [1, 1]} : vector<4x96xf32> to vector<4x32xf32>
      %75 = arith.addf %73, %74 : vector<4x32xf32>
      %76 = arith.negf %75 : vector<4x32xf32>
      %77 = math.exp %76 : vector<4x32xf32>
      %cst_27 = arith.constant 1.000000e+00 : f32
      %78 = vector.broadcast %cst_27 : f32 to vector<4x32xf32>
      %79 = arith.addf %78, %77 : vector<4x32xf32>
      %80 = arith.divf %78, %79 : vector<4x32xf32>
      %81 = vector.extract_strided_slice %63 {offsets = [0, 64], sizes = [4, 32], strides = [1, 1]} : vector<4x96xf32> to vector<4x32xf32>
      %82 = vector.extract_strided_slice %64 {offsets = [0, 64], sizes = [4, 32], strides = [1, 1]} : vector<4x96xf32> to vector<4x32xf32>
      %83 = vector.broadcast %12 : vector<1x32xf32> to vector<4x32xf32>
      %84 = arith.addf %82, %83 : vector<4x32xf32>
      %85 = arith.mulf %72, %84 : vector<4x32xf32>
      %86 = arith.addf %81, %85 : vector<4x32xf32>
      %87 = math.tanh %86 : vector<4x32xf32>
      %cst_28 = arith.constant 1.000000e+00 : f32
      %88 = vector.broadcast %cst_28 : f32 to vector<4x32xf32>
      %89 = arith.subf %88, %80 : vector<4x32xf32>
      %90 = arith.mulf %89, %87 : vector<4x32xf32>
      %91 = arith.mulf %80, %60 : vector<4x32xf32>
      %92 = arith.addf %90, %91 : vector<4x32xf32>
      %c0_29 = arith.constant 0 : index
      %c32 = arith.constant 32 : index
      %93 = vector.load %arg9[%c0_29, %c32] : memref<4x256xf32, #tpu.memory_space<vmem>>, vector<4x32xf32>
      tpu.vector_store %arg9[%c0_29, %c32], %92 {strides = array<i32>} : memref<4x256xf32, #tpu.memory_space<vmem>>, vector<4x32xf32>,
      %94 = vector.extract_strided_slice %10 {offsets = [0, 2, 0], sizes = [4, 1, 96], strides = [1, 1, 1]} : vector<4x8x96xf32> to vector<4x1x96xf32>
      %95 = vector.shape_cast %94 : vector<4x1x96xf32> to vector<4x96xf32>
      %cst_30 = arith.constant dense<0.000000e+00> : vector<4x96xf32>
      %96 = tpu.matmul %92, %11, %cst_30 {dimension_numbers = #tpu.dot_dimension_numbers<[1], [0], [0], [1], [0, 0, 1, 1], [], []>} : vector<4x32xf32>, vector<32x96xf32>, vector<4x96xf32> -> vector<4x96xf32>
      %97 = vector.extract_strided_slice %95 {offsets = [0, 0], sizes = [4, 32], strides = [1, 1]} : vector<4x96xf32> to vector<4x32xf32>
      %98 = vector.extract_strided_slice %96 {offsets = [0, 0], sizes = [4, 32], strides = [1, 1]} : vector<4x96xf32> to vector<4x32xf32>
      %99 = arith.addf %97, %98 : vector<4x32xf32>
      %100 = arith.negf %99 : vector<4x32xf32>
      %101 = math.exp %100 : vector<4x32xf32>
      %cst_31 = arith.constant 1.000000e+00 : f32
      %102 = vector.broadcast %cst_31 : f32 to vector<4x32xf32>
      %103 = arith.addf %102, %101 : vector<4x32xf32>
      %104 = arith.divf %102, %103 : vector<4x32xf32>
      %105 = vector.extract_strided_slice %95 {offsets = [0, 32], sizes = [4, 32], strides = [1, 1]} : vector<4x96xf32> to vector<4x32xf32>
      %106 = vector.extract_strided_slice %96 {offsets = [0, 32], sizes = [4, 32], strides = [1, 1]} : vector<4x96xf32> to vector<4x32xf32>
      %107 = arith.addf %105, %106 : vector<4x32xf32>
      %108 = arith.negf %107 : vector<4x32xf32>
      %109 = math.exp %108 : vector<4x32xf32>
      %cst_32 = arith.constant 1.000000e+00 : f32
      %110 = vector.broadcast %cst_32 : f32 to vector<4x32xf32>
      %111 = arith.addf %110, %109 : vector<4x32xf32>
      %112 = arith.divf %110, %111 : vector<4x32xf32>
      %113 = vector.extract_strided_slice %95 {offsets = [0, 64], sizes = [4, 32], strides = [1, 1]} : vector<4x96xf32> to vector<4x32xf32>
      %114 = vector.extract_strided_slice %96 {offsets = [0, 64], sizes = [4, 32], strides = [1, 1]} : vector<4x96xf32> to vector<4x32xf32>
      %115 = vector.broadcast %12 : vector<1x32xf32> to vector<4x32xf32>
      %116 = arith.addf %114, %115 : vector<4x32xf32>
      %117 = arith.mulf %104, %116 : vector<4x32xf32>
      %118 = arith.addf %113, %117 : vector<4x32xf32>
      %119 = math.tanh %118 : vector<4x32xf32>
      %cst_33 = arith.constant 1.000000e+00 : f32
      %120 = vector.broadcast %cst_33 : f32 to vector<4x32xf32>
      %121 = arith.subf %120, %112 : vector<4x32xf32>
      %122 = arith.mulf %121, %119 : vector<4x32xf32>
      %123 = arith.mulf %112, %92 : vector<4x32xf32>
      %124 = arith.addf %122, %123 : vector<4x32xf32>
      %c0_34 = arith.constant 0 : index
      %c64 = arith.constant 64 : index
      %125 = vector.load %arg9[%c0_34, %c64] : memref<4x256xf32, #tpu.memory_space<vmem>>, vector<4x32xf32>
      tpu.vector_store %arg9[%c0_34, %c64], %124 {strides = array<i32>} : memref<4x256xf32, #tpu.memory_space<vmem>>, vector<4x32xf32>,
      %126 = vector.extract_strided_slice %10 {offsets = [0, 3, 0], sizes = [4, 1, 96], strides = [1, 1, 1]} : vector<4x8x96xf32> to vector<4x1x96xf32>
      %127 = vector.shape_cast %126 : vector<4x1x96xf32> to vector<4x96xf32>
      %cst_35 = arith.constant dense<0.000000e+00> : vector<4x96xf32>
      %128 = tpu.matmul %124, %11, %cst_35 {dimension_numbers = #tpu.dot_dimension_numbers<[1], [0], [0], [1], [0, 0, 1, 1], [], []>} : vector<4x32xf32>, vector<32x96xf32>, vector<4x96xf32> -> vector<4x96xf32>
      %129 = vector.extract_strided_slice %127 {offsets = [0, 0], sizes = [4, 32], strides = [1, 1]} : vector<4x96xf32> to vector<4x32xf32>
      %130 = vector.extract_strided_slice %128 {offsets = [0, 0], sizes = [4, 32], strides = [1, 1]} : vector<4x96xf32> to vector<4x32xf32>
      %131 = arith.addf %129, %130 : vector<4x32xf32>
      %132 = arith.negf %131 : vector<4x32xf32>
      %133 = math.exp %132 : vector<4x32xf32>
      %cst_36 = arith.constant 1.000000e+00 : f32
      %134 = vector.broadcast %cst_36 : f32 to vector<4x32xf32>
      %135 = arith.addf %134, %133 : vector<4x32xf32>
      %136 = arith.divf %134, %135 : vector<4x32xf32>
      %137 = vector.extract_strided_slice %127 {offsets = [0, 32], sizes = [4, 32], strides = [1, 1]} : vector<4x96xf32> to vector<4x32xf32>
      %138 = vector.extract_strided_slice %128 {offsets = [0, 32], sizes = [4, 32], strides = [1, 1]} : vector<4x96xf32> to vector<4x32xf32>
      %139 = arith.addf %137, %138 : vector<4x32xf32>
      %140 = arith.negf %139 : vector<4x32xf32>
      %141 = math.exp %140 : vector<4x32xf32>
      %cst_37 = arith.constant 1.000000e+00 : f32
      %142 = vector.broadcast %cst_37 : f32 to vector<4x32xf32>
      %143 = arith.addf %142, %141 : vector<4x32xf32>
      %144 = arith.divf %142, %143 : vector<4x32xf32>
      %145 = vector.extract_strided_slice %127 {offsets = [0, 64], sizes = [4, 32], strides = [1, 1]} : vector<4x96xf32> to vector<4x32xf32>
      %146 = vector.extract_strided_slice %128 {offsets = [0, 64], sizes = [4, 32], strides = [1, 1]} : vector<4x96xf32> to vector<4x32xf32>
      %147 = vector.broadcast %12 : vector<1x32xf32> to vector<4x32xf32>
      %148 = arith.addf %146, %147 : vector<4x32xf32>
      %149 = arith.mulf %136, %148 : vector<4x32xf32>
      %150 = arith.addf %145, %149 : vector<4x32xf32>
      %151 = math.tanh %150 : vector<4x32xf32>
      %cst_38 = arith.constant 1.000000e+00 : f32
      %152 = vector.broadcast %cst_38 : f32 to vector<4x32xf32>
      %153 = arith.subf %152, %144 : vector<4x32xf32>
      %154 = arith.mulf %153, %151 : vector<4x32xf32>
      %155 = arith.mulf %144, %124 : vector<4x32xf32>
      %156 = arith.addf %154, %155 : vector<4x32xf32>
      %c0_39 = arith.constant 0 : index
      %c96 = arith.constant 96 : index
      %157 = vector.load %arg9[%c0_39, %c96] : memref<4x256xf32, #tpu.memory_space<vmem>>, vector<4x32xf32>
      tpu.vector_store %arg9[%c0_39, %c96], %156 {strides = array<i32>} : memref<4x256xf32, #tpu.memory_space<vmem>>, vector<4x32xf32>,
      %158 = vector.extract_strided_slice %10 {offsets = [0, 4, 0], sizes = [4, 1, 96], strides = [1, 1, 1]} : vector<4x8x96xf32> to vector<4x1x96xf32>
      %159 = vector.shape_cast %158 : vector<4x1x96xf32> to vector<4x96xf32>
      %cst_40 = arith.constant dense<0.000000e+00> : vector<4x96xf32>
      %160 = tpu.matmul %156, %11, %cst_40 {dimension_numbers = #tpu.dot_dimension_numbers<[1], [0], [0], [1], [0, 0, 1, 1], [], []>} : vector<4x32xf32>, vector<32x96xf32>, vector<4x96xf32> -> vector<4x96xf32>
      %161 = vector.extract_strided_slice %159 {offsets = [0, 0], sizes = [4, 32], strides = [1, 1]} : vector<4x96xf32> to vector<4x32xf32>
      %162 = vector.extract_strided_slice %160 {offsets = [0, 0], sizes = [4, 32], strides = [1, 1]} : vector<4x96xf32> to vector<4x32xf32>
      %163 = arith.addf %161, %162 : vector<4x32xf32>
      %164 = arith.negf %163 : vector<4x32xf32>
      %165 = math.exp %164 : vector<4x32xf32>
      %cst_41 = arith.constant 1.000000e+00 : f32
      %166 = vector.broadcast %cst_41 : f32 to vector<4x32xf32>
      %167 = arith.addf %166, %165 : vector<4x32xf32>
      %168 = arith.divf %166, %167 : vector<4x32xf32>
      %169 = vector.extract_strided_slice %159 {offsets = [0, 32], sizes = [4, 32], strides = [1, 1]} : vector<4x96xf32> to vector<4x32xf32>
      %170 = vector.extract_strided_slice %160 {offsets = [0, 32], sizes = [4, 32], strides = [1, 1]} : vector<4x96xf32> to vector<4x32xf32>
      %171 = arith.addf %169, %170 : vector<4x32xf32>
      %172 = arith.negf %171 : vector<4x32xf32>
      %173 = math.exp %172 : vector<4x32xf32>
      %cst_42 = arith.constant 1.000000e+00 : f32
      %174 = vector.broadcast %cst_42 : f32 to vector<4x32xf32>
      %175 = arith.addf %174, %173 : vector<4x32xf32>
      %176 = arith.divf %174, %175 : vector<4x32xf32>
      %177 = vector.extract_strided_slice %159 {offsets = [0, 64], sizes = [4, 32], strides = [1, 1]} : vector<4x96xf32> to vector<4x32xf32>
      %178 = vector.extract_strided_slice %160 {offsets = [0, 64], sizes = [4, 32], strides = [1, 1]} : vector<4x96xf32> to vector<4x32xf32>
      %179 = vector.broadcast %12 : vector<1x32xf32> to vector<4x32xf32>
      %180 = arith.addf %178, %179 : vector<4x32xf32>
      %181 = arith.mulf %168, %180 : vector<4x32xf32>
      %182 = arith.addf %177, %181 : vector<4x32xf32>
      %183 = math.tanh %182 : vector<4x32xf32>
      %cst_43 = arith.constant 1.000000e+00 : f32
      %184 = vector.broadcast %cst_43 : f32 to vector<4x32xf32>
      %185 = arith.subf %184, %176 : vector<4x32xf32>
      %186 = arith.mulf %185, %183 : vector<4x32xf32>
      %187 = arith.mulf %176, %156 : vector<4x32xf32>
      %188 = arith.addf %186, %187 : vector<4x32xf32>
      %c0_44 = arith.constant 0 : index
      %c128 = arith.constant 128 : index
      %189 = vector.load %arg9[%c0_44, %c128] : memref<4x256xf32, #tpu.memory_space<vmem>>, vector<4x32xf32>
      tpu.vector_store %arg9[%c0_44, %c128], %188 {strides = array<i32>} : memref<4x256xf32, #tpu.memory_space<vmem>>, vector<4x32xf32>,
      %190 = vector.extract_strided_slice %10 {offsets = [0, 5, 0], sizes = [4, 1, 96], strides = [1, 1, 1]} : vector<4x8x96xf32> to vector<4x1x96xf32>
      %191 = vector.shape_cast %190 : vector<4x1x96xf32> to vector<4x96xf32>
      %cst_45 = arith.constant dense<0.000000e+00> : vector<4x96xf32>
      %192 = tpu.matmul %188, %11, %cst_45 {dimension_numbers = #tpu.dot_dimension_numbers<[1], [0], [0], [1], [0, 0, 1, 1], [], []>} : vector<4x32xf32>, vector<32x96xf32>, vector<4x96xf32> -> vector<4x96xf32>
      %193 = vector.extract_strided_slice %191 {offsets = [0, 0], sizes = [4, 32], strides = [1, 1]} : vector<4x96xf32> to vector<4x32xf32>
      %194 = vector.extract_strided_slice %192 {offsets = [0, 0], sizes = [4, 32], strides = [1, 1]} : vector<4x96xf32> to vector<4x32xf32>
      %195 = arith.addf %193, %194 : vector<4x32xf32>
      %196 = arith.negf %195 : vector<4x32xf32>
      %197 = math.exp %196 : vector<4x32xf32>
      %cst_46 = arith.constant 1.000000e+00 : f32
      %198 = vector.broadcast %cst_46 : f32 to vector<4x32xf32>
      %199 = arith.addf %198, %197 : vector<4x32xf32>
      %200 = arith.divf %198, %199 : vector<4x32xf32>
      %201 = vector.extract_strided_slice %191 {offsets = [0, 32], sizes = [4, 32], strides = [1, 1]} : vector<4x96xf32> to vector<4x32xf32>
      %202 = vector.extract_strided_slice %192 {offsets = [0, 32], sizes = [4, 32], strides = [1, 1]} : vector<4x96xf32> to vector<4x32xf32>
      %203 = arith.addf %201, %202 : vector<4x32xf32>
      %204 = arith.negf %203 : vector<4x32xf32>
      %205 = math.exp %204 : vector<4x32xf32>
      %cst_47 = arith.constant 1.000000e+00 : f32
      %206 = vector.broadcast %cst_47 : f32 to vector<4x32xf32>
      %207 = arith.addf %206, %205 : vector<4x32xf32>
      %208 = arith.divf %206, %207 : vector<4x32xf32>
      %209 = vector.extract_strided_slice %191 {offsets = [0, 64], sizes = [4, 32], strides = [1, 1]} : vector<4x96xf32> to vector<4x32xf32>
      %210 = vector.extract_strided_slice %192 {offsets = [0, 64], sizes = [4, 32], strides = [1, 1]} : vector<4x96xf32> to vector<4x32xf32>
      %211 = vector.broadcast %12 : vector<1x32xf32> to vector<4x32xf32>
      %212 = arith.addf %210, %211 : vector<4x32xf32>
      %213 = arith.mulf %200, %212 : vector<4x32xf32>
      %214 = arith.addf %209, %213 : vector<4x32xf32>
      %215 = math.tanh %214 : vector<4x32xf32>
      %cst_48 = arith.constant 1.000000e+00 : f32
      %216 = vector.broadcast %cst_48 : f32 to vector<4x32xf32>
      %217 = arith.subf %216, %208 : vector<4x32xf32>
      %218 = arith.mulf %217, %215 : vector<4x32xf32>
      %219 = arith.mulf %208, %188 : vector<4x32xf32>
      %220 = arith.addf %218, %219 : vector<4x32xf32>
      %c0_49 = arith.constant 0 : index
      %c160 = arith.constant 160 : index
      %221 = vector.load %arg9[%c0_49, %c160] : memref<4x256xf32, #tpu.memory_space<vmem>>, vector<4x32xf32>
      tpu.vector_store %arg9[%c0_49, %c160], %220 {strides = array<i32>} : memref<4x256xf32, #tpu.memory_space<vmem>>, vector<4x32xf32>,
      %222 = vector.extract_strided_slice %10 {offsets = [0, 6, 0], sizes = [4, 1, 96], strides = [1, 1, 1]} : vector<4x8x96xf32> to vector<4x1x96xf32>
      %223 = vector.shape_cast %222 : vector<4x1x96xf32> to vector<4x96xf32>
      %cst_50 = arith.constant dense<0.000000e+00> : vector<4x96xf32>
      %224 = tpu.matmul %220, %11, %cst_50 {dimension_numbers = #tpu.dot_dimension_numbers<[1], [0], [0], [1], [0, 0, 1, 1], [], []>} : vector<4x32xf32>, vector<32x96xf32>, vector<4x96xf32> -> vector<4x96xf32>
      %225 = vector.extract_strided_slice %223 {offsets = [0, 0], sizes = [4, 32], strides = [1, 1]} : vector<4x96xf32> to vector<4x32xf32>
      %226 = vector.extract_strided_slice %224 {offsets = [0, 0], sizes = [4, 32], strides = [1, 1]} : vector<4x96xf32> to vector<4x32xf32>
      %227 = arith.addf %225, %226 : vector<4x32xf32>
      %228 = arith.negf %227 : vector<4x32xf32>
      %229 = math.exp %228 : vector<4x32xf32>
      %cst_51 = arith.constant 1.000000e+00 : f32
      %230 = vector.broadcast %cst_51 : f32 to vector<4x32xf32>
      %231 = arith.addf %230, %229 : vector<4x32xf32>
      %232 = arith.divf %230, %231 : vector<4x32xf32>
      %233 = vector.extract_strided_slice %223 {offsets = [0, 32], sizes = [4, 32], strides = [1, 1]} : vector<4x96xf32> to vector<4x32xf32>
      %234 = vector.extract_strided_slice %224 {offsets = [0, 32], sizes = [4, 32], strides = [1, 1]} : vector<4x96xf32> to vector<4x32xf32>
      %235 = arith.addf %233, %234 : vector<4x32xf32>
      %236 = arith.negf %235 : vector<4x32xf32>
      %237 = math.exp %236 : vector<4x32xf32>
      %cst_52 = arith.constant 1.000000e+00 : f32
      %238 = vector.broadcast %cst_52 : f32 to vector<4x32xf32>
      %239 = arith.addf %238, %237 : vector<4x32xf32>
      %240 = arith.divf %238, %239 : vector<4x32xf32>
      %241 = vector.extract_strided_slice %223 {offsets = [0, 64], sizes = [4, 32], strides = [1, 1]} : vector<4x96xf32> to vector<4x32xf32>
      %242 = vector.extract_strided_slice %224 {offsets = [0, 64], sizes = [4, 32], strides = [1, 1]} : vector<4x96xf32> to vector<4x32xf32>
      %243 = vector.broadcast %12 : vector<1x32xf32> to vector<4x32xf32>
      %244 = arith.addf %242, %243 : vector<4x32xf32>
      %245 = arith.mulf %232, %244 : vector<4x32xf32>
      %246 = arith.addf %241, %245 : vector<4x32xf32>
      %247 = math.tanh %246 : vector<4x32xf32>
      %cst_53 = arith.constant 1.000000e+00 : f32
      %248 = vector.broadcast %cst_53 : f32 to vector<4x32xf32>
      %249 = arith.subf %248, %240 : vector<4x32xf32>
      %250 = arith.mulf %249, %247 : vector<4x32xf32>
      %251 = arith.mulf %240, %220 : vector<4x32xf32>
      %252 = arith.addf %250, %251 : vector<4x32xf32>
      %c0_54 = arith.constant 0 : index
      %c192 = arith.constant 192 : index
      %253 = vector.load %arg9[%c0_54, %c192] : memref<4x256xf32, #tpu.memory_space<vmem>>, vector<4x32xf32>
      tpu.vector_store %arg9[%c0_54, %c192], %252 {strides = array<i32>} : memref<4x256xf32, #tpu.memory_space<vmem>>, vector<4x32xf32>,
      %254 = vector.extract_strided_slice %10 {offsets = [0, 7, 0], sizes = [4, 1, 96], strides = [1, 1, 1]} : vector<4x8x96xf32> to vector<4x1x96xf32>
      %255 = vector.shape_cast %254 : vector<4x1x96xf32> to vector<4x96xf32>
      %cst_55 = arith.constant dense<0.000000e+00> : vector<4x96xf32>
      %256 = tpu.matmul %252, %11, %cst_55 {dimension_numbers = #tpu.dot_dimension_numbers<[1], [0], [0], [1], [0, 0, 1, 1], [], []>} : vector<4x32xf32>, vector<32x96xf32>, vector<4x96xf32> -> vector<4x96xf32>
      %257 = vector.extract_strided_slice %255 {offsets = [0, 0], sizes = [4, 32], strides = [1, 1]} : vector<4x96xf32> to vector<4x32xf32>
      %258 = vector.extract_strided_slice %256 {offsets = [0, 0], sizes = [4, 32], strides = [1, 1]} : vector<4x96xf32> to vector<4x32xf32>
      %259 = arith.addf %257, %258 : vector<4x32xf32>
      %260 = arith.negf %259 : vector<4x32xf32>
      %261 = math.exp %260 : vector<4x32xf32>
      %cst_56 = arith.constant 1.000000e+00 : f32
      %262 = vector.broadcast %cst_56 : f32 to vector<4x32xf32>
      %263 = arith.addf %262, %261 : vector<4x32xf32>
      %264 = arith.divf %262, %263 : vector<4x32xf32>
      %265 = vector.extract_strided_slice %255 {offsets = [0, 32], sizes = [4, 32], strides = [1, 1]} : vector<4x96xf32> to vector<4x32xf32>
      %266 = vector.extract_strided_slice %256 {offsets = [0, 32], sizes = [4, 32], strides = [1, 1]} : vector<4x96xf32> to vector<4x32xf32>
      %267 = arith.addf %265, %266 : vector<4x32xf32>
      %268 = arith.negf %267 : vector<4x32xf32>
      %269 = math.exp %268 : vector<4x32xf32>
      %cst_57 = arith.constant 1.000000e+00 : f32
      %270 = vector.broadcast %cst_57 : f32 to vector<4x32xf32>
      %271 = arith.addf %270, %269 : vector<4x32xf32>
      %272 = arith.divf %270, %271 : vector<4x32xf32>
      %273 = vector.extract_strided_slice %255 {offsets = [0, 64], sizes = [4, 32], strides = [1, 1]} : vector<4x96xf32> to vector<4x32xf32>
      %274 = vector.extract_strided_slice %256 {offsets = [0, 64], sizes = [4, 32], strides = [1, 1]} : vector<4x96xf32> to vector<4x32xf32>
      %275 = vector.broadcast %12 : vector<1x32xf32> to vector<4x32xf32>
      %276 = arith.addf %274, %275 : vector<4x32xf32>
      %277 = arith.mulf %264, %276 : vector<4x32xf32>
      %278 = arith.addf %273, %277 : vector<4x32xf32>
      %279 = math.tanh %278 : vector<4x32xf32>
      %cst_58 = arith.constant 1.000000e+00 : f32
      %280 = vector.broadcast %cst_58 : f32 to vector<4x32xf32>
      %281 = arith.subf %280, %272 : vector<4x32xf32>
      %282 = arith.mulf %281, %279 : vector<4x32xf32>
      %283 = arith.mulf %272, %252 : vector<4x32xf32>
      %284 = arith.addf %282, %283 : vector<4x32xf32>
      %c0_59 = arith.constant 0 : index
      %c224 = arith.constant 224 : index
      %285 = vector.load %arg9[%c0_59, %c224] : memref<4x256xf32, #tpu.memory_space<vmem>>, vector<4x32xf32>
      tpu.vector_store %arg9[%c0_59, %c224], %284 {strides = array<i32>} : memref<4x256xf32, #tpu.memory_space<vmem>>, vector<4x32xf32>,
      %c0_60 = arith.constant 0 : index
      %c0_61 = arith.constant 0 : index
      %286 = vector.load %arg10[%c0_60, %c0_61] : memref<4x32xf32, #tpu.memory_space<vmem>>, vector<4x32xf32>
      tpu.vector_store %arg10[%c0_60, %c0_61], %284 {strides = array<i32>} : memref<4x32xf32, #tpu.memory_space<vmem>>, vector<4x32xf32>,
    } else {
    }
    %true = arith.constant true
    %27 = arith.xori %24, %true : i1
    %28 = arith.extui %27 : i1 to i32
    %c0_i32_18 = arith.constant 0 : i32
    %29 = arith.cmpi ne, %28, %c0_i32_18 : i32
    scf.if %29 {
      %30 = vector.extract_strided_slice %10 {offsets = [0, 0, 0], sizes = [4, 1, 96], strides = [1, 1, 1]} : vector<4x8x96xf32> to vector<4x1x96xf32>
      %31 = vector.shape_cast %30 : vector<4x1x96xf32> to vector<4x96xf32>
      %cst_19 = arith.constant dense<0.000000e+00> : vector<4x96xf32>
      %32 = tpu.matmul %14, %11, %cst_19 {dimension_numbers = #tpu.dot_dimension_numbers<[1], [0], [0], [1], [0, 0, 1, 1], [], []>} : vector<4x32xf32>, vector<32x96xf32>, vector<4x96xf32> -> vector<4x96xf32>
      %33 = vector.extract_strided_slice %31 {offsets = [0, 0], sizes = [4, 32], strides = [1, 1]} : vector<4x96xf32> to vector<4x32xf32>
      %34 = vector.extract_strided_slice %32 {offsets = [0, 0], sizes = [4, 32], strides = [1, 1]} : vector<4x96xf32> to vector<4x32xf32>
      %35 = arith.addf %33, %34 : vector<4x32xf32>
      %36 = arith.negf %35 : vector<4x32xf32>
      %37 = math.exp %36 : vector<4x32xf32>
      %cst_20 = arith.constant 1.000000e+00 : f32
      %38 = vector.broadcast %cst_20 : f32 to vector<4x32xf32>
      %39 = arith.addf %38, %37 : vector<4x32xf32>
      %40 = arith.divf %38, %39 : vector<4x32xf32>
      %41 = vector.extract_strided_slice %31 {offsets = [0, 32], sizes = [4, 32], strides = [1, 1]} : vector<4x96xf32> to vector<4x32xf32>
      %42 = vector.extract_strided_slice %32 {offsets = [0, 32], sizes = [4, 32], strides = [1, 1]} : vector<4x96xf32> to vector<4x32xf32>
      %43 = arith.addf %41, %42 : vector<4x32xf32>
      %44 = arith.negf %43 : vector<4x32xf32>
      %45 = math.exp %44 : vector<4x32xf32>
      %cst_21 = arith.constant 1.000000e+00 : f32
      %46 = vector.broadcast %cst_21 : f32 to vector<4x32xf32>
      %47 = arith.addf %46, %45 : vector<4x32xf32>
      %48 = arith.divf %46, %47 : vector<4x32xf32>
      %49 = vector.extract_strided_slice %31 {offsets = [0, 64], sizes = [4, 32], strides = [1, 1]} : vector<4x96xf32> to vector<4x32xf32>
      %50 = vector.extract_strided_slice %32 {offsets = [0, 64], sizes = [4, 32], strides = [1, 1]} : vector<4x96xf32> to vector<4x32xf32>
      %51 = vector.broadcast %12 : vector<1x32xf32> to vector<4x32xf32>
      %52 = arith.addf %50, %51 : vector<4x32xf32>
      %53 = arith.mulf %40, %52 : vector<4x32xf32>
      %54 = arith.addf %49, %53 : vector<4x32xf32>
      %55 = math.tanh %54 : vector<4x32xf32>
      %cst_22 = arith.constant 1.000000e+00 : f32
      %56 = vector.broadcast %cst_22 : f32 to vector<4x32xf32>
      %57 = arith.subf %56, %48 : vector<4x32xf32>
      %58 = arith.mulf %57, %55 : vector<4x32xf32>
      %59 = arith.mulf %48, %14 : vector<4x32xf32>
      %60 = arith.addf %58, %59 : vector<4x32xf32>
      %c0_i32_23 = arith.constant 0 : i32
      %61 = arith.addi %15, %c0_i32_23 : i32
      %62 = vector.broadcast %61 : i32 to vector<4x1xi32>
      %63 = arith.cmpi slt, %62, %13 : vector<4x1xi32>
      %cst_24 = arith.constant 0.000000e+00 : f32
      %64 = vector.shape_cast %63 : vector<4x1xi1> to vector<4x1xi1>
      %65 = vector.broadcast %64 : vector<4x1xi1> to vector<4x32xi1>
      %66 = vector.broadcast %cst_24 : f32 to vector<4x32xf32>
      %67 = arith.select %65, %60, %66 : vector<4x32xi1>, vector<4x32xf32>
      %c0_25 = arith.constant 0 : index
      %c0_26 = arith.constant 0 : index
      %68 = vector.load %arg9[%c0_25, %c0_26] : memref<4x256xf32, #tpu.memory_space<vmem>>, vector<4x32xf32>
      tpu.vector_store %arg9[%c0_25, %c0_26], %67 {strides = array<i32>} : memref<4x256xf32, #tpu.memory_space<vmem>>, vector<4x32xf32>,
      %69 = vector.shape_cast %63 : vector<4x1xi1> to vector<4x1xi1>
      %70 = vector.broadcast %69 : vector<4x1xi1> to vector<4x32xi1>
      %71 = arith.select %70, %60, %14 : vector<4x32xi1>, vector<4x32xf32>
      %72 = vector.extract_strided_slice %10 {offsets = [0, 1, 0], sizes = [4, 1, 96], strides = [1, 1, 1]} : vector<4x8x96xf32> to vector<4x1x96xf32>
      %73 = vector.shape_cast %72 : vector<4x1x96xf32> to vector<4x96xf32>
      %cst_27 = arith.constant dense<0.000000e+00> : vector<4x96xf32>
      %74 = tpu.matmul %71, %11, %cst_27 {dimension_numbers = #tpu.dot_dimension_numbers<[1], [0], [0], [1], [0, 0, 1, 1], [], []>} : vector<4x32xf32>, vector<32x96xf32>, vector<4x96xf32> -> vector<4x96xf32>
      %75 = vector.extract_strided_slice %73 {offsets = [0, 0], sizes = [4, 32], strides = [1, 1]} : vector<4x96xf32> to vector<4x32xf32>
      %76 = vector.extract_strided_slice %74 {offsets = [0, 0], sizes = [4, 32], strides = [1, 1]} : vector<4x96xf32> to vector<4x32xf32>
      %77 = arith.addf %75, %76 : vector<4x32xf32>
      %78 = arith.negf %77 : vector<4x32xf32>
      %79 = math.exp %78 : vector<4x32xf32>
      %cst_28 = arith.constant 1.000000e+00 : f32
      %80 = vector.broadcast %cst_28 : f32 to vector<4x32xf32>
      %81 = arith.addf %80, %79 : vector<4x32xf32>
      %82 = arith.divf %80, %81 : vector<4x32xf32>
      %83 = vector.extract_strided_slice %73 {offsets = [0, 32], sizes = [4, 32], strides = [1, 1]} : vector<4x96xf32> to vector<4x32xf32>
      %84 = vector.extract_strided_slice %74 {offsets = [0, 32], sizes = [4, 32], strides = [1, 1]} : vector<4x96xf32> to vector<4x32xf32>
      %85 = arith.addf %83, %84 : vector<4x32xf32>
      %86 = arith.negf %85 : vector<4x32xf32>
      %87 = math.exp %86 : vector<4x32xf32>
      %cst_29 = arith.constant 1.000000e+00 : f32
      %88 = vector.broadcast %cst_29 : f32 to vector<4x32xf32>
      %89 = arith.addf %88, %87 : vector<4x32xf32>
      %90 = arith.divf %88, %89 : vector<4x32xf32>
      %91 = vector.extract_strided_slice %73 {offsets = [0, 64], sizes = [4, 32], strides = [1, 1]} : vector<4x96xf32> to vector<4x32xf32>
      %92 = vector.extract_strided_slice %74 {offsets = [0, 64], sizes = [4, 32], strides = [1, 1]} : vector<4x96xf32> to vector<4x32xf32>
      %93 = vector.broadcast %12 : vector<1x32xf32> to vector<4x32xf32>
      %94 = arith.addf %92, %93 : vector<4x32xf32>
      %95 = arith.mulf %82, %94 : vector<4x32xf32>
      %96 = arith.addf %91, %95 : vector<4x32xf32>
      %97 = math.tanh %96 : vector<4x32xf32>
      %cst_30 = arith.constant 1.000000e+00 : f32
      %98 = vector.broadcast %cst_30 : f32 to vector<4x32xf32>
      %99 = arith.subf %98, %90 : vector<4x32xf32>
      %100 = arith.mulf %99, %97 : vector<4x32xf32>
      %101 = arith.mulf %90, %71 : vector<4x32xf32>
      %102 = arith.addf %100, %101 : vector<4x32xf32>
      %c1_i32 = arith.constant 1 : i32
      %103 = arith.addi %15, %c1_i32 : i32
      %104 = vector.broadcast %103 : i32 to vector<4x1xi32>
      %105 = arith.cmpi slt, %104, %13 : vector<4x1xi32>
      %cst_31 = arith.constant 0.000000e+00 : f32
      %106 = vector.shape_cast %105 : vector<4x1xi1> to vector<4x1xi1>
      %107 = vector.broadcast %106 : vector<4x1xi1> to vector<4x32xi1>
      %108 = vector.broadcast %cst_31 : f32 to vector<4x32xf32>
      %109 = arith.select %107, %102, %108 : vector<4x32xi1>, vector<4x32xf32>
      %c0_32 = arith.constant 0 : index
      %c32 = arith.constant 32 : index
      %110 = vector.load %arg9[%c0_32, %c32] : memref<4x256xf32, #tpu.memory_space<vmem>>, vector<4x32xf32>
      tpu.vector_store %arg9[%c0_32, %c32], %109 {strides = array<i32>} : memref<4x256xf32, #tpu.memory_space<vmem>>, vector<4x32xf32>,
      %111 = vector.shape_cast %105 : vector<4x1xi1> to vector<4x1xi1>
      %112 = vector.broadcast %111 : vector<4x1xi1> to vector<4x32xi1>
      %113 = arith.select %112, %102, %71 : vector<4x32xi1>, vector<4x32xf32>
      %114 = vector.extract_strided_slice %10 {offsets = [0, 2, 0], sizes = [4, 1, 96], strides = [1, 1, 1]} : vector<4x8x96xf32> to vector<4x1x96xf32>
      %115 = vector.shape_cast %114 : vector<4x1x96xf32> to vector<4x96xf32>
      %cst_33 = arith.constant dense<0.000000e+00> : vector<4x96xf32>
      %116 = tpu.matmul %113, %11, %cst_33 {dimension_numbers = #tpu.dot_dimension_numbers<[1], [0], [0], [1], [0, 0, 1, 1], [], []>} : vector<4x32xf32>, vector<32x96xf32>, vector<4x96xf32> -> vector<4x96xf32>
      %117 = vector.extract_strided_slice %115 {offsets = [0, 0], sizes = [4, 32], strides = [1, 1]} : vector<4x96xf32> to vector<4x32xf32>
      %118 = vector.extract_strided_slice %116 {offsets = [0, 0], sizes = [4, 32], strides = [1, 1]} : vector<4x96xf32> to vector<4x32xf32>
      %119 = arith.addf %117, %118 : vector<4x32xf32>
      %120 = arith.negf %119 : vector<4x32xf32>
      %121 = math.exp %120 : vector<4x32xf32>
      %cst_34 = arith.constant 1.000000e+00 : f32
      %122 = vector.broadcast %cst_34 : f32 to vector<4x32xf32>
      %123 = arith.addf %122, %121 : vector<4x32xf32>
      %124 = arith.divf %122, %123 : vector<4x32xf32>
      %125 = vector.extract_strided_slice %115 {offsets = [0, 32], sizes = [4, 32], strides = [1, 1]} : vector<4x96xf32> to vector<4x32xf32>
      %126 = vector.extract_strided_slice %116 {offsets = [0, 32], sizes = [4, 32], strides = [1, 1]} : vector<4x96xf32> to vector<4x32xf32>
      %127 = arith.addf %125, %126 : vector<4x32xf32>
      %128 = arith.negf %127 : vector<4x32xf32>
      %129 = math.exp %128 : vector<4x32xf32>
      %cst_35 = arith.constant 1.000000e+00 : f32
      %130 = vector.broadcast %cst_35 : f32 to vector<4x32xf32>
      %131 = arith.addf %130, %129 : vector<4x32xf32>
      %132 = arith.divf %130, %131 : vector<4x32xf32>
      %133 = vector.extract_strided_slice %115 {offsets = [0, 64], sizes = [4, 32], strides = [1, 1]} : vector<4x96xf32> to vector<4x32xf32>
      %134 = vector.extract_strided_slice %116 {offsets = [0, 64], sizes = [4, 32], strides = [1, 1]} : vector<4x96xf32> to vector<4x32xf32>
      %135 = vector.broadcast %12 : vector<1x32xf32> to vector<4x32xf32>
      %136 = arith.addf %134, %135 : vector<4x32xf32>
      %137 = arith.mulf %124, %136 : vector<4x32xf32>
      %138 = arith.addf %133, %137 : vector<4x32xf32>
      %139 = math.tanh %138 : vector<4x32xf32>
      %cst_36 = arith.constant 1.000000e+00 : f32
      %140 = vector.broadcast %cst_36 : f32 to vector<4x32xf32>
      %141 = arith.subf %140, %132 : vector<4x32xf32>
      %142 = arith.mulf %141, %139 : vector<4x32xf32>
      %143 = arith.mulf %132, %113 : vector<4x32xf32>
      %144 = arith.addf %142, %143 : vector<4x32xf32>
      %c2_i32 = arith.constant 2 : i32
      %145 = arith.addi %15, %c2_i32 : i32
      %146 = vector.broadcast %145 : i32 to vector<4x1xi32>
      %147 = arith.cmpi slt, %146, %13 : vector<4x1xi32>
      %cst_37 = arith.constant 0.000000e+00 : f32
      %148 = vector.shape_cast %147 : vector<4x1xi1> to vector<4x1xi1>
      %149 = vector.broadcast %148 : vector<4x1xi1> to vector<4x32xi1>
      %150 = vector.broadcast %cst_37 : f32 to vector<4x32xf32>
      %151 = arith.select %149, %144, %150 : vector<4x32xi1>, vector<4x32xf32>
      %c0_38 = arith.constant 0 : index
      %c64 = arith.constant 64 : index
      %152 = vector.load %arg9[%c0_38, %c64] : memref<4x256xf32, #tpu.memory_space<vmem>>, vector<4x32xf32>
      tpu.vector_store %arg9[%c0_38, %c64], %151 {strides = array<i32>} : memref<4x256xf32, #tpu.memory_space<vmem>>, vector<4x32xf32>,
      %153 = vector.shape_cast %147 : vector<4x1xi1> to vector<4x1xi1>
      %154 = vector.broadcast %153 : vector<4x1xi1> to vector<4x32xi1>
      %155 = arith.select %154, %144, %113 : vector<4x32xi1>, vector<4x32xf32>
      %156 = vector.extract_strided_slice %10 {offsets = [0, 3, 0], sizes = [4, 1, 96], strides = [1, 1, 1]} : vector<4x8x96xf32> to vector<4x1x96xf32>
      %157 = vector.shape_cast %156 : vector<4x1x96xf32> to vector<4x96xf32>
      %cst_39 = arith.constant dense<0.000000e+00> : vector<4x96xf32>
      %158 = tpu.matmul %155, %11, %cst_39 {dimension_numbers = #tpu.dot_dimension_numbers<[1], [0], [0], [1], [0, 0, 1, 1], [], []>} : vector<4x32xf32>, vector<32x96xf32>, vector<4x96xf32> -> vector<4x96xf32>
      %159 = vector.extract_strided_slice %157 {offsets = [0, 0], sizes = [4, 32], strides = [1, 1]} : vector<4x96xf32> to vector<4x32xf32>
      %160 = vector.extract_strided_slice %158 {offsets = [0, 0], sizes = [4, 32], strides = [1, 1]} : vector<4x96xf32> to vector<4x32xf32>
      %161 = arith.addf %159, %160 : vector<4x32xf32>
      %162 = arith.negf %161 : vector<4x32xf32>
      %163 = math.exp %162 : vector<4x32xf32>
      %cst_40 = arith.constant 1.000000e+00 : f32
      %164 = vector.broadcast %cst_40 : f32 to vector<4x32xf32>
      %165 = arith.addf %164, %163 : vector<4x32xf32>
      %166 = arith.divf %164, %165 : vector<4x32xf32>
      %167 = vector.extract_strided_slice %157 {offsets = [0, 32], sizes = [4, 32], strides = [1, 1]} : vector<4x96xf32> to vector<4x32xf32>
      %168 = vector.extract_strided_slice %158 {offsets = [0, 32], sizes = [4, 32], strides = [1, 1]} : vector<4x96xf32> to vector<4x32xf32>
      %169 = arith.addf %167, %168 : vector<4x32xf32>
      %170 = arith.negf %169 : vector<4x32xf32>
      %171 = math.exp %170 : vector<4x32xf32>
      %cst_41 = arith.constant 1.000000e+00 : f32
      %172 = vector.broadcast %cst_41 : f32 to vector<4x32xf32>
      %173 = arith.addf %172, %171 : vector<4x32xf32>
      %174 = arith.divf %172, %173 : vector<4x32xf32>
      %175 = vector.extract_strided_slice %157 {offsets = [0, 64], sizes = [4, 32], strides = [1, 1]} : vector<4x96xf32> to vector<4x32xf32>
      %176 = vector.extract_strided_slice %158 {offsets = [0, 64], sizes = [4, 32], strides = [1, 1]} : vector<4x96xf32> to vector<4x32xf32>
      %177 = vector.broadcast %12 : vector<1x32xf32> to vector<4x32xf32>
      %178 = arith.addf %176, %177 : vector<4x32xf32>
      %179 = arith.mulf %166, %178 : vector<4x32xf32>
      %180 = arith.addf %175, %179 : vector<4x32xf32>
      %181 = math.tanh %180 : vector<4x32xf32>
      %cst_42 = arith.constant 1.000000e+00 : f32
      %182 = vector.broadcast %cst_42 : f32 to vector<4x32xf32>
      %183 = arith.subf %182, %174 : vector<4x32xf32>
      %184 = arith.mulf %183, %181 : vector<4x32xf32>
      %185 = arith.mulf %174, %155 : vector<4x32xf32>
      %186 = arith.addf %184, %185 : vector<4x32xf32>
      %c3_i32 = arith.constant 3 : i32
      %187 = arith.addi %15, %c3_i32 : i32
      %188 = vector.broadcast %187 : i32 to vector<4x1xi32>
      %189 = arith.cmpi slt, %188, %13 : vector<4x1xi32>
      %cst_43 = arith.constant 0.000000e+00 : f32
      %190 = vector.shape_cast %189 : vector<4x1xi1> to vector<4x1xi1>
      %191 = vector.broadcast %190 : vector<4x1xi1> to vector<4x32xi1>
      %192 = vector.broadcast %cst_43 : f32 to vector<4x32xf32>
      %193 = arith.select %191, %186, %192 : vector<4x32xi1>, vector<4x32xf32>
      %c0_44 = arith.constant 0 : index
      %c96 = arith.constant 96 : index
      %194 = vector.load %arg9[%c0_44, %c96] : memref<4x256xf32, #tpu.memory_space<vmem>>, vector<4x32xf32>
      tpu.vector_store %arg9[%c0_44, %c96], %193 {strides = array<i32>} : memref<4x256xf32, #tpu.memory_space<vmem>>, vector<4x32xf32>,
      %195 = vector.shape_cast %189 : vector<4x1xi1> to vector<4x1xi1>
      %196 = vector.broadcast %195 : vector<4x1xi1> to vector<4x32xi1>
      %197 = arith.select %196, %186, %155 : vector<4x32xi1>, vector<4x32xf32>
      %198 = vector.extract_strided_slice %10 {offsets = [0, 4, 0], sizes = [4, 1, 96], strides = [1, 1, 1]} : vector<4x8x96xf32> to vector<4x1x96xf32>
      %199 = vector.shape_cast %198 : vector<4x1x96xf32> to vector<4x96xf32>
      %cst_45 = arith.constant dense<0.000000e+00> : vector<4x96xf32>
      %200 = tpu.matmul %197, %11, %cst_45 {dimension_numbers = #tpu.dot_dimension_numbers<[1], [0], [0], [1], [0, 0, 1, 1], [], []>} : vector<4x32xf32>, vector<32x96xf32>, vector<4x96xf32> -> vector<4x96xf32>
      %201 = vector.extract_strided_slice %199 {offsets = [0, 0], sizes = [4, 32], strides = [1, 1]} : vector<4x96xf32> to vector<4x32xf32>
      %202 = vector.extract_strided_slice %200 {offsets = [0, 0], sizes = [4, 32], strides = [1, 1]} : vector<4x96xf32> to vector<4x32xf32>
      %203 = arith.addf %201, %202 : vector<4x32xf32>
      %204 = arith.negf %203 : vector<4x32xf32>
      %205 = math.exp %204 : vector<4x32xf32>
      %cst_46 = arith.constant 1.000000e+00 : f32
      %206 = vector.broadcast %cst_46 : f32 to vector<4x32xf32>
      %207 = arith.addf %206, %205 : vector<4x32xf32>
      %208 = arith.divf %206, %207 : vector<4x32xf32>
      %209 = vector.extract_strided_slice %199 {offsets = [0, 32], sizes = [4, 32], strides = [1, 1]} : vector<4x96xf32> to vector<4x32xf32>
      %210 = vector.extract_strided_slice %200 {offsets = [0, 32], sizes = [4, 32], strides = [1, 1]} : vector<4x96xf32> to vector<4x32xf32>
      %211 = arith.addf %209, %210 : vector<4x32xf32>
      %212 = arith.negf %211 : vector<4x32xf32>
      %213 = math.exp %212 : vector<4x32xf32>
      %cst_47 = arith.constant 1.000000e+00 : f32
      %214 = vector.broadcast %cst_47 : f32 to vector<4x32xf32>
      %215 = arith.addf %214, %213 : vector<4x32xf32>
      %216 = arith.divf %214, %215 : vector<4x32xf32>
      %217 = vector.extract_strided_slice %199 {offsets = [0, 64], sizes = [4, 32], strides = [1, 1]} : vector<4x96xf32> to vector<4x32xf32>
      %218 = vector.extract_strided_slice %200 {offsets = [0, 64], sizes = [4, 32], strides = [1, 1]} : vector<4x96xf32> to vector<4x32xf32>
      %219 = vector.broadcast %12 : vector<1x32xf32> to vector<4x32xf32>
      %220 = arith.addf %218, %219 : vector<4x32xf32>
      %221 = arith.mulf %208, %220 : vector<4x32xf32>
      %222 = arith.addf %217, %221 : vector<4x32xf32>
      %223 = math.tanh %222 : vector<4x32xf32>
      %cst_48 = arith.constant 1.000000e+00 : f32
      %224 = vector.broadcast %cst_48 : f32 to vector<4x32xf32>
      %225 = arith.subf %224, %216 : vector<4x32xf32>
      %226 = arith.mulf %225, %223 : vector<4x32xf32>
      %227 = arith.mulf %216, %197 : vector<4x32xf32>
      %228 = arith.addf %226, %227 : vector<4x32xf32>
      %c4_i32 = arith.constant 4 : i32
      %229 = arith.addi %15, %c4_i32 : i32
      %230 = vector.broadcast %229 : i32 to vector<4x1xi32>
      %231 = arith.cmpi slt, %230, %13 : vector<4x1xi32>
      %cst_49 = arith.constant 0.000000e+00 : f32
      %232 = vector.shape_cast %231 : vector<4x1xi1> to vector<4x1xi1>
      %233 = vector.broadcast %232 : vector<4x1xi1> to vector<4x32xi1>
      %234 = vector.broadcast %cst_49 : f32 to vector<4x32xf32>
      %235 = arith.select %233, %228, %234 : vector<4x32xi1>, vector<4x32xf32>
      %c0_50 = arith.constant 0 : index
      %c128 = arith.constant 128 : index
      %236 = vector.load %arg9[%c0_50, %c128] : memref<4x256xf32, #tpu.memory_space<vmem>>, vector<4x32xf32>
      tpu.vector_store %arg9[%c0_50, %c128], %235 {strides = array<i32>} : memref<4x256xf32, #tpu.memory_space<vmem>>, vector<4x32xf32>,
      %237 = vector.shape_cast %231 : vector<4x1xi1> to vector<4x1xi1>
      %238 = vector.broadcast %237 : vector<4x1xi1> to vector<4x32xi1>
      %239 = arith.select %238, %228, %197 : vector<4x32xi1>, vector<4x32xf32>
      %240 = vector.extract_strided_slice %10 {offsets = [0, 5, 0], sizes = [4, 1, 96], strides = [1, 1, 1]} : vector<4x8x96xf32> to vector<4x1x96xf32>
      %241 = vector.shape_cast %240 : vector<4x1x96xf32> to vector<4x96xf32>
      %cst_51 = arith.constant dense<0.000000e+00> : vector<4x96xf32>
      %242 = tpu.matmul %239, %11, %cst_51 {dimension_numbers = #tpu.dot_dimension_numbers<[1], [0], [0], [1], [0, 0, 1, 1], [], []>} : vector<4x32xf32>, vector<32x96xf32>, vector<4x96xf32> -> vector<4x96xf32>
      %243 = vector.extract_strided_slice %241 {offsets = [0, 0], sizes = [4, 32], strides = [1, 1]} : vector<4x96xf32> to vector<4x32xf32>
      %244 = vector.extract_strided_slice %242 {offsets = [0, 0], sizes = [4, 32], strides = [1, 1]} : vector<4x96xf32> to vector<4x32xf32>
      %245 = arith.addf %243, %244 : vector<4x32xf32>
      %246 = arith.negf %245 : vector<4x32xf32>
      %247 = math.exp %246 : vector<4x32xf32>
      %cst_52 = arith.constant 1.000000e+00 : f32
      %248 = vector.broadcast %cst_52 : f32 to vector<4x32xf32>
      %249 = arith.addf %248, %247 : vector<4x32xf32>
      %250 = arith.divf %248, %249 : vector<4x32xf32>
      %251 = vector.extract_strided_slice %241 {offsets = [0, 32], sizes = [4, 32], strides = [1, 1]} : vector<4x96xf32> to vector<4x32xf32>
      %252 = vector.extract_strided_slice %242 {offsets = [0, 32], sizes = [4, 32], strides = [1, 1]} : vector<4x96xf32> to vector<4x32xf32>
      %253 = arith.addf %251, %252 : vector<4x32xf32>
      %254 = arith.negf %253 : vector<4x32xf32>
      %255 = math.exp %254 : vector<4x32xf32>
      %cst_53 = arith.constant 1.000000e+00 : f32
      %256 = vector.broadcast %cst_53 : f32 to vector<4x32xf32>
      %257 = arith.addf %256, %255 : vector<4x32xf32>
      %258 = arith.divf %256, %257 : vector<4x32xf32>
      %259 = vector.extract_strided_slice %241 {offsets = [0, 64], sizes = [4, 32], strides = [1, 1]} : vector<4x96xf32> to vector<4x32xf32>
      %260 = vector.extract_strided_slice %242 {offsets = [0, 64], sizes = [4, 32], strides = [1, 1]} : vector<4x96xf32> to vector<4x32xf32>
      %261 = vector.broadcast %12 : vector<1x32xf32> to vector<4x32xf32>
      %262 = arith.addf %260, %261 : vector<4x32xf32>
      %263 = arith.mulf %250, %262 : vector<4x32xf32>
      %264 = arith.addf %259, %263 : vector<4x32xf32>
      %265 = math.tanh %264 : vector<4x32xf32>
      %cst_54 = arith.constant 1.000000e+00 : f32
      %266 = vector.broadcast %cst_54 : f32 to vector<4x32xf32>
      %267 = arith.subf %266, %258 : vector<4x32xf32>
      %268 = arith.mulf %267, %265 : vector<4x32xf32>
      %269 = arith.mulf %258, %239 : vector<4x32xf32>
      %270 = arith.addf %268, %269 : vector<4x32xf32>
      %c5_i32 = arith.constant 5 : i32
      %271 = arith.addi %15, %c5_i32 : i32
      %272 = vector.broadcast %271 : i32 to vector<4x1xi32>
      %273 = arith.cmpi slt, %272, %13 : vector<4x1xi32>
      %cst_55 = arith.constant 0.000000e+00 : f32
      %274 = vector.shape_cast %273 : vector<4x1xi1> to vector<4x1xi1>
      %275 = vector.broadcast %274 : vector<4x1xi1> to vector<4x32xi1>
      %276 = vector.broadcast %cst_55 : f32 to vector<4x32xf32>
      %277 = arith.select %275, %270, %276 : vector<4x32xi1>, vector<4x32xf32>
      %c0_56 = arith.constant 0 : index
      %c160 = arith.constant 160 : index
      %278 = vector.load %arg9[%c0_56, %c160] : memref<4x256xf32, #tpu.memory_space<vmem>>, vector<4x32xf32>
      tpu.vector_store %arg9[%c0_56, %c160], %277 {strides = array<i32>} : memref<4x256xf32, #tpu.memory_space<vmem>>, vector<4x32xf32>,
      %279 = vector.shape_cast %273 : vector<4x1xi1> to vector<4x1xi1>
      %280 = vector.broadcast %279 : vector<4x1xi1> to vector<4x32xi1>
      %281 = arith.select %280, %270, %239 : vector<4x32xi1>, vector<4x32xf32>
      %282 = vector.extract_strided_slice %10 {offsets = [0, 6, 0], sizes = [4, 1, 96], strides = [1, 1, 1]} : vector<4x8x96xf32> to vector<4x1x96xf32>
      %283 = vector.shape_cast %282 : vector<4x1x96xf32> to vector<4x96xf32>
      %cst_57 = arith.constant dense<0.000000e+00> : vector<4x96xf32>
      %284 = tpu.matmul %281, %11, %cst_57 {dimension_numbers = #tpu.dot_dimension_numbers<[1], [0], [0], [1], [0, 0, 1, 1], [], []>} : vector<4x32xf32>, vector<32x96xf32>, vector<4x96xf32> -> vector<4x96xf32>
      %285 = vector.extract_strided_slice %283 {offsets = [0, 0], sizes = [4, 32], strides = [1, 1]} : vector<4x96xf32> to vector<4x32xf32>
      %286 = vector.extract_strided_slice %284 {offsets = [0, 0], sizes = [4, 32], strides = [1, 1]} : vector<4x96xf32> to vector<4x32xf32>
      %287 = arith.addf %285, %286 : vector<4x32xf32>
      %288 = arith.negf %287 : vector<4x32xf32>
      %289 = math.exp %288 : vector<4x32xf32>
      %cst_58 = arith.constant 1.000000e+00 : f32
      %290 = vector.broadcast %cst_58 : f32 to vector<4x32xf32>
      %291 = arith.addf %290, %289 : vector<4x32xf32>
      %292 = arith.divf %290, %291 : vector<4x32xf32>
      %293 = vector.extract_strided_slice %283 {offsets = [0, 32], sizes = [4, 32], strides = [1, 1]} : vector<4x96xf32> to vector<4x32xf32>
      %294 = vector.extract_strided_slice %284 {offsets = [0, 32], sizes = [4, 32], strides = [1, 1]} : vector<4x96xf32> to vector<4x32xf32>
      %295 = arith.addf %293, %294 : vector<4x32xf32>
      %296 = arith.negf %295 : vector<4x32xf32>
      %297 = math.exp %296 : vector<4x32xf32>
      %cst_59 = arith.constant 1.000000e+00 : f32
      %298 = vector.broadcast %cst_59 : f32 to vector<4x32xf32>
      %299 = arith.addf %298, %297 : vector<4x32xf32>
      %300 = arith.divf %298, %299 : vector<4x32xf32>
      %301 = vector.extract_strided_slice %283 {offsets = [0, 64], sizes = [4, 32], strides = [1, 1]} : vector<4x96xf32> to vector<4x32xf32>
      %302 = vector.extract_strided_slice %284 {offsets = [0, 64], sizes = [4, 32], strides = [1, 1]} : vector<4x96xf32> to vector<4x32xf32>
      %303 = vector.broadcast %12 : vector<1x32xf32> to vector<4x32xf32>
      %304 = arith.addf %302, %303 : vector<4x32xf32>
      %305 = arith.mulf %292, %304 : vector<4x32xf32>
      %306 = arith.addf %301, %305 : vector<4x32xf32>
      %307 = math.tanh %306 : vector<4x32xf32>
      %cst_60 = arith.constant 1.000000e+00 : f32
      %308 = vector.broadcast %cst_60 : f32 to vector<4x32xf32>
      %309 = arith.subf %308, %300 : vector<4x32xf32>
      %310 = arith.mulf %309, %307 : vector<4x32xf32>
      %311 = arith.mulf %300, %281 : vector<4x32xf32>
      %312 = arith.addf %310, %311 : vector<4x32xf32>
      %c6_i32 = arith.constant 6 : i32
      %313 = arith.addi %15, %c6_i32 : i32
      %314 = vector.broadcast %313 : i32 to vector<4x1xi32>
      %315 = arith.cmpi slt, %314, %13 : vector<4x1xi32>
      %cst_61 = arith.constant 0.000000e+00 : f32
      %316 = vector.shape_cast %315 : vector<4x1xi1> to vector<4x1xi1>
      %317 = vector.broadcast %316 : vector<4x1xi1> to vector<4x32xi1>
      %318 = vector.broadcast %cst_61 : f32 to vector<4x32xf32>
      %319 = arith.select %317, %312, %318 : vector<4x32xi1>, vector<4x32xf32>
      %c0_62 = arith.constant 0 : index
      %c192 = arith.constant 192 : index
      %320 = vector.load %arg9[%c0_62, %c192] : memref<4x256xf32, #tpu.memory_space<vmem>>, vector<4x32xf32>
      tpu.vector_store %arg9[%c0_62, %c192], %319 {strides = array<i32>} : memref<4x256xf32, #tpu.memory_space<vmem>>, vector<4x32xf32>,
      %321 = vector.shape_cast %315 : vector<4x1xi1> to vector<4x1xi1>
      %322 = vector.broadcast %321 : vector<4x1xi1> to vector<4x32xi1>
      %323 = arith.select %322, %312, %281 : vector<4x32xi1>, vector<4x32xf32>
      %324 = vector.extract_strided_slice %10 {offsets = [0, 7, 0], sizes = [4, 1, 96], strides = [1, 1, 1]} : vector<4x8x96xf32> to vector<4x1x96xf32>
      %325 = vector.shape_cast %324 : vector<4x1x96xf32> to vector<4x96xf32>
      %cst_63 = arith.constant dense<0.000000e+00> : vector<4x96xf32>
      %326 = tpu.matmul %323, %11, %cst_63 {dimension_numbers = #tpu.dot_dimension_numbers<[1], [0], [0], [1], [0, 0, 1, 1], [], []>} : vector<4x32xf32>, vector<32x96xf32>, vector<4x96xf32> -> vector<4x96xf32>
      %327 = vector.extract_strided_slice %325 {offsets = [0, 0], sizes = [4, 32], strides = [1, 1]} : vector<4x96xf32> to vector<4x32xf32>
      %328 = vector.extract_strided_slice %326 {offsets = [0, 0], sizes = [4, 32], strides = [1, 1]} : vector<4x96xf32> to vector<4x32xf32>
      %329 = arith.addf %327, %328 : vector<4x32xf32>
      %330 = arith.negf %329 : vector<4x32xf32>
      %331 = math.exp %330 : vector<4x32xf32>
      %cst_64 = arith.constant 1.000000e+00 : f32
      %332 = vector.broadcast %cst_64 : f32 to vector<4x32xf32>
      %333 = arith.addf %332, %331 : vector<4x32xf32>
      %334 = arith.divf %332, %333 : vector<4x32xf32>
      %335 = vector.extract_strided_slice %325 {offsets = [0, 32], sizes = [4, 32], strides = [1, 1]} : vector<4x96xf32> to vector<4x32xf32>
      %336 = vector.extract_strided_slice %326 {offsets = [0, 32], sizes = [4, 32], strides = [1, 1]} : vector<4x96xf32> to vector<4x32xf32>
      %337 = arith.addf %335, %336 : vector<4x32xf32>
      %338 = arith.negf %337 : vector<4x32xf32>
      %339 = math.exp %338 : vector<4x32xf32>
      %cst_65 = arith.constant 1.000000e+00 : f32
      %340 = vector.broadcast %cst_65 : f32 to vector<4x32xf32>
      %341 = arith.addf %340, %339 : vector<4x32xf32>
      %342 = arith.divf %340, %341 : vector<4x32xf32>
      %343 = vector.extract_strided_slice %325 {offsets = [0, 64], sizes = [4, 32], strides = [1, 1]} : vector<4x96xf32> to vector<4x32xf32>
      %344 = vector.extract_strided_slice %326 {offsets = [0, 64], sizes = [4, 32], strides = [1, 1]} : vector<4x96xf32> to vector<4x32xf32>
      %345 = vector.broadcast %12 : vector<1x32xf32> to vector<4x32xf32>
      %346 = arith.addf %344, %345 : vector<4x32xf32>
      %347 = arith.mulf %334, %346 : vector<4x32xf32>
      %348 = arith.addf %343, %347 : vector<4x32xf32>
      %349 = math.tanh %348 : vector<4x32xf32>
      %cst_66 = arith.constant 1.000000e+00 : f32
      %350 = vector.broadcast %cst_66 : f32 to vector<4x32xf32>
      %351 = arith.subf %350, %342 : vector<4x32xf32>
      %352 = arith.mulf %351, %349 : vector<4x32xf32>
      %353 = arith.mulf %342, %323 : vector<4x32xf32>
      %354 = arith.addf %352, %353 : vector<4x32xf32>
      %c7_i32 = arith.constant 7 : i32
      %355 = arith.addi %15, %c7_i32 : i32
      %356 = vector.broadcast %355 : i32 to vector<4x1xi32>
      %357 = arith.cmpi slt, %356, %13 : vector<4x1xi32>
      %cst_67 = arith.constant 0.000000e+00 : f32
      %358 = vector.shape_cast %357 : vector<4x1xi1> to vector<4x1xi1>
      %359 = vector.broadcast %358 : vector<4x1xi1> to vector<4x32xi1>
      %360 = vector.broadcast %cst_67 : f32 to vector<4x32xf32>
      %361 = arith.select %359, %354, %360 : vector<4x32xi1>, vector<4x32xf32>
      %c0_68 = arith.constant 0 : index
      %c224 = arith.constant 224 : index
      %362 = vector.load %arg9[%c0_68, %c224] : memref<4x256xf32, #tpu.memory_space<vmem>>, vector<4x32xf32>
      tpu.vector_store %arg9[%c0_68, %c224], %361 {strides = array<i32>} : memref<4x256xf32, #tpu.memory_space<vmem>>, vector<4x32xf32>,
      %363 = vector.shape_cast %357 : vector<4x1xi1> to vector<4x1xi1>
      %364 = vector.broadcast %363 : vector<4x1xi1> to vector<4x32xi1>
      %365 = arith.select %364, %354, %323 : vector<4x32xi1>, vector<4x32xf32>
      %c0_69 = arith.constant 0 : index
      %c0_70 = arith.constant 0 : index
      %366 = vector.load %arg10[%c0_69, %c0_70] : memref<4x32xf32, #tpu.memory_space<vmem>>, vector<4x32xf32>
      tpu.vector_store %arg10[%c0_69, %c0_70], %365 {strides = array<i32>} : memref<4x32xf32, #tpu.memory_space<vmem>>, vector<4x32xf32>,
    } else {
    }
    return
  }
  func.func @transform_0(%arg0: i32, %arg1: memref<4xi32, #tpu.memory_space<smem>>) -> (i32, i32, i32) {
    %c0_i32 = arith.constant 0 : i32
    %c0_i32_0 = arith.constant 0 : i32
    %c0_i32_1 = arith.constant 0 : i32
    return %c0_i32, %arg0, %c0_i32_0 : i32, i32, i32
  }
  func.func @transform_1(%arg0: i32, %arg1: memref<4xi32, #tpu.memory_space<smem>>) -> (i32, i32) {
    %c0_i32 = arith.constant 0 : i32
    %c0_i32_0 = arith.constant 0 : i32
    %c0_i32_1 = arith.constant 0 : i32
    return %c0_i32, %c0_i32_0 : i32, i32
  }
  func.func @transform_2(%arg0: i32, %arg1: memref<4xi32, #tpu.memory_space<smem>>) -> (i32, i32) {
    %c0_i32 = arith.constant 0 : i32
    %c0_i32_0 = arith.constant 0 : i32
    %c0_i32_1 = arith.constant 0 : i32
    return %c0_i32, %c0_i32_0 : i32, i32
  }
  func.func @transform_3(%arg0: i32, %arg1: memref<4xi32, #tpu.memory_space<smem>>) -> (i32, i32) {
    %c0_i32 = arith.constant 0 : i32
    %c0_i32_0 = arith.constant 0 : i32
    %c0_i32_1 = arith.constant 0 : i32
    return %c0_i32, %c0_i32_0 : i32, i32
  }
  func.func @transform_4(%arg0: i32, %arg1: memref<4xi32, #tpu.memory_space<smem>>) -> (i32, i32) {
    %c0_i32 = arith.constant 0 : i32
    %c0_i32_0 = arith.constant 0 : i32
    %c0_i32_1 = arith.constant 0 : i32
    return %c0_i32, %c0_i32_0 : i32, i32
  }
  func.func @transform_5(%arg0: i32, %arg1: memref<4xi32, #tpu.memory_space<smem>>) -> (i32, i32) {
    %c0_i32 = arith.constant 0 : i32
    %c0_i32_0 = arith.constant 0 : i32
    %c0_i32_1 = arith.constant 0 : i32
    return %c0_i32, %c0_i32_0 : i32, i32
  }
  func.func @transform_6(%arg0: i32, %arg1: memref<4xi32, #tpu.memory_space<smem>>) -> (i32, i32) {
    %c0_i32 = arith.constant 0 : i32
    %c0_i32_0 = arith.constant 0 : i32
    %c0_i32_1 = arith.constant 0 : i32
    return %c0_i32, %c0_i32_0 : i32, i32
  }
  func.func @transform_7(%arg0: i32, %arg1: memref<4xi32, #tpu.memory_space<smem>>) -> (i32, i32) {
    %c0_i32 = arith.constant 0 : i32
    %c0_i32_0 = arith.constant 0 : i32
    return %c0_i32, %arg0 : i32, i32
  }
  func.func @transform_8(%arg0: i32, %arg1: memref<4xi32, #tpu.memory_space<smem>>) -> (i32, i32) {
    %c0_i32 = arith.constant 0 : i32
    %c0_i32_0 = arith.constant 0 : i32
    %c0_i32_1 = arith.constant 0 : i32
    return %c0_i32, %c0_i32_0 : i32, i32
  }
}

</mosaic_0001>

<bundles_post_ra>
// kernel: gru_pallas.1
= control target key start
LH: loop header
LB: loop body
LE: loop exit
PB: predicated region body
PF: predicated region fallthrough
CT: control target
= control target key end

     0   :  { %s5942_s0 = inlined_call_operand.vmem [shape: s32[4], index: 0, kind: input, shape index: {}]   ;;  %s5943_s1 = inlined_call_operand.hbm [shape: f32[4,8,16], index: 1, kind: input, shape index: {}]   ;;  %s5944_s2 = inlined_call_operand.vmem [shape: f32[16,96], index: 2, kind: input, shape index: {}]   ;;  %s5945_s3 = inlined_call_operand.hbm [shape: f32[32,96], index: 3, kind: input, shape index: {}]   ;;  %s5946_s4 = inlined_call_operand.vmem [shape: f32[1,96], index: 4, kind: input, shape index: {}]   ;;  %s5947_s5 = inlined_call_operand.vmem [shape: f32[1,32], index: 5, kind: input, shape index: {}]   ;;  %s5948_s6 = inlined_call_operand.vmem [shape: f32[4,32], index: 6, kind: input, shape index: {}]   ;;  %s5949_s7 = inlined_call_operand.vmem [shape: s32[4,1], index: 7, kind: input, shape index: {}]   ;;  %s5950_s8 = inlined_call_operand.vmem [shape: f32[4,256], index: 8, kind: output, shape index: {0}]   ;;  %s5951_s9 = inlined_call_operand.hbm [shape: f32[4,32], index: 9, kind: output, shape index: {1}]  }
   0x1   :  { %s15_s11 = sshll.u32 %s5942_s0, 4  ;;  %s16_s11 = int_to_ptr.vmem [resolvable:$true] %s15_s11 }
   0x2   :  { %s4644_s12 = scalar_lea.vmem %s16_s11, 16  ;;  %p4649_p1 = scmp.lt.s32.totalorder %s16_s11, %s16_s11 }
   0x3   :  { %p4645_p0 = scmp.ne.s32.totalorder %s16_s11, %s4644_s12  ;;  %p4650_p2 = scmp.lt.s32.totalorder %s4644_s12, %s4644_s12 }
   0x5   :  { %p4651_p3 = por %p4650_p2, %p4649_p1 }
   0x7   :  { %p4652_p4 = pnand %p4651_p3, %p4645_p0 }
   0x9   :  { %4655 = shalt.err (!%p4652_p4)  }
   0xa   :  { %s4724_s13 = smov [#allocation3]  }
   0xb   :  { %18 = dma.vmem_to_smem %s16_s11, 16, %s4724_s13, [#allocation2] }
   0xc   :  { %4716 = dma.done.wait [#allocation2], 16 }
   0xd   :  { %4717 = vsyncadd [#allocation2], 4294967280 }
   0xe   :  { %20 = sfence }
   0xf   :  { %21 = vsyncpa [#allocation5], 0 }
  0x10   :  { %22 = vsyncpa [#allocation8], 0 }
  0x11   :  { %23 = vsyncpa [#allocation6], 0  ;;  %s4725_s14 = smov [#allocation4]  }
  0x12   :  { %s29_s15 = sshll.u32 %s4725_s14, 4  ;;  %s30_s15 = int_to_ptr.vmem [resolvable:$true] %s29_s15 }
  0x13   :  { %s4664_s0 = scalar_lea.vmem %s30_s15, 512  ;;  %p4669_p6 = scmp.lt.s32.totalorder %s30_s15, %s30_s15 }
  0x14   :  { %p4665_p5 = scmp.ne.s32.totalorder %s30_s15, %s4664_s0  ;;  %p4670_p7 = scmp.lt.s32.totalorder %s4664_s0, %s4664_s0 }
  0x16   :  { %p4671_p8 = por %p4670_p7, %p4669_p6 }
  0x18   :  { %p4672_p9 = pnand %p4671_p8, %p4665_p5 }
  0x1a   :  { %4675 = shalt.err (!%p4672_p9)
}
  0x1b   :  { %s4726_s16 = smov 128   ;;  %s4727_s17 = smov 8  }
  0x1c   :  { %35 = dma.hbm_to_vmem [thread:$0]  %s5943_s1, 512, %s30_s15, [#allocation5], %s4726_s16, %s4726_s16, %s4727_s17  }
  0x1d   :  { %s4728_s20 = smov [#allocation7]  }
  0x1e   :  { %s43_s21 = sshll.u32 %s4728_s20, 4  ;;  %s44_s21 = int_to_ptr.vmem [resolvable:$true] %s43_s21 }
  0x1f   :  { %s4684_s22 = scalar_lea.vmem %s44_s21, 512  ;;  %p4689_p11 = scmp.lt.s32.totalorder %s44_s21, %s44_s21 }
  0x20   :  { %p4685_p10 = scmp.ne.s32.totalorder %s44_s21, %s4684_s22  ;;  %p4690_p12 = scmp.lt.s32.totalorder %s4684_s22, %s4684_s22 }
  0x22   :  { %p4691_p13 = por %p4690_p12, %p4689_p11 }
  0x24   :  { %p4692_p0 = pnand %p4691_p13, %p4685_p10 }
  0x26   :  { %4695 = shalt.err (!%p4692_p0)
}
  0x27   :  { %49 = dma.hbm_to_vmem [thread:$0]  %s5945_s3, 512, %s44_s21, [#allocation8], %s4726_s16, %s4726_s16, %s4727_s17  }
  0x28   :  { %4718 = dma.done.wait [#allocation5], 512  }
  0x29   :  { %4719 = vsyncadd [#allocation5], 4294966784 }
  0x2a   :  { %4720 = dma.done.wait [#allocation8], 512  }
  0x2b   :  { %4721 = vsyncadd [#allocation8], 4294966784  ;;  %s190_s25 = sld [smem:[#allocation3]]  ;;  %vm69_vm0 = vcmask 257024   ;;  %v68_v0 = vld [vmem:[%s5948_s6] sm:$0xf] }
  0x2c   :  { %s3872_s1 = sld [smem:[#allocation3 + $0x1]]  ;;  %v4805_v1 = vld [vmem:[#allocation7] sm:$0xff]  ;;  %v4807_v2 = vld [vmem:[#allocation7 + $0x8] sm:$0xff]  ;;  %70 = vst.msk [vmem:[#allocation9] sm:$0xf] %vm69_vm0, %v68_v0  ;;  %v4810_v3 = vld [vmem:[#allocation7 + $0x10] sm:$0xff] }
  0x2d   :  { %s4800_s26 = sld [smem:[#allocation3 + $0x2]]  ;;  %v4812_v4 = vld [vmem:[#allocation7 + $0x18] sm:$0xff]  ;;  %v4817_v5 = vld [vmem:[%s5947_s5] sm:$0x1]  ;;  %v76_v7 = vld [vmem:[%s5944_s2 + $0x8] sm:$0xff]  ;;  %vm84_vm1 = vcmask 130048  }
  0x2e   :  { %s3874_s30 = sld [smem:[#allocation3 + $0x3]]  ;;  %v4822_v6 = vld [vmem:[%s5949_s7] sm:$0xf]  ;;  %4051 = vmatprep.subr.mxu0 %v76_v7  ;;  %4237 = vmatprep.subr.mxu1 %v76_v7  ;;  %v73_v10 = vld [vmem:[#allocation4 + $0x10] sm:$0xff]  ;;  %v72_v11 = vld [vmem:[#allocation4 + $0x8] sm:$0xff] }
  0x2f   :  { %v75_v8 = vld [vmem:[%s5944_s2] sm:$0xff]  ;;  %4052 = vmatpush3.msra.mxu0 %v76_v7  ;;  %4239 = vmatpush3.msra.mxu1 %v76_v7  ;;  %v74_v12 = vld [vmem:[#allocation4 + $0x18] sm:$0xff] }
  0x30   :  { %v71_v9 = vld [vmem:[#allocation4] sm:$0xff]  ;;  %4053 = vmatprep.subr.mxu0 %v75_v8  ;;  %4238 = vmatprep.subr.mxu1 %v75_v8 }
  0x31   :  { %4054 = vmatpush3.msra.mxu0 %v75_v8  ;;  %4240 = vmatpush3.msra.mxu1 %v75_v8  ;;  %v3867_v14 = vld [vmem:[%s5946_s4] ss:$0 sm:$0xff] }
  0x32   :  { %p192_p1 = scmp.lt.s32.totalorder %s190_s25, %s3872_s1  ;;  %4055 = vmatprep.mubr.msk.f32.mxu0 %vm84_vm1, %v71_v9  ;;  %4058 = vmatprep.mubr.msk.f32.mxu1 %vm84_vm1, %v73_v10 }
  0x33   :  { %v4832_v13 = vld [vmem:[#allocation9] sm:$0xf]  ;;  %4056 = vmatmul.mubr.msk.f32.vlgmr.msra.gmra.mxu0 %vm84_vm1, %v72_v11  ;;  %4059 = vmatmul.mubr.msk.f32.vlgmr.msra.gmra.mxu1 %vm84_vm1, %v74_v12 }
  0x34   :  { %s5953_s25 = smov (!%p192_p1, %s190_s25), %s3872_s1 }
  0x35   :  { %p195_p2 = scmp.lt.s32.totalorder %s5953_s25, %s4800_s26 }
  0x37   :  { %s5955_s25 = smov (!%p195_p2, %s5953_s25), %s4800_s26 }
  0x38   :  { %p198_p3 = scmp.lt.s32.totalorder %s5955_s25, %s3874_s30 }
  0x3a   :  { %s5957_s25 = smov (!%p198_p3, %s5955_s25), %s3874_s30 }
  0x3b   :  { %p3875_p4 = scmp.lt.s32.totalorder %s5957_s25, 8 }
  0x3c   :  { %s4731_s4 = smov (!%p3875_p4), 64   ;;  %s4732_s7 = smov (!%p3875_p4), 32  }
  0x3d   :  { %s4733_s15 = smov (!%p3875_p4), 96  }
  0xf2   :  { %204 = sbr.rel (%p3875_p4) target bundleno = 5778 (0x1692), region = 45 }
  0xf3   :  { %v4057_v15 = vpop.f32.mrf.mxu0  ;;  %v4060_v16 = vpop.f32.mrf.mxu1 }
  0xf4   :  { %v4839_v17 = vadd.f32 %v4057_v15, %v3867_v14  ;;  %v4841_v18 = vadd.f32 %v4060_v16, %v3867_v14 }
  0xf5   :  { %v163_v19 = vpop.f32.mrf.mxu0  ;;  %v173_v20 = vpop.f32.mrf.mxu1 }
  0xf6   :  { %v4843_v21 = vadd.f32 %v3867_v14, %v163_v19  ;;  %v4845_v22 = vadd.f32 %v3867_v14, %v173_v20 }
  0xf7   :  { %v316_v23 = vlaneseq  ;;  %v4729_v24 = vmov 0.0   ;;  %vm4730_vm2 = vmmov 0   ;;  %vm205_vm3 = vcmask 261120  }
  0xf8   :  { %4061 = vmatprep.subr.mxu0 %v4729_v24  ;;  %4069 = vmatprep.mubr.msk.f32.mxu0 %vm4730_vm2, %v4729_v24  ;;  %v392_v8 = vrot.slane %v4832_v13, 1  ;;  %v393_v9 = vrot.slane %v4832_v13, 2  ;;  %vm420_vm4 = vcmask 1041409   ;;  %vm422_vm5 = vcmask 1045509  }
  0xf9   :  { %4062 = vmatpush3.msra.mxu0 %v4812_v4  ;;  %v317_v25 = vshrl.u32 %v316_v23, 7  ;;  %4072 = vmatprep.subr.mxu1 %v4729_v24  ;;  %vm425_vm6 = vcmask 1042434   ;;  %vm430_vm7 = vcmask 1043459   ;;  %vm427_vm8 = vcmask 1046534  }
  0xfa   :  { %4063 = vmatprep.subr.mxu0 %v4729_v24  ;;  %4073 = vmatpush3.msra.mxu1 %v4812_v4  ;;  %vm432_vm9 = vcmask 1047559   ;;  %vm649_vm10 = vcmask 519424   ;;  %vm863_vm11 = vcmask 781824   ;;  %vm1077_vm12 = vcmask 1044224  }
  0xfb   :  { %4064 = vmatpush3.msra.mxu0 %v4810_v3  ;;  %v318_v26 = vsub.s32 0, %v317_v25  ;;  %4074 = vmatprep.subr.mxu1 %v4729_v24  ;;  %vm1983_vm13 = vcmask 261127   ;;  %vm1985_vm14 = vcmask 256000  }
  0xfc   :  { %4065 = vmatprep.subr.mxu0 %v4729_v24  ;;  %4075 = vmatpush3.msra.mxu1 %v4810_v3 }
  0xfd   :  { %4066 = vmatpush3.msra.mxu0 %v4807_v2  ;;  %v319_v27 = vrot.slane %v4817_v5, %v318_v26  ;;  %4076 = vmatprep.subr.mxu1 %v4729_v24  ;;  %v394_v26 = vrot.slane %v4832_v13, 3 }
  0xfe   :  { %4067 = vmatprep.subr.mxu0 %v4729_v24  ;;  %4077 = vmatpush3.msra.mxu1 %v4807_v2 }
  0xff   :  { %4068 = vmatpush3.msra.mxu0 %v4805_v1  ;;  %320 = vrot.lane.b32.xlu0 %v319_v27, %s4731_s4 }
 0x100   :  { %4070 = vmatmul.mubr.msk.f32.vlgmr.msra.gmra.mxu0 %vm205_vm3, %v4832_v13  ;;  %4078 = vmatprep.subr.mxu1 %v4729_v24 }
 0x101   :  { %4079 = vmatpush3.msra.mxu1 %v4805_v1  ;;  %4080 = vmatprep.mubr.msk.f32.mxu1 %vm4730_vm2, %v4729_v24 }
 0x102   :  { %4083 = vmatprep.subr.mxu0 %v4729_v24  ;;  %4091 = vmatprep.mubr.msk.f32.mxu0 %vm4730_vm2, %v4729_v24 }
 0x103   :  { %4084 = vmatpush3.msra.mxu0 %v4812_v4  ;;  %4094 = vmatprep.subr.mxu1 %v4729_v24 }
 0x104   :  { %4085 = vmatprep.subr.mxu0 %v4729_v24 }
 0x105   :  { %4086 = vmatpush3.msra.mxu0 %v4810_v3 }
 0x106   :  { %4087 = vmatprep.subr.mxu0 %v4729_v24 }
 0x107   :  { %4088 = vmatpush3.msra.mxu0 %v4807_v2 }
 0x108   :  { %4089 = vmatprep.subr.mxu0 %v4729_v24 }
 0x109   :  { %4090 = vmatpush3.msra.mxu0 %v4805_v1 }
 0x10a   :  { %4105 = vmatprep.subr.mxu0 %v4729_v24 }
 0x171   :  { %v4884_v28 = vpop.permute.xlu0 %320 }
 0x1c0   :  { %v275_v29 = vpop.f32.mrf.mxu0 }
 0x1c1   :  { %v323_v30 = vadd.f32 %v4884_v28, %v275_v29  ;;  %v280_v35 = vrot.slane %v275_v29, 1  ;;  %v281_v36 = vrot.slane %v275_v29, 2  ;;  %v282_v38 = vrot.slane %v275_v29, 3 }
 0x1c2   :  { %v4071_v31 = vpop.f32.mrf.mxu0  ;;  %v287_v40 = vadd.f32 %v275_v29, %v4843_v21 }
 0x1c3   :  { %v326_v32 = vrot.slane %v323_v30, 2  ;;  %v325_v33 = vrot.slane %v323_v30, 1  ;;  %v327_v34 = vrot.slane %v323_v30, 3  ;;  %v288_v37 = vadd.f32 %v280_v35, %v4839_v17 }
 0x1c4   :  { %v289_v39 = vadd.f32 %v281_v36, %v4845_v22  ;;  %v290_v42 = vadd.f32 %v282_v38, %v4841_v18  ;;  %v3877_v44 = vmul.f32 -1.442695, %v287_v40 }
 0x1c5   :  { %332 = vrot.lane.b32.xlu1 %v326_v32, %s4731_s4  ;;  %330 = vrot.lane.b32.xlu0 %v325_v33, %s4731_s4  ;;  %v3878_v41 = vmul.f32 -1.442695, %v288_v37 }
 0x1c6   :  { %v3879_v43 = vmul.f32 -1.442695, %v289_v39  ;;  %v3880_v45 = vmul.f32 -1.442695, %v290_v42 }
 0x1c7   :  { %4258 = vpow2.f32 %v3878_v41 }
 0x1c8   :  { %4260 = vpow2.f32 %v3879_v43 }
 0x1c9   :  { %328 = vrot.lane.b32.xlu1 %v323_v30, %s4731_s4  ;;  %334 = vrot.lane.b32.xlu0 %v327_v34, %s4731_s4  ;;  %4262 = vpow2.f32 %v3877_v44 }
 0x1ca   :  { %4264 = vpow2.f32 %v3880_v45 }
 0x1d4   :  { %v4259_v46 = vpop.eup %4258 }
 0x1d5   :  { %v4261_v47 = vpop.eup %4260  ;;  %v304_v48 = vadd.f32 1.0, %v4259_v46 }
 0x1d6   :  { %v4263_v49 = vpop.eup %4262  ;;  %v305_v50 = vadd.f32 1.0, %v4261_v47 }
 0x1d7   :  { %v4265_v51 = vpop.eup %4264  ;;  %v303_v52 = vadd.f32 1.0, %v4263_v49  ;;  %4266 = vrcp.f32 %v304_v48 }
 0x1d8   :  { %v306_v53 = vadd.f32 1.0, %v4265_v51  ;;  %4268 = vrcp.f32 %v305_v50 }
 0x1d9   :  { %4270 = vrcp.f32 %v303_v52 }
 0x1da   :  { %4272 = vrcp.f32 %v306_v53 }
 0x1e4   :  { %v4267_v54 = vpop.eup %4266 }
 0x1e5   :  { %v4269_v55 = vpop.eup %4268  ;;  %v369_v35 = vsub.f32 1.0, %v4267_v54 }
 0x1e6   :  { %v4271_v60 = vpop.eup %4270  ;;  %v370_v38 = vsub.f32 1.0, %v4269_v55 }
 0x1e7   :  { %v4273_v61 = vpop.eup %4272  ;;  %v368_v46 = vsub.f32 1.0, %v4271_v60 }
 0x1e8   :  { %v371_v41 = vsub.f32 1.0, %v4273_v61 }
 0x237   :  { %v333_v56 = vpop.permute.xlu1 %332  ;;  %v331_v57 = vpop.permute.xlu0 %330 }
 0x238   :  { %v342_v58 = vmul.f32 %v4269_v55, %v333_v56  ;;  %v341_v59 = vmul.f32 %v4267_v54, %v331_v57 }
 0x23a   :  { %352 = vrot.lane.b32.xlu0 %v342_v58, %s4731_s4  ;;  %350 = vrot.lane.b32.xlu1 %v341_v59, %s4731_s4 }
 0x23b   :  { %v329_v62 = vpop.permute.xlu1 %328  ;;  %v335_v63 = vpop.permute.xlu0 %334 }
 0x23c   :  { %v340_v0 = vmul.f32 %v4271_v60, %v329_v62  ;;  %v343_v7 = vmul.f32 %v4273_v61, %v335_v63 }
 0x23e   :  { %354 = vrot.lane.b32.xlu0 %v343_v7, %s4731_s4  ;;  %348 = vrot.lane.b32.xlu1 %v340_v0, %s4731_s4 }
 0x242   :  { %397 = vrot.lane.b32.xlu0 %v392_v8, %s4732_s7 }
 0x246   :  { %399 = vrot.lane.b32.xlu0 %v393_v9, %s4732_s7 }
 0x2ac   :  { %v353_v10 = vpop.permute.xlu0 %352  ;;  %v351_v11 = vpop.permute.xlu1 %350 }
 0x2ad   :  { %v361_v19 = vadd.f32 %v351_v11, %v4839_v17  ;;  %v362_v20 = vadd.f32 %v353_v10, %v4845_v22 }
 0x2b0   :  { %v355_v12 = vpop.permute.xlu0 %354  ;;  %v349_v14 = vpop.permute.xlu1 %348 }
 0x2b1   :  { %v363_v15 = vadd.f32 %v355_v12, %v4841_v18  ;;  %v360_v16 = vadd.f32 %v349_v14, %v4843_v21 }
 0x2b3   :  { %4274 = vtanh.f32 %v363_v15 }
 0x2b4   :  { %4276 = vtanh.f32 %v360_v16  ;;  %v398_v30 = vpop.permute.xlu0 %397 }
 0x2b5   :  { %4278 = vtanh.f32 %v361_v19  ;;  %v408_v40 = vmul.f32 %v4267_v54, %v398_v30 }
 0x2b6   :  { %4280 = vtanh.f32 %v362_v20 }
 0x2b8   :  { %v400_v31 = vpop.permute.xlu0 %399 }
 0x2b9   :  { %v409_v44 = vmul.f32 %v4269_v55, %v400_v31 }
 0x2c0   :  { %v4275_v23 = vpop.eup %4274 }
 0x2c1   :  { %v4277_v25 = vpop.eup %4276  ;;  %382 = vrot.lane.b32.xlu0 %v4275_v23, %s4733_s15 }
 0x2c2   :  { %376 = vrot.lane.b32.xlu1 %v4277_v25, %s4733_s15  ;;  %v4279_v27 = vpop.eup %4278 }
 0x2c3   :  { %v4281_v29 = vpop.eup %4280 }
 0x2c5   :  { %401 = vrot.lane.b32.xlu0 %v394_v26, %s4732_s7 }
 0x2c6   :  { %378 = vrot.lane.b32.xlu1 %v4279_v27, %s4733_s15 }
 0x2ca   :  { %380 = vrot.lane.b32.xlu1 %v4281_v29, %s4733_s15 }
 0x2ce   :  { %395 = vrot.lane.b32.xlu1 %v4832_v13, %s4732_s7 }
 0x333   :  { %v383_v32 = vpop.permute.xlu0 %382 }
 0x334   :  { %v377_v33 = vpop.permute.xlu1 %376  ;;  %v391_v45 = vmul.f32 %v383_v32, %v371_v41 }
 0x335   :  { %v388_v50 = vmul.f32 %v377_v33, %v368_v46 }
 0x337   :  { %v402_v36 = vpop.permute.xlu0 %401 }
 0x338   :  { %v379_v34 = vpop.permute.xlu1 %378  ;;  %v410_v42 = vmul.f32 %v4273_v61, %v402_v36 }
 0x339   :  { %v389_v37 = vmul.f32 %v379_v34, %v369_v35 }
 0x33a   :  { %v4917_v51 = vadd.f32 %v410_v42, %v391_v45 }
 0x33b   :  { %v412_v47 = vadd.f32 %v408_v40, %v389_v37 }
 0x33c   :  { %v381_v39 = vpop.permute.xlu1 %380  ;;  %v429_v55 = vrot.slane %v4917_v51, 5 }
 0x33d   :  { %v390_v43 = vmul.f32 %v381_v39, %v370_v38  ;;  %v4919_v53 = vrot.slane %v412_v47, 7 }
 0x33f   :  { %v4915_v48 = vadd.f32 %v409_v44, %v390_v43 }
 0x340   :  { %v396_v49 = vpop.permute.xlu1 %395 }
 0x341   :  { %v407_v52 = vmul.f32 %v4271_v60, %v396_v49  ;;  %v424_v54 = vrot.slane %v4915_v48, 6 }
 0x343   :  { %v4921_v56 = vadd.f32 %v407_v52, %v388_v50 }
 0x345   :  { %v421_v57 = vsel %vm420_vm4, %v4919_v53, %v4921_v56 }
 0x346   :  { %v439_v58 = vsel %vm425_vm6, %v424_v54, %v421_v57  ;;  %v423_v59 = vsel %vm422_vm5, %v4919_v53, %v421_v57 }
 0x347   :  { %v440_v60 = vsel %vm430_vm7, %v429_v55, %v439_v58  ;;  %v426_v61 = vsel %vm425_vm6, %v424_v54, %v423_v59 }
 0x348   :  { %441 = vrot.lane.b32.xlu1 %v440_v60, %s4733_s15  ;;  %v428_v62 = vsel %vm427_vm8, %v424_v54, %v426_v61 }
 0x349   :  { %v431_v63 = vsel %vm430_vm7, %v429_v55, %v428_v62 }
 0x34a   :  { %v4937_v0 = vsel %vm432_vm9, %v429_v55, %v431_v63 }
 0x3ba   :  { %v442_v7 = vpop.permute.xlu1 %441 }
 0x3bb   :  { %4081 = vmatmul.mubr.msk.f32.vlgmr.msra.gmra.mxu1 %vm205_vm3, %v442_v7 }
 0x3bc   :  { %4095 = vmatpush3.msra.mxu1 %v4812_v4  ;;  %4102 = vmatprep.mubr.msk.f32.mxu1 %vm4730_vm2, %v4729_v24 }
 0x3bd   :  { %4096 = vmatprep.subr.mxu1 %v4729_v24 }
 0x3be   :  { %4097 = vmatpush3.msra.mxu1 %v4810_v3 }
 0x3bf   :  { %4098 = vmatprep.subr.mxu1 %v4729_v24 }
 0x3c0   :  { %4099 = vmatpush3.msra.mxu1 %v4807_v2 }
 0x3c1   :  { %4100 = vmatprep.subr.mxu1 %v4729_v24 }
 0x3c2   :  { %4101 = vmatpush3.msra.mxu1 %v4805_v1 }
 0x3c3   :  { %4116 = vmatprep.subr.mxu1 %v4729_v24 }
 0x47b   :  { %v511_v8 = vpop.f32.mrf.mxu1 }
 0x47c   :  { %v551_v9 = vadd.f32 %v511_v8, %v4884_v28  ;;  %v516_v15 = vrot.slane %v511_v8, 7  ;;  %v517_v16 = vrot.slane %v511_v8, 1  ;;  %v518_v20 = vrot.slane %v511_v8, 2 }
 0x47d   :  { %v4082_v10 = vpop.f32.mrf.mxu1  ;;  %v524_v25 = vadd.f32 %v511_v8, %v4839_v17 }
 0x47e   :  { %v554_v11 = vrot.slane %v551_v9, 1  ;;  %v553_v12 = vrot.slane %v551_v9, 7  ;;  %v555_v14 = vrot.slane %v551_v9, 2  ;;  %v523_v19 = vadd.f32 %v516_v15, %v4843_v21 }
 0x47f   :  { %v525_v23 = vadd.f32 %v517_v16, %v4845_v22  ;;  %v526_v27 = vadd.f32 %v518_v20, %v4841_v18  ;;  %v3883_v30 = vmul.f32 -1.442695, %v524_v25  ;;  %v621_v16 = vrot.slane %v4915_v48, 7 }
 0x480   :  { %560 = vrot.lane.b32.xlu1 %v554_v11, %s4731_s4  ;;  %556 = vrot.lane.b32.xlu0 %v553_v12, %s4731_s4  ;;  %v3882_v26 = vmul.f32 -1.442695, %v523_v19  ;;  %v620_v12 = vrot.slane %v4921_v56, 7 }
 0x481   :  { %v3884_v29 = vmul.f32 -1.442695, %v525_v23  ;;  %v3885_v31 = vmul.f32 -1.442695, %v526_v27 }
 0x482   :  { %4282 = vpow2.f32 %v3882_v26  ;;  %v622_v26 = vrot.slane %v4917_v51, 7 }
 0x483   :  { %4284 = vpow2.f32 %v3884_v29 }
 0x484   :  { %562 = vrot.lane.b32.xlu1 %v555_v14, %s4731_s4  ;;  %558 = vrot.lane.b32.xlu0 %v551_v9, %s4731_s4  ;;  %4286 = vpow2.f32 %v3883_v30 }
 0x485   :  { %4288 = vpow2.f32 %v3885_v31 }
 0x48f   :  { %v4283_v32 = vpop.eup %4282 }
 0x490   :  { %v4285_v33 = vpop.eup %4284  ;;  %v539_v34 = vadd.f32 1.0, %v4283_v32 }
 0x491   :  { %v4287_v35 = vpop.eup %4286  ;;  %v541_v36 = vadd.f32 1.0, %v4285_v33 }
 0x492   :  { %v4289_v37 = vpop.eup %4288  ;;  %v540_v38 = vadd.f32 1.0, %v4287_v35  ;;  %4290 = vrcp.f32 %v539_v34 }
 0x493   :  { %v542_v39 = vadd.f32 1.0, %v4289_v37  ;;  %4292 = vrcp.f32 %v541_v36 }
 0x494   :  { %4294 = vrcp.f32 %v540_v38 }
 0x495   :  { %4296 = vrcp.f32 %v542_v39 }
 0x49f   :  { %v4291_v40 = vpop.eup %4290 }
 0x4a0   :  { %v4293_v41 = vpop.eup %4292  ;;  %v596_v15 = vsub.f32 1.0, %v4291_v40  ;;  %v627_v23 = vmul.f32 %v4291_v40, %v620_v12 }
 0x4a1   :  { %v4295_v46 = vpop.eup %4294  ;;  %v598_v11 = vsub.f32 1.0, %v4293_v41  ;;  %v629_v27 = vmul.f32 %v4293_v41, %v621_v16 }
 0x4a2   :  { %v4297_v47 = vpop.eup %4296  ;;  %v597_v32 = vsub.f32 1.0, %v4295_v46  ;;  %v628_v36 = vmul.f32 %v4295_v46, %v4919_v53 }
 0x4a3   :  { %v599_v29 = vsub.f32 1.0, %v4297_v47  ;;  %v630_v34 = vmul.f32 %v4297_v47, %v622_v26 }
 0x4f2   :  { %v561_v42 = vpop.permute.xlu1 %560  ;;  %v557_v43 = vpop.permute.xlu0 %556 }
 0x4f3   :  { %v570_v44 = vmul.f32 %v4293_v41, %v561_v42  ;;  %v568_v45 = vmul.f32 %v4291_v40, %v557_v43 }
 0x4f5   :  { %580 = vrot.lane.b32.xlu1 %v570_v44, %s4731_s4  ;;  %576 = vrot.lane.b32.xlu0 %v568_v45, %s4731_s4 }
 0x4f6   :  { %v563_v49 = vpop.permute.xlu1 %562  ;;  %v559_v50 = vpop.permute.xlu0 %558 }
 0x4f7   :  { %v571_v52 = vmul.f32 %v4297_v47, %v563_v49  ;;  %v569_v54 = vmul.f32 %v4295_v46, %v559_v50 }
 0x4f9   :  { %582 = vrot.lane.b32.xlu1 %v571_v52, %s4731_s4  ;;  %578 = vrot.lane.b32.xlu0 %v569_v54, %s4731_s4 }
 0x567   :  { %v581_v55 = vpop.permute.xlu1 %580  ;;  %v577_v57 = vpop.permute.xlu0 %576 }
 0x568   :  { %v590_v58 = vadd.f32 %v581_v55, %v4845_v22  ;;  %v588_v59 = vadd.f32 %v577_v57, %v4843_v21 }
 0x56a   :  { %4298 = vtanh.f32 %v590_v58 }
 0x56b   :  { %4300 = vtanh.f32 %v588_v59  ;;  %v583_v60 = vpop.permute.xlu1 %582  ;;  %v579_v61 = vpop.permute.xlu0 %578 }
 0x56c   :  { %v591_v62 = vadd.f32 %v583_v60, %v4841_v18  ;;  %v589_v63 = vadd.f32 %v579_v61, %v4839_v17 }
 0x56e   :  { %4302 = vtanh.f32 %v591_v62 }
 0x56f   :  { %4304 = vtanh.f32 %v589_v63 }
 0x577   :  { %v4299_v7 = vpop.eup %4298 }
 0x578   :  { %v4301_v8 = vpop.eup %4300  ;;  %608 = vrot.lane.b32.xlu1 %v4299_v7, %s4733_s15 }
 0x579   :  { %604 = vrot.lane.b32.xlu0 %v4301_v8, %s4733_s15 }
 0x57b   :  { %v4303_v9 = vpop.eup %4302 }
 0x57c   :  { %v4305_v10 = vpop.eup %4304  ;;  %610 = vrot.lane.b32.xlu1 %v4303_v9, %s4733_s15 }
 0x57d   :  { %606 = vrot.lane.b32.xlu0 %v4305_v10, %s4733_s15 }
 0x5ea   :  { %v609_v14 = vpop.permute.xlu1 %608 }
 0x5eb   :  { %v618_v19 = vmul.f32 %v609_v14, %v598_v11  ;;  %v605_v20 = vpop.permute.xlu0 %604 }
 0x5ec   :  { %v616_v25 = vmul.f32 %v605_v20, %v596_v15 }
 0x5ed   :  { %v633_v33 = vadd.f32 %v629_v27, %v618_v19 }
 0x5ee   :  { %v4974_v30 = vadd.f32 %v627_v23, %v616_v25  ;;  %v611_v31 = vpop.permute.xlu1 %610 }
 0x5ef   :  { %v619_v35 = vmul.f32 %v611_v31, %v599_v29  ;;  %v607_v56 = vpop.permute.xlu0 %606  ;;  %v4982_v51 = vrot.slane %v633_v33, 7 }
 0x5f0   :  { %v617_v37 = vmul.f32 %v607_v56, %v597_v32  ;;  %v639_v38 = vrot.slane %v4974_v30, 1 }
 0x5f1   :  { %v4977_v48 = vadd.f32 %v630_v34, %v619_v35 }
 0x5f2   :  { %v4980_v39 = vadd.f32 %v628_v36, %v617_v37 }
 0x5f3   :  { %v645_v40 = vrot.slane %v4977_v48, 6 }
 0x5f4   :  { %v640_v41 = vsel %vm420_vm4, %v4980_v39, %v639_v38 }
 0x5f5   :  { %v651_v42 = vsel %vm425_vm6, %v4982_v51, %v640_v41  ;;  %v641_v53 = vsel %vm422_vm5, %v4980_v39, %v640_v41 }
 0x5f6   :  { %v652_v43 = vsel %vm430_vm7, %v645_v40, %v651_v42  ;;  %v643_v44 = vsel %vm425_vm6, %v4982_v51, %v641_v53 }
 0x5f7   :  { %653 = vrot.lane.b32.xlu0 %v652_v43, %s4733_s15  ;;  %v644_v45 = vsel %vm427_vm8, %v4982_v51, %v643_v44 }
 0x5f8   :  { %v646_v46 = vsel %vm430_vm7, %v645_v40, %v644_v45 }
 0x5f9   :  { %v4999_v47 = vsel %vm432_vm9, %v645_v40, %v646_v46 }
 0x669   :  { %v654_v49 = vpop.permute.xlu0 %653 }
 0x66a   :  { %4092 = vmatmul.mubr.msk.f32.vlgmr.msra.gmra.mxu0 %vm205_vm3, %v654_v49 }
 0x66b   :  { %4106 = vmatpush3.msra.mxu0 %v4812_v4  ;;  %4113 = vmatprep.mubr.msk.f32.mxu0 %vm4730_vm2, %v4729_v24 }
 0x66c   :  { %4107 = vmatprep.subr.mxu0 %v4729_v24 }
 0x66d   :  { %4108 = vmatpush3.msra.mxu0 %v4810_v3 }
 0x66e   :  { %4109 = vmatprep.subr.mxu0 %v4729_v24 }
 0x66f   :  { %4110 = vmatpush3.msra.mxu0 %v4807_v2 }
 0x670   :  { %4111 = vmatprep.subr.mxu0 %v4729_v24 }
 0x671   :  { %4112 = vmatpush3.msra.mxu0 %v4805_v1 }
 0x672   :  { %4127 = vmatprep.subr.mxu0 %v4729_v24 }
 0x72a   :  { %v723_v50 = vpop.f32.mrf.mxu0 }
 0x72b   :  { %v763_v52 = vadd.f32 %v723_v50, %v4884_v28  ;;  %v728_v59 = vrot.slane %v723_v50, 6  ;;  %v729_v60 = vrot.slane %v723_v50, 7  ;;  %v730_v62 = vrot.slane %v723_v50, 1 }
 0x72c   :  { %v4093_v54 = vpop.f32.mrf.mxu0  ;;  %v737_v7 = vadd.f32 %v723_v50, %v4845_v22 }
 0x72d   :  { %v766_v55 = vrot.slane %v763_v52, 7  ;;  %v765_v57 = vrot.slane %v763_v52, 6  ;;  %v767_v58 = vrot.slane %v763_v52, 1  ;;  %v735_v61 = vadd.f32 %v728_v59, %v4843_v21 }
 0x72e   :  { %v736_v63 = vadd.f32 %v729_v60, %v4839_v17  ;;  %v738_v9 = vadd.f32 %v730_v62, %v4841_v18  ;;  %v3889_v11 = vmul.f32 -1.442695, %v737_v7  ;;  %v832_v59 = vrot.slane %v4974_v30, 7 }
 0x72f   :  { %770 = vrot.lane.b32.xlu0 %v766_v55, %s4731_s4  ;;  %768 = vrot.lane.b32.xlu1 %v765_v57, %s4731_s4  ;;  %v3887_v8 = vmul.f32 -1.442695, %v735_v61 }
 0x730   :  { %v3888_v10 = vmul.f32 -1.442695, %v736_v63  ;;  %v3890_v12 = vmul.f32 -1.442695, %v738_v9 }
 0x731   :  { %4306 = vpow2.f32 %v3887_v8 }
 0x732   :  { %4308 = vpow2.f32 %v3888_v10 }
 0x733   :  { %772 = vrot.lane.b32.xlu0 %v763_v52, %s4731_s4  ;;  %774 = vrot.lane.b32.xlu1 %v767_v58, %s4731_s4  ;;  %4310 = vpow2.f32 %v3889_v11  ;;  %v833_v58 = vrot.slane %v4980_v39, 7 }
 0x734   :  { %4312 = vpow2.f32 %v3890_v12  ;;  %v834_v12 = vrot.slane %v4977_v48, 7 }
 0x73e   :  { %v4307_v14 = vpop.eup %4306 }
 0x73f   :  { %v4309_v15 = vpop.eup %4308  ;;  %v751_v16 = vadd.f32 1.0, %v4307_v14 }
 0x740   :  { %v4311_v19 = vpop.eup %4310  ;;  %v752_v20 = vadd.f32 1.0, %v4309_v15 }
 0x741   :  { %v4313_v23 = vpop.eup %4312  ;;  %v753_v25 = vadd.f32 1.0, %v4311_v19  ;;  %4314 = vrcp.f32 %v751_v16 }
 0x742   :  { %v754_v26 = vadd.f32 1.0, %v4313_v23  ;;  %4316 = vrcp.f32 %v752_v20 }
 0x743   :  { %4318 = vrcp.f32 %v753_v25 }
 0x744   :  { %4320 = vrcp.f32 %v754_v26 }
 0x74e   :  { %v4315_v27 = vpop.eup %4314 }
 0x74f   :  { %v4317_v29 = vpop.eup %4316  ;;  %v808_v61 = vsub.f32 1.0, %v4315_v27  ;;  %v839_v8 = vmul.f32 %v4315_v27, %v832_v59 }
 0x750   :  { %v4319_v35 = vpop.eup %4318  ;;  %v809_v57 = vsub.f32 1.0, %v4317_v29  ;;  %v840_v62 = vmul.f32 %v4317_v29, %v833_v58 }
 0x751   :  { %v4321_v56 = vpop.eup %4320  ;;  %v810_v11 = vsub.f32 1.0, %v4319_v35  ;;  %v841_v30 = vmul.f32 %v4319_v35, %v4982_v51 }
 0x752   :  { %v811_v16 = vsub.f32 1.0, %v4321_v56  ;;  %v842_v25 = vmul.f32 %v4321_v56, %v834_v12 }
 0x7a1   :  { %v771_v31 = vpop.permute.xlu0 %770  ;;  %v769_v32 = vpop.permute.xlu1 %768 }
 0x7a2   :  { %v781_v33 = vmul.f32 %v4317_v29, %v771_v31  ;;  %v780_v34 = vmul.f32 %v4315_v27, %v769_v32 }
 0x7a4   :  { %790 = vrot.lane.b32.xlu0 %v781_v33, %s4731_s4  ;;  %788 = vrot.lane.b32.xlu1 %v780_v34, %s4731_s4 }
 0x7a5   :  { %v773_v36 = vpop.permute.xlu0 %772  ;;  %v775_v37 = vpop.permute.xlu1 %774 }
 0x7a6   :  { %v782_v38 = vmul.f32 %v4319_v35, %v773_v36  ;;  %v783_v40 = vmul.f32 %v4321_v56, %v775_v37 }
 0x7a8   :  { %792 = vrot.lane.b32.xlu0 %v782_v38, %s4731_s4  ;;  %794 = vrot.lane.b32.xlu1 %v783_v40, %s4731_s4 }
 0x816   :  { %v791_v41 = vpop.permute.xlu0 %790  ;;  %v789_v42 = vpop.permute.xlu1 %788 }
 0x817   :  { %v801_v53 = vadd.f32 %v791_v41, %v4839_v17  ;;  %v800_v43 = vadd.f32 %v789_v42, %v4843_v21 }
 0x819   :  { %4322 = vtanh.f32 %v801_v53 }
 0x81a   :  { %4324 = vtanh.f32 %v800_v43  ;;  %v793_v44 = vpop.permute.xlu0 %792  ;;  %v795_v45 = vpop.permute.xlu1 %794 }
 0x81b   :  { %v802_v46 = vadd.f32 %v793_v44, %v4845_v22  ;;  %v803_v49 = vadd.f32 %v795_v45, %v4841_v18 }
 0x81d   :  { %4326 = vtanh.f32 %v802_v46 }
 0x81e   :  { %4328 = vtanh.f32 %v803_v49 }
 0x826   :  { %v4323_v50 = vpop.eup %4322 }
 0x827   :  { %v4325_v52 = vpop.eup %4324  ;;  %818 = vrot.lane.b32.xlu0 %v4323_v50, %s4733_s15 }
 0x828   :  { %816 = vrot.lane.b32.xlu1 %v4325_v52, %s4733_s15 }
 0x82a   :  { %v4327_v54 = vpop.eup %4326 }
 0x82b   :  { %v4329_v55 = vpop.eup %4328  ;;  %820 = vrot.lane.b32.xlu0 %v4327_v54, %s4733_s15 }
 0x82c   :  { %822 = vrot.lane.b32.xlu1 %v4329_v55, %s4733_s15 }
 0x899   :  { %v819_v60 = vpop.permute.xlu0 %818 }
 0x89a   :  { %v829_v63 = vmul.f32 %v819_v60, %v809_v57  ;;  %v817_v7 = vpop.permute.xlu1 %816 }
 0x89b   :  { %v828_v9 = vmul.f32 %v817_v7, %v808_v61 }
 0x89c   :  { %v5035_v10 = vadd.f32 %v840_v62, %v829_v63 }
 0x89d   :  { %v5038_v14 = vadd.f32 %v839_v8, %v828_v9  ;;  %v821_v15 = vpop.permute.xlu0 %820 }
 0x89e   :  { %v852_v39 = vrot.slane %v5035_v10, 1  ;;  %v830_v19 = vmul.f32 %v821_v15, %v810_v11  ;;  %v823_v20 = vpop.permute.xlu1 %822 }
 0x89f   :  { %v851_v23 = vrot.slane %v5038_v14, 2  ;;  %v831_v26 = vmul.f32 %v823_v20, %v811_v16 }
 0x8a0   :  { %v5043_v27 = vadd.f32 %v841_v30, %v830_v19 }
 0x8a1   :  { %v846_v29 = vadd.f32 %v842_v25, %v831_v26  ;;  %v853_v31 = vsel %vm420_vm4, %v852_v39, %v851_v23 }
 0x8a2   :  { %v854_v48 = vsel %vm422_vm5, %v852_v39, %v853_v31  ;;  %v865_v32 = vsel %vm425_vm6, %v5043_v27, %v853_v31 }
 0x8a3   :  { %v5049_v33 = vrot.slane %v846_v29, 7  ;;  %v855_v51 = vsel %vm425_vm6, %v5043_v27, %v854_v48 }
 0x8a4   :  { %v5055_v34 = vsel %vm427_vm8, %v5043_v27, %v855_v51 }
 0x8a5   :  { %v866_v35 = vsel %vm430_vm7, %v5049_v33, %v865_v32 }
 0x8a6   :  { %867 = vrot.lane.b32.xlu1 %v866_v35, %s4733_s15 }
 0x918   :  { %v868_v56 = vpop.permute.xlu1 %867 }
 0x919   :  { %4103 = vmatmul.mubr.msk.f32.vlgmr.msra.gmra.mxu1 %vm205_vm3, %v868_v56 }
 0x91a   :  { %4117 = vmatpush3.msra.mxu1 %v4812_v4  ;;  %4124 = vmatprep.mubr.msk.f32.mxu1 %vm4730_vm2, %v4729_v24 }
 0x91b   :  { %4118 = vmatprep.subr.mxu1 %v4729_v24 }
 0x91c   :  { %4119 = vmatpush3.msra.mxu1 %v4810_v3 }
 0x91d   :  { %4120 = vmatprep.subr.mxu1 %v4729_v24 }
 0x91e   :  { %4121 = vmatpush3.msra.mxu1 %v4807_v2 }
 0x91f   :  { %4122 = vmatprep.subr.mxu1 %v4729_v24 }
 0x920   :  { %4123 = vmatpush3.msra.mxu1 %v4805_v1 }
 0x921   :  { %4138 = vmatprep.subr.mxu1 %v4729_v24 }
 0x9d9   :  { %v937_v36 = vpop.f32.mrf.mxu1 }
 0x9da   :  { %v977_v37 = vadd.f32 %v937_v36, %v4884_v28  ;;  %v942_v53 = vrot.slane %v937_v36, 5  ;;  %v943_v43 = vrot.slane %v937_v36, 6  ;;  %v944_v45 = vrot.slane %v937_v36, 7 }
 0x9db   :  { %v4104_v38 = vpop.f32.mrf.mxu1  ;;  %v952_v49 = vadd.f32 %v937_v36, %v4841_v18 }
 0x9dc   :  { %v980_v40 = vrot.slane %v977_v37, 6  ;;  %v979_v41 = vrot.slane %v977_v37, 5  ;;  %v981_v42 = vrot.slane %v977_v37, 7  ;;  %v949_v44 = vadd.f32 %v942_v53, %v4843_v21 }
 0x9dd   :  { %v950_v46 = vadd.f32 %v943_v43, %v4839_v17  ;;  %v951_v52 = vadd.f32 %v944_v45, %v4845_v22  ;;  %v3895_v55 = vmul.f32 -1.442695, %v952_v49  ;;  %v1046_v43 = vrot.slane %v5038_v14, 7 }
 0x9de   :  { %984 = vrot.lane.b32.xlu1 %v980_v40, %s4731_s4  ;;  %982 = vrot.lane.b32.xlu0 %v979_v41, %s4731_s4  ;;  %v3892_v50 = vmul.f32 -1.442695, %v949_v44 }
 0x9df   :  { %v3893_v54 = vmul.f32 -1.442695, %v950_v46  ;;  %v3894_v57 = vmul.f32 -1.442695, %v951_v52 }
 0x9e0   :  { %4330 = vpow2.f32 %v3892_v50 }
 0x9e1   :  { %4332 = vpow2.f32 %v3893_v54 }
 0x9e2   :  { %988 = vrot.lane.b32.xlu1 %v977_v37, %s4731_s4  ;;  %986 = vrot.lane.b32.xlu0 %v981_v42, %s4731_s4  ;;  %4334 = vpow2.f32 %v3895_v55  ;;  %v1047_v42 = vrot.slane %v5035_v10, 7 }
 0x9e3   :  { %4336 = vpow2.f32 %v3894_v57 }
 0x9ed   :  { %v4331_v58 = vpop.eup %4330 }
 0x9ee   :  { %v4333_v59 = vpop.eup %4332  ;;  %v965_v60 = vadd.f32 1.0, %v4331_v58 }
 0x9ef   :  { %v4335_v61 = vpop.eup %4334  ;;  %v966_v62 = vadd.f32 1.0, %v4333_v59 }
 0x9f0   :  { %v4337_v63 = vpop.eup %4336  ;;  %v968_v7 = vadd.f32 1.0, %v4335_v61  ;;  %4338 = vrcp.f32 %v965_v60  ;;  %v1048_v60 = vrot.slane %v5043_v27, 7 }
 0x9f1   :  { %v967_v8 = vadd.f32 1.0, %v4337_v63  ;;  %4340 = vrcp.f32 %v966_v62 }
 0x9f2   :  { %4342 = vrcp.f32 %v968_v7 }
 0x9f3   :  { %4344 = vrcp.f32 %v967_v8 }
 0x9fd   :  { %v4339_v9 = vpop.eup %4338 }
 0x9fe   :  { %v4341_v11 = vpop.eup %4340  ;;  %v1022_v45 = vsub.f32 1.0, %v4339_v9  ;;  %v1053_v52 = vmul.f32 %v4339_v9, %v1046_v43 }
 0x9ff   :  { %v4343_v30 = vpop.eup %4342  ;;  %v1023_v53 = vsub.f32 1.0, %v4341_v11  ;;  %v1054_v46 = vmul.f32 %v4341_v11, %v1047_v42 }
 0xa00   :  { %v4345_v19 = vpop.eup %4344  ;;  %v1025_v61 = vsub.f32 1.0, %v4343_v30 }
 0xa01   :  { %v1024_v59 = vsub.f32 1.0, %v4345_v19  ;;  %v1055_v63 = vmul.f32 %v4345_v19, %v1048_v60 }
 0xa50   :  { %v985_v12 = vpop.permute.xlu1 %984  ;;  %v983_v15 = vpop.permute.xlu0 %982 }
 0xa51   :  { %v995_v16 = vmul.f32 %v4341_v11, %v985_v12  ;;  %v994_v39 = vmul.f32 %v4339_v9, %v983_v15  ;;  %v1056_v12 = vmul.f32 %v4343_v30, %v5049_v33 }
 0xa53   :  { %1004 = vrot.lane.b32.xlu1 %v995_v16, %s4731_s4  ;;  %1002 = vrot.lane.b32.xlu0 %v994_v39, %s4731_s4 }
 0xa54   :  { %v989_v20 = vpop.permute.xlu1 %988  ;;  %v987_v23 = vpop.permute.xlu0 %986 }
 0xa55   :  { %v997_v25 = vmul.f32 %v4343_v30, %v989_v20  ;;  %v996_v26 = vmul.f32 %v4345_v19, %v987_v23 }
 0xa57   :  { %1008 = vrot.lane.b32.xlu1 %v997_v25, %s4731_s4  ;;  %1006 = vrot.lane.b32.xlu0 %v996_v26, %s4731_s4 }
 0xac5   :  { %v1005_v29 = vpop.permute.xlu1 %1004  ;;  %v1003_v31 = vpop.permute.xlu0 %1002 }
 0xac6   :  { %v1015_v48 = vadd.f32 %v1005_v29, %v4839_v17  ;;  %v1014_v32 = vadd.f32 %v1003_v31, %v4843_v21 }
 0xac8   :  { %4346 = vtanh.f32 %v1015_v48 }
 0xac9   :  { %4348 = vtanh.f32 %v1014_v32  ;;  %v1009_v51 = vpop.permute.xlu1 %1008  ;;  %v1007_v35 = vpop.permute.xlu0 %1006 }
 0xaca   :  { %v1017_v56 = vadd.f32 %v1009_v51, %v4841_v18  ;;  %v1016_v36 = vadd.f32 %v1007_v35, %v4845_v22 }
 0xacc   :  { %4350 = vtanh.f32 %v1017_v56 }
 0xacd   :  { %4352 = vtanh.f32 %v1016_v36 }
 0xad5   :  { %v4347_v37 = vpop.eup %4346 }
 0xad6   :  { %v4349_v38 = vpop.eup %4348  ;;  %1032 = vrot.lane.b32.xlu1 %v4347_v37, %s4733_s15 }
 0xad7   :  { %1030 = vrot.lane.b32.xlu0 %v4349_v38, %s4733_s15 }
 0xad9   :  { %v4351_v40 = vpop.eup %4350 }
 0xada   :  { %v4353_v41 = vpop.eup %4352  ;;  %1036 = vrot.lane.b32.xlu1 %v4351_v40, %s4733_s15 }
 0xadb   :  { %1034 = vrot.lane.b32.xlu0 %v4353_v41, %s4733_s15 }
 0xb48   :  { %v1033_v44 = vpop.permute.xlu1 %1032 }
 0xb49   :  { %v1043_v49 = vmul.f32 %v1033_v44, %v1023_v53  ;;  %v1031_v50 = vpop.permute.xlu0 %1030 }
 0xb4a   :  { %v1042_v54 = vmul.f32 %v1031_v50, %v1022_v45 }
 0xb4b   :  { %v5094_v55 = vadd.f32 %v1054_v46, %v1043_v49 }
 0xb4c   :  { %v5096_v57 = vadd.f32 %v1053_v52, %v1042_v54  ;;  %v1037_v58 = vpop.permute.xlu1 %1036 }
 0xb4d   :  { %v1066_v10 = vrot.slane %v5094_v55, 2  ;;  %v1035_v62 = vpop.permute.xlu0 %1034  ;;  %v1045_v8 = vmul.f32 %v1037_v58, %v1025_v61 }
 0xb4e   :  { %v1065_v14 = vrot.slane %v5096_v57, 3  ;;  %v1044_v7 = vmul.f32 %v1035_v62, %v1024_v59 }
 0xb4f   :  { %v5107_v27 = vadd.f32 %v1056_v12, %v1045_v8 }
 0xb50   :  { %v5101_v11 = vadd.f32 %v1055_v63, %v1044_v7  ;;  %v1067_v9 = vsel %vm420_vm4, %v1066_v10, %v1065_v14 }
 0xb51   :  { %v1068_v15 = vsel %vm422_vm5, %v1066_v10, %v1067_v9 }
 0xb52   :  { %v1069_v16 = vrot.slane %v5101_v11, 1 }
 0xb54   :  { %v1079_v39 = vsel %vm425_vm6, %v1069_v16, %v1067_v9  ;;  %v1070_v20 = vsel %vm425_vm6, %v1069_v16, %v1068_v15 }
 0xb55   :  { %v1080_v19 = vsel %vm430_vm7, %v5107_v27, %v1079_v39  ;;  %v1071_v23 = vsel %vm427_vm8, %v1069_v16, %v1070_v20 }
 0xb56   :  { %1081 = vrot.lane.b32.xlu0 %v1080_v19, %s4733_s15  ;;  %v1072_v30 = vsel %vm430_vm7, %v5107_v27, %v1071_v23 }
 0xb57   :  { %v5119_v25 = vsel %vm432_vm9, %v5107_v27, %v1072_v30 }
 0xbc8   :  { %v1082_v26 = vpop.permute.xlu0 %1081 }
 0xbc9   :  { %4114 = vmatmul.mubr.msk.f32.vlgmr.msra.gmra.mxu0 %vm205_vm3, %v1082_v26 }
 0xbca   :  { %4128 = vmatpush3.msra.mxu0 %v4812_v4  ;;  %4135 = vmatprep.mubr.msk.f32.mxu0 %vm4730_vm2, %v4729_v24 }
 0xbcb   :  { %4129 = vmatprep.subr.mxu0 %v4729_v24 }
 0xbcc   :  { %4130 = vmatpush3.msra.mxu0 %v4810_v3 }
 0xbcd   :  { %4131 = vmatprep.subr.mxu0 %v4729_v24 }
 0xbce   :  { %4132 = vmatpush3.msra.mxu0 %v4807_v2 }
 0xbcf   :  { %4133 = vmatprep.subr.mxu0 %v4729_v24 }
 0xbd0   :  { %4134 = vmatpush3.msra.mxu0 %v4805_v1 }
 0xc89   :  { %v1151_v29 = vpop.f32.mrf.mxu0 }
 0xc8a   :  { %v1192_v31 = vadd.f32 %v1151_v29, %v4884_v28  ;;  %v1156_v36 = vrot.slane %v1151_v29, 4  ;;  %v1157_v37 = vrot.slane %v1151_v29, 5  ;;  %v1158_v38 = vrot.slane %v1151_v29, 6 }
 0xc8b   :  { %v4115_v48 = vpop.f32.mrf.mxu0  ;;  %v1159_v41 = vrot.slane %v1151_v29, 7 }
 0xc8c   :  { %v1195_v32 = vrot.slane %v1192_v31, 5  ;;  %v1194_v51 = vrot.slane %v1192_v31, 4  ;;  %v1197_v35 = vrot.slane %v1192_v31, 7  ;;  %v1196_v56 = vrot.slane %v1192_v31, 6 }
 0xc8d   :  { %v1164_v40 = vadd.f32 %v1156_v36, %v4843_v21  ;;  %v1165_v42 = vadd.f32 %v1157_v37, %v4839_v17  ;;  %v1166_v53 = vadd.f32 %v1158_v38, %v4845_v22  ;;  %v1167_v44 = vadd.f32 %v1159_v41, %v4841_v18 }
 0xc8e   :  { %1200 = vrot.lane.b32.xlu0 %v1195_v32, %s4731_s4  ;;  %1198 = vrot.lane.b32.xlu1 %v1194_v51, %s4731_s4  ;;  %v1263_v38 = vrot.slane %v5094_v55, 7  ;;  %v1262_v41 = vrot.slane %v5096_v57, 7 }
 0xc8f   :  { %v3897_v43 = vmul.f32 -1.442695, %v1164_v40  ;;  %v3898_v45 = vmul.f32 -1.442695, %v1165_v42  ;;  %v3899_v46 = vmul.f32 -1.442695, %v1166_v53 }
 0xc90   :  { %v3900_v49 = vmul.f32 -1.442695, %v1167_v44 }
 0xc91   :  { %4354 = vpow2.f32 %v3897_v43 }
 0xc92   :  { %1204 = vrot.lane.b32.xlu0 %v1197_v35, %s4731_s4  ;;  %1202 = vrot.lane.b32.xlu1 %v1196_v56, %s4731_s4  ;;  %4356 = vpow2.f32 %v3898_v45 }
 0xc93   :  { %4358 = vpow2.f32 %v3899_v46 }
 0xc94   :  { %4360 = vpow2.f32 %v3900_v49 }
 0xc9e   :  { %v4355_v50 = vpop.eup %4354 }
 0xc9f   :  { %v4357_v52 = vpop.eup %4356  ;;  %v1180_v54 = vadd.f32 1.0, %v4355_v50 }
 0xca0   :  { %v4359_v58 = vpop.eup %4358  ;;  %v1181_v59 = vadd.f32 1.0, %v4357_v52 }
 0xca1   :  { %v4361_v60 = vpop.eup %4360  ;;  %v1182_v10 = vadd.f32 1.0, %v4359_v58  ;;  %4362 = vrcp.f32 %v1180_v54  ;;  %v1265_v54 = vrot.slane %v5107_v27, 7  ;;  %v1264_v58 = vrot.slane %v5101_v11, 7 }
 0xca2   :  { %v1183_v61 = vadd.f32 1.0, %v4361_v60  ;;  %4364 = vrcp.f32 %v1181_v59 }
 0xca3   :  { %4366 = vrcp.f32 %v1182_v10 }
 0xca4   :  { %4368 = vrcp.f32 %v1183_v61 }
 0xcae   :  { %v4363_v62 = vpop.eup %4362 }
 0xcaf   :  { %v4365_v14 = vpop.eup %4364  ;;  %v1238_v53 = vsub.f32 1.0, %v4363_v62  ;;  %v1270_v46 = vmul.f32 %v4363_v62, %v1262_v41 }
 0xcb0   :  { %v4367_v12 = vpop.eup %4366  ;;  %v1239_v40 = vsub.f32 1.0, %v4365_v14  ;;  %v1271_v43 = vmul.f32 %v4365_v14, %v1263_v38 }
 0xcb1   :  { %v4369_v15 = vpop.eup %4368  ;;  %v1240_v60 = vsub.f32 1.0, %v4367_v12 }
 0xcb2   :  { %v1241_v52 = vsub.f32 1.0, %v4369_v15  ;;  %v1273_v61 = vmul.f32 %v4369_v15, %v1265_v54 }
 0xd00   :  { %v1201_v63 = vpop.permute.xlu0 %1200  ;;  %v1199_v7 = vpop.permute.xlu1 %1198 }
 0xd01   :  { %v1211_v8 = vmul.f32 %v4365_v14, %v1201_v63  ;;  %v1210_v9 = vmul.f32 %v4363_v62, %v1199_v7  ;;  %v1272_v7 = vmul.f32 %v4367_v12, %v1264_v58 }
 0xd03   :  { %1220 = vrot.lane.b32.xlu0 %v1211_v8, %s4731_s4  ;;  %1218 = vrot.lane.b32.xlu1 %v1210_v9, %s4731_s4 }
 0xd04   :  { %v1205_v16 = vpop.permute.xlu0 %1204  ;;  %v1203_v39 = vpop.permute.xlu1 %1202 }
 0xd05   :  { %v1213_v20 = vmul.f32 %v4369_v15, %v1205_v16  ;;  %v1212_v19 = vmul.f32 %v4367_v12, %v1203_v39 }
 0xd07   :  { %1224 = vrot.lane.b32.xlu0 %v1213_v20, %s4731_s4  ;;  %1222 = vrot.lane.b32.xlu1 %v1212_v19, %s4731_s4 }
 0xd75   :  { %v1221_v23 = vpop.permute.xlu0 %1220  ;;  %v1219_v30 = vpop.permute.xlu1 %1218 }
 0xd76   :  { %v1231_v26 = vadd.f32 %v1221_v23, %v4839_v17  ;;  %v1230_v29 = vadd.f32 %v1219_v30, %v4843_v21 }
 0xd78   :  { %4370 = vtanh.f32 %v1231_v26 }
 0xd79   :  { %4372 = vtanh.f32 %v1230_v29  ;;  %v1225_v31 = vpop.permute.xlu0 %1224  ;;  %v1223_v48 = vpop.permute.xlu1 %1222 }
 0xd7a   :  { %v1233_v32 = vadd.f32 %v1225_v31, %v4841_v18  ;;  %v1232_v51 = vadd.f32 %v1223_v48, %v4845_v22 }
 0xd7c   :  { %4374 = vtanh.f32 %v1233_v32 }
 0xd7d   :  { %4376 = vtanh.f32 %v1232_v51 }
 0xd85   :  { %v4371_v35 = vpop.eup %4370 }
 0xd86   :  { %v4373_v56 = vpop.eup %4372  ;;  %1248 = vrot.lane.b32.xlu0 %v4371_v35, %s4733_s15 }
 0xd87   :  { %1246 = vrot.lane.b32.xlu1 %v4373_v56, %s4733_s15 }
 0xd89   :  { %v4375_v36 = vpop.eup %4374 }
 0xd8a   :  { %v4377_v37 = vpop.eup %4376  ;;  %1252 = vrot.lane.b32.xlu0 %v4375_v36, %s4733_s15 }
 0xd8b   :  { %1250 = vrot.lane.b32.xlu1 %v4377_v37, %s4733_s15 }
 0xdf8   :  { %v1249_v42 = vpop.permute.xlu0 %1248 }
 0xdf9   :  { %v1259_v44 = vmul.f32 %v1249_v42, %v1239_v40  ;;  %v1247_v45 = vpop.permute.xlu1 %1246 }
 0xdfa   :  { %v1258_v49 = vmul.f32 %v1247_v45, %v1238_v53 }
 0xdfb   :  { %v5154_v50 = vadd.f32 %v1271_v43, %v1259_v44 }
 0xdfc   :  { %v5158_v59 = vadd.f32 %v1270_v46, %v1258_v49  ;;  %v1253_v55 = vpop.permute.xlu0 %1252 }
 0xdfd   :  { %v1283_v57 = vcombine.high %v5154_v50, %v5154_v50  ;;  %v1300_v10 = vrot.slane %v5154_v50, 3  ;;  %v1261_v14 = vmul.f32 %v1253_v55, %v1241_v52  ;;  %v1251_v62 = vpop.permute.xlu1 %1250 }
 0xdfe   :  { %v1299_v63 = vrot.slane %v5158_v59, 4  ;;  %v1260_v8 = vmul.f32 %v1251_v62, %v1240_v60  ;;  %v1282_v11 = vcombine.high %v5158_v59, %v5158_v59 }
 0xdff   :  { %v1286_v9 = vrot.slane %v1283_v57, 7  ;;  %v5166_v27 = vadd.f32 %v1273_v61, %v1261_v14 }
 0xe00   :  { %v5168_v16 = vadd.f32 %v1272_v7, %v1260_v8  ;;  %v1301_v39 = vsel %vm420_vm4, %v1300_v10, %v1299_v63 }
 0xe01   :  { %v1287_v20 = vsel %vm420_vm4, %v1286_v9, %v1282_v11  ;;  %v1304_v15 = vrot.slane %v5166_v27, 1  ;;  %v1285_v19 = vcombine.high %v5166_v27, %v5166_v27 }
 0xe02   :  { %v1284_v12 = vcombine.high %v5168_v16, %v5168_v16  ;;  %v1302_v23 = vrot.slane %v5168_v16, 2  ;;  %v1288_v30 = vsel %vm422_vm5, %v1286_v9, %v1287_v20 }
 0xe03   :  { %v1292_v48 = vrot.slane %v1285_v19, 5 }
 0xe04   :  { %v1289_v26 = vrot.slane %v1284_v12, 6  ;;  %v1303_v29 = vsel %vm425_vm6, %v1302_v23, %v1301_v39 }
 0xe05   :  { %v1305_v31 = vsel %vm430_vm7, %v1304_v15, %v1303_v29 }
 0xe06   :  { %1306 = vrot.lane.b32.xlu1 %v1305_v31, %s4733_s15  ;;  %v1290_v32 = vsel %vm425_vm6, %v1289_v26, %v1288_v30 }
 0xe07   :  { %v1291_v51 = vsel %vm427_vm8, %v1289_v26, %v1290_v32 }
 0xe08   :  { %v1293_v35 = vsel %vm430_vm7, %v1292_v48, %v1291_v51 }
 0xe09   :  { %v5186_v56 = vsel %vm432_vm9, %v1292_v48, %v1293_v35 }
 0xe78   :  { %v1307_v36 = vpop.permute.xlu1 %1306 }
 0xe79   :  { %4125 = vmatmul.mubr.msk.f32.vlgmr.msra.gmra.mxu1 %vm205_vm3, %v1307_v36 }
 0xe7a   :  { %4139 = vmatpush3.msra.mxu1 %v4812_v4  ;;  %4146 = vmatprep.mubr.msk.f32.mxu1 %vm4730_vm2, %v4729_v24 }
 0xe7b   :  { %4140 = vmatprep.subr.mxu1 %v4729_v24 }
 0xe7c   :  { %4141 = vmatpush3.msra.mxu1 %v4810_v3 }
 0xe7d   :  { %4142 = vmatprep.subr.mxu1 %v4729_v24 }
 0xe7e   :  { %4143 = vmatpush3.msra.mxu1 %v4807_v2 }
 0xe7f   :  { %4144 = vmatprep.subr.mxu1 %v4729_v24 }
 0xe80   :  { %4145 = vmatpush3.msra.mxu1 %v4805_v1 }
 0xf39   :  { %v1376_v37 = vpop.f32.mrf.mxu1 }
 0xf3a   :  { %v1417_v38 = vadd.f32 %v1376_v37, %v4884_v28  ;;  %v1381_v44 = vrot.slane %v1376_v37, 3  ;;  %v1382_v24 = vrot.slane %v1376_v37, 4  ;;  %v1383_v45 = vrot.slane %v1376_v37, 5 }
 0xf3b   :  { %v4126_v40 = vpop.f32.mrf.mxu1  ;;  %v1384_v49 = vrot.slane %v1376_v37, 6 }
 0xf3c   :  { %v1420_v41 = vrot.slane %v1417_v38, 4  ;;  %v1419_v42 = vrot.slane %v1417_v38, 3  ;;  %v1422_v53 = vrot.slane %v1417_v38, 6  ;;  %v1421_v43 = vrot.slane %v1417_v38, 5 }
 0xf3d   :  { %v1389_v46 = vadd.f32 %v1381_v44, %v4843_v21  ;;  %v1390_v52 = vadd.f32 %v1382_v24, %v4839_v17  ;;  %v1391_v54 = vadd.f32 %v1383_v45, %v4845_v22  ;;  %v1392_v55 = vadd.f32 %v1384_v49, %v4841_v18 }
 0xf3e   :  { %1425 = vrot.lane.b32.xlu1 %v1420_v41, %s4731_s4  ;;  %1423 = vrot.lane.b32.xlu0 %v1419_v42, %s4731_s4 }
 0xf3f   :  { %v3902_v58 = vmul.f32 -1.442695, %v1389_v46  ;;  %v3903_v60 = vmul.f32 -1.442695, %v1390_v52  ;;  %v3904_v57 = vmul.f32 -1.442695, %v1391_v54 }
 0xf40   :  { %v3905_v10 = vmul.f32 -1.442695, %v1392_v55  ;;  %v1488_v46 = vrot.slane %v5154_v50, 7  ;;  %v1487_v54 = vrot.slane %v5158_v59, 7  ;;  %v1489_v50 = vrot.slane %v5168_v16, 7 }
 0xf41   :  { %4378 = vpow2.f32 %v3902_v58 }
 0xf42   :  { %1429 = vrot.lane.b32.xlu1 %v1422_v53, %s4731_s4  ;;  %1427 = vrot.lane.b32.xlu0 %v1421_v43, %s4731_s4  ;;  %4380 = vpow2.f32 %v3903_v60 }
 0xf43   :  { %4382 = vpow2.f32 %v3904_v57 }
 0xf44   :  { %4384 = vpow2.f32 %v3905_v10 }
 0xf4e   :  { %v4379_v61 = vpop.eup %4378 }
 0xf4f   :  { %v4381_v14 = vpop.eup %4380  ;;  %v1405_v62 = vadd.f32 1.0, %v4379_v61 }
 0xf50   :  { %v4383_v63 = vpop.eup %4382  ;;  %v1406_v7 = vadd.f32 1.0, %v4381_v14 }
 0xf51   :  { %v4385_v8 = vpop.eup %4384  ;;  %v1407_v9 = vadd.f32 1.0, %v4383_v63  ;;  %4386 = vrcp.f32 %v1405_v62  ;;  %v1490_v62 = vrot.slane %v5166_v27, 7 }
 0xf52   :  { %v1408_v11 = vadd.f32 1.0, %v4385_v8  ;;  %4388 = vrcp.f32 %v1406_v7 }
 0xf53   :  { %4390 = vrcp.f32 %v1407_v9 }
 0xf54   :  { %4392 = vrcp.f32 %v1408_v11 }
 0xf5e   :  { %v4387_v39 = vpop.eup %4386 }
 0xf5f   :  { %v4389_v20 = vpop.eup %4388  ;;  %v1463_v52 = vsub.f32 1.0, %v4387_v39  ;;  %v1495_v57 = vmul.f32 %v4387_v39, %v1487_v54 }
 0xf60   :  { %v4391_v30 = vpop.eup %4390  ;;  %v1464_v45 = vsub.f32 1.0, %v4389_v20  ;;  %v1496_v58 = vmul.f32 %v4389_v20, %v1488_v46 }
 0xf61   :  { %v4393_v26 = vpop.eup %4392  ;;  %v1465_v8 = vsub.f32 1.0, %v4391_v30 }
 0xf62   :  { %v1466_v14 = vsub.f32 1.0, %v4393_v26  ;;  %v1498_v11 = vmul.f32 %v4393_v26, %v1490_v62 }
 0xfb0   :  { %v1426_v15 = vpop.permute.xlu1 %1425  ;;  %v1424_v19 = vpop.permute.xlu0 %1423 }
 0xfb1   :  { %v1436_v12 = vmul.f32 %v4389_v20, %v1426_v15  ;;  %v1435_v23 = vmul.f32 %v4387_v39, %v1424_v19  ;;  %v1497_v19 = vmul.f32 %v4391_v30, %v1489_v50 }
 0xfb3   :  { %1445 = vrot.lane.b32.xlu1 %v1436_v12, %s4731_s4  ;;  %1443 = vrot.lane.b32.xlu0 %v1435_v23, %s4731_s4 }
 0xfb4   :  { %v1430_v29 = vpop.permute.xlu1 %1429  ;;  %v1428_v31 = vpop.permute.xlu0 %1427 }
 0xfb5   :  { %v1438_v48 = vmul.f32 %v4393_v26, %v1430_v29  ;;  %v1437_v32 = vmul.f32 %v4391_v30, %v1428_v31 }
 0xfb7   :  { %1449 = vrot.lane.b32.xlu1 %v1438_v48, %s4731_s4  ;;  %1447 = vrot.lane.b32.xlu0 %v1437_v32, %s4731_s4 }
0x1025   :  { %v1446_v51 = vpop.permute.xlu1 %1445  ;;  %v1444_v35 = vpop.permute.xlu0 %1443 }
0x1026   :  { %v1456_v36 = vadd.f32 %v1446_v51, %v4839_v17  ;;  %v1455_v37 = vadd.f32 %v1444_v35, %v4843_v21 }
0x1028   :  { %4394 = vtanh.f32 %v1456_v36 }
0x1029   :  { %4396 = vtanh.f32 %v1455_v37  ;;  %v1450_v38 = vpop.permute.xlu1 %1449  ;;  %v1448_v40 = vpop.permute.xlu0 %1447 }
0x102a   :  { %v1458_v41 = vadd.f32 %v1450_v38, %v4841_v18  ;;  %v1457_v42 = vadd.f32 %v1448_v40, %v4845_v22 }
0x102c   :  { %4398 = vtanh.f32 %v1458_v41 }
0x102d   :  { %4400 = vtanh.f32 %v1457_v42 }
0x1035   :  { %v4395_v53 = vpop.eup %4394 }
0x1036   :  { %v4397_v43 = vpop.eup %4396  ;;  %1473 = vrot.lane.b32.xlu1 %v4395_v53, %s4733_s15 }
0x1037   :  { %1471 = vrot.lane.b32.xlu0 %v4397_v43, %s4733_s15 }
0x1039   :  { %v4399_v44 = vpop.eup %4398 }
0x103a   :  { %v4401_v24 = vpop.eup %4400  ;;  %1477 = vrot.lane.b32.xlu1 %v4399_v44, %s4733_s15 }
0x103b   :  { %1475 = vrot.lane.b32.xlu0 %v4401_v24, %s4733_s15 }
0x10a8   :  { %v1474_v49 = vpop.permute.xlu1 %1473 }
0x10a9   :  { %v1484_v55 = vmul.f32 %v1474_v49, %v1464_v45  ;;  %v1472_v60 = vpop.permute.xlu0 %1471 }
0x10aa   :  { %v1483_v10 = vmul.f32 %v1472_v60, %v1463_v52 }
0x10ab   :  { %v5221_v61 = vadd.f32 %v1496_v58, %v1484_v55 }
0x10ac   :  { %v5224_v63 = vadd.f32 %v1495_v57, %v1483_v10  ;;  %v1478_v7 = vpop.permute.xlu1 %1477 }
0x10ad   :  { %v1523_v9 = vrot.slane %v5221_v61, 4  ;;  %v1486_v59 = vmul.f32 %v1478_v7, %v1466_v14  ;;  %v1476_v20 = vpop.permute.xlu0 %1475  ;;  %v1508_v27 = vcombine.high %v5221_v61, %v5221_v61 }
0x10ae   :  { %v1507_v39 = vcombine.high %v5224_v63, %v5224_v63  ;;  %v1522_v15 = vrot.slane %v5224_v63, 5  ;;  %v1485_v12 = vmul.f32 %v1476_v20, %v1465_v8 }
0x10af   :  { %v5231_v23 = vadd.f32 %v1498_v11, %v1486_v59 }
0x10b0   :  { %v1511_v29 = vrot.slane %v1507_v39, 1  ;;  %v5235_v31 = vadd.f32 %v1497_v19, %v1485_v12  ;;  %v1524_v16 = vsel %vm420_vm4, %v1523_v9, %v1522_v15 }
0x10b1   :  { %v1527_v26 = vrot.slane %v5231_v23, 2  ;;  %v1510_v32 = vcombine.high %v5231_v23, %v5231_v23 }
0x10b2   :  { %v1512_v48 = vsel %vm420_vm4, %v1508_v27, %v1511_v29  ;;  %v1509_v30 = vcombine.high %v5235_v31, %v5235_v31  ;;  %v1525_v51 = vrot.slane %v5235_v31, 3 }
0x10b3   :  { %v1513_v35 = vsel %vm422_vm5, %v1508_v27, %v1512_v48  ;;  %v1517_v40 = vrot.slane %v1510_v32, 6 }
0x10b4   :  { %v1514_v36 = vrot.slane %v1509_v30, 7  ;;  %v1526_v37 = vsel %vm425_vm6, %v1525_v51, %v1524_v16 }
0x10b5   :  { %v1528_v38 = vsel %vm430_vm7, %v1527_v26, %v1526_v37 }
0x10b6   :  { %1529 = vrot.lane.b32.xlu0 %v1528_v38, %s4733_s15  ;;  %v1515_v41 = vsel %vm425_vm6, %v1514_v36, %v1513_v35 }
0x10b7   :  { %v1516_v42 = vsel %vm427_vm8, %v1514_v36, %v1515_v41 }
0x10b8   :  { %v1518_v53 = vsel %vm430_vm7, %v1517_v40, %v1516_v42 }
0x10b9   :  { %v5253_v43 = vsel %vm432_vm9, %v1517_v40, %v1518_v53 }
0x1128   :  { %v1530_v44 = vpop.permute.xlu0 %1529 }
0x1129   :  { %4136 = vmatmul.mubr.msk.f32.vlgmr.msra.gmra.mxu0 %vm205_vm3, %v1530_v44 }
0x11e9   :  { %v1599_v24 = vpop.f32.mrf.mxu0 }
0x11ea   :  { %v1640_v45 = vadd.f32 %v1599_v24, %v4884_v28  ;;  %v1604_v55 = vrot.slane %v1599_v24, 2  ;;  %v1605_v60 = vrot.slane %v1599_v24, 3  ;;  %v1606_v57 = vrot.slane %v1599_v24, 4 }
0x11eb   :  { %v4137_v46 = vpop.f32.mrf.mxu0  ;;  %v1607_v14 = vrot.slane %v1599_v24, 5 }
0x11ec   :  { %v1643_v49 = vrot.slane %v1640_v45, 3  ;;  %v1642_v52 = vrot.slane %v1640_v45, 2  ;;  %v1645_v54 = vrot.slane %v1640_v45, 5  ;;  %v1644_v58 = vrot.slane %v1640_v45, 4 }
0x11ed   :  { %v1612_v10 = vadd.f32 %v1604_v55, %v4843_v21  ;;  %v1613_v62 = vadd.f32 %v1605_v60, %v4839_v17  ;;  %v1614_v7 = vadd.f32 %v1606_v57, %v4845_v22  ;;  %v1615_v50 = vadd.f32 %v1607_v14, %v4841_v18 }
0x11ee   :  { %1648 = vrot.lane.b32.xlu0 %v1643_v49, %s4731_s4  ;;  %1646 = vrot.lane.b32.xlu1 %v1642_v52, %s4731_s4  ;;  %v1711_v14 = vrot.slane %v5221_v61, 7  ;;  %v1712_v61 = vrot.slane %v5235_v31, 7 }
0x11ef   :  { %v3907_v8 = vmul.f32 -1.442695, %v1612_v10  ;;  %v3908_v9 = vmul.f32 -1.442695, %v1613_v62  ;;  %v3909_v11 = vmul.f32 -1.442695, %v1614_v7 }
0x11f0   :  { %v3910_v59 = vmul.f32 -1.442695, %v1615_v50 }
0x11f1   :  { %4402 = vpow2.f32 %v3907_v8  ;;  %v1710_v8 = vrot.slane %v5224_v63, 7 }
0x11f2   :  { %1652 = vrot.lane.b32.xlu0 %v1645_v54, %s4731_s4  ;;  %1650 = vrot.lane.b32.xlu1 %v1644_v58, %s4731_s4  ;;  %4404 = vpow2.f32 %v3908_v9 }
0x11f3   :  { %4406 = vpow2.f32 %v3909_v11 }
0x11f4   :  { %4408 = vpow2.f32 %v3910_v59 }
0x11fe   :  { %v4403_v20 = vpop.eup %4402 }
0x11ff   :  { %v4405_v39 = vpop.eup %4404  ;;  %v1628_v15 = vadd.f32 1.0, %v4403_v20 }
0x1200   :  { %v4407_v19 = vpop.eup %4406  ;;  %v1629_v12 = vadd.f32 1.0, %v4405_v39 }
0x1201   :  { %v4409_v27 = vpop.eup %4408  ;;  %v1630_v29 = vadd.f32 1.0, %v4407_v19  ;;  %4410 = vrcp.f32 %v1628_v15  ;;  %v1713_v19 = vrot.slane %v5231_v23, 7 }
0x1202   :  { %v1631_v16 = vadd.f32 1.0, %v4409_v27  ;;  %4412 = vrcp.f32 %v1629_v12 }
0x1203   :  { %4414 = vrcp.f32 %v1630_v29 }
0x1204   :  { %4416 = vrcp.f32 %v1631_v16 }
0x120e   :  { %v4411_v26 = vpop.eup %4410 }
0x120f   :  { %v4413_v48 = vpop.eup %4412  ;;  %v1686_v7 = vsub.f32 1.0, %v4411_v26  ;;  %v1718_v59 = vmul.f32 %v4411_v26, %v1710_v8 }
0x1210   :  { %v4415_v36 = vpop.eup %4414  ;;  %v1687_v10 = vsub.f32 1.0, %v4413_v48  ;;  %v1719_v50 = vmul.f32 %v4413_v48, %v1711_v14 }
0x1211   :  { %v4417_v37 = vpop.eup %4416  ;;  %v1688_v29 = vsub.f32 1.0, %v4415_v36  ;;  %v1720_v23 = vmul.f32 %v4415_v36, %v1712_v61 }
0x1212   :  { %v1689_v15 = vsub.f32 1.0, %v4417_v37 }
0x1260   :  { %v1649_v32 = vpop.permute.xlu0 %1648  ;;  %v1647_v30 = vpop.permute.xlu1 %1646 }
0x1261   :  { %v1659_v51 = vmul.f32 %v4413_v48, %v1649_v32  ;;  %v1658_v35 = vmul.f32 %v4411_v26, %v1647_v30  ;;  %v1721_v48 = vmul.f32 %v4417_v37, %v1713_v19 }
0x1263   :  { %1668 = vrot.lane.b32.xlu0 %v1659_v51, %s4731_s4  ;;  %1666 = vrot.lane.b32.xlu1 %v1658_v35, %s4731_s4 }
0x1264   :  { %v1653_v38 = vpop.permute.xlu0 %1652  ;;  %v1651_v40 = vpop.permute.xlu1 %1650 }
0x1265   :  { %v1661_v41 = vmul.f32 %v4417_v37, %v1653_v38  ;;  %v1660_v42 = vmul.f32 %v4415_v36, %v1651_v40 }
0x1267   :  { %1672 = vrot.lane.b32.xlu0 %v1661_v41, %s4731_s4  ;;  %1670 = vrot.lane.b32.xlu1 %v1660_v42, %s4731_s4 }
0x12d5   :  { %v1669_v53 = vpop.permute.xlu0 %1668  ;;  %v1667_v44 = vpop.permute.xlu1 %1666 }
0x12d6   :  { %v1679_v24 = vadd.f32 %v1669_v53, %v4839_v17  ;;  %v1678_v45 = vadd.f32 %v1667_v44, %v4843_v21 }
0x12d8   :  { %4418 = vtanh.f32 %v1679_v24 }
0x12d9   :  { %4420 = vtanh.f32 %v1678_v45  ;;  %v1673_v46 = vpop.permute.xlu0 %1672  ;;  %v1671_v49 = vpop.permute.xlu1 %1670 }
0x12da   :  { %v1681_v52 = vadd.f32 %v1673_v46, %v4841_v18  ;;  %v1680_v54 = vadd.f32 %v1671_v49, %v4845_v22 }
0x12dc   :  { %4422 = vtanh.f32 %v1681_v52 }
0x12dd   :  { %4424 = vtanh.f32 %v1680_v54 }
0x12e5   :  { %v4419_v58 = vpop.eup %4418 }
0x12e6   :  { %v4421_v55 = vpop.eup %4420  ;;  %1696 = vrot.lane.b32.xlu0 %v4419_v58, %s4733_s15 }
0x12e7   :  { %1694 = vrot.lane.b32.xlu1 %v4421_v55, %s4733_s15 }
0x12e9   :  { %v4423_v60 = vpop.eup %4422 }
0x12ea   :  { %v4425_v57 = vpop.eup %4424  ;;  %1700 = vrot.lane.b32.xlu0 %v4423_v60, %s4733_s15 }
0x12eb   :  { %1698 = vrot.lane.b32.xlu1 %v4425_v57, %s4733_s15 }
0x1358   :  { %v1697_v62 = vpop.permute.xlu0 %1696 }
0x1359   :  { %v1707_v9 = vmul.f32 %v1697_v62, %v1687_v10  ;;  %v1695_v11 = vpop.permute.xlu1 %1694 }
0x135a   :  { %v1706_v20 = vmul.f32 %v1695_v11, %v1686_v7 }
0x135b   :  { %v5279_v39 = vadd.f32 %v1719_v50, %v1707_v9 }
0x135c   :  { %v5282_v12 = vadd.f32 %v1718_v59, %v1706_v20  ;;  %v1701_v27 = vpop.permute.xlu0 %1700 }
0x135d   :  { %v1731_v16 = vcombine.high %v5279_v39, %v5279_v39  ;;  %v1748_v63 = vrot.slane %v5279_v39, 5  ;;  %v1709_v32 = vmul.f32 %v1701_v27, %v1689_v15  ;;  %v1699_v26 = vpop.permute.xlu1 %1698 }
0x135e   :  { %v1730_v30 = vcombine.high %v5282_v12, %v5282_v12  ;;  %v1747_v51 = vrot.slane %v5282_v12, 6  ;;  %v1708_v35 = vmul.f32 %v1699_v26, %v1688_v29 }
0x135f   :  { %v1735_v38 = vrot.slane %v1731_v16, 1  ;;  %v5291_v40 = vadd.f32 %v1721_v48, %v1709_v32 }
0x1360   :  { %v1734_v41 = vrot.slane %v1730_v30, 2  ;;  %v5293_v31 = vadd.f32 %v1720_v23, %v1708_v35  ;;  %v1749_v42 = vsel %vm420_vm4, %v1748_v63, %v1747_v51 }
0x1361   :  { %v1733_v37 = vcombine.high %v5291_v40, %v5291_v40  ;;  %v1752_v53 = vrot.slane %v5291_v40, 3 }
0x1362   :  { %v1736_v44 = vsel %vm420_vm4, %v1735_v38, %v1734_v41  ;;  %v1732_v24 = vcombine.high %v5293_v31, %v5293_v31  ;;  %v1750_v36 = vrot.slane %v5293_v31, 4 }
0x1363   :  { %v1740_v45 = vrot.slane %v1733_v37, 7  ;;  %v1737_v46 = vsel %vm422_vm5, %v1735_v38, %v1736_v44 }
0x1364   :  { %v1751_v49 = vsel %vm425_vm6, %v1750_v36, %v1749_v42  ;;  %v1738_v52 = vsel %vm425_vm6, %v1732_v24, %v1737_v46 }
0x1365   :  { %v1753_v54 = vsel %vm430_vm7, %v1752_v53, %v1751_v49  ;;  %v1739_v58 = vsel %vm427_vm8, %v1732_v24, %v1738_v52 }
0x1366   :  { %1754 = vrot.lane.b32.xlu1 %v1753_v54, %s4733_s15  ;;  %v1741_v55 = vsel %vm430_vm7, %v1740_v45, %v1739_v58 }
0x1367   :  { %v5311_v60 = vsel %vm432_vm9, %v1740_v45, %v1741_v55 }
0x13d8   :  { %v1755_v57 = vpop.permute.xlu1 %1754 }
0x13d9   :  { %4147 = vmatmul.mubr.msk.f32.vlgmr.msra.gmra.mxu1 %vm205_vm3, %v1755_v57 }
0x1499   :  { %v1824_v10 = vpop.f32.mrf.mxu1 }
0x149a   :  { %v1865_v14 = vadd.f32 %v1824_v10, %v4884_v28  ;;  %v1829_v11 = vrot.slane %v1824_v10, 1  ;;  %v1830_v59 = vrot.slane %v1824_v10, 2  ;;  %v1831_v20 = vrot.slane %v1824_v10, 3 }
0x149b   :  { %v4148_v62 = vpop.f32.mrf.mxu1  ;;  %v1832_v19 = vrot.slane %v1824_v10, 4 }
0x149c   :  { %v1868_v7 = vrot.slane %v1865_v14, 2  ;;  %v1867_v8 = vrot.slane %v1865_v14, 1  ;;  %v1870_v50 = vrot.slane %v1865_v14, 4  ;;  %v1869_v9 = vrot.slane %v1865_v14, 3 }
0x149d   :  { %v1837_v15 = vadd.f32 %v1829_v11, %v4843_v21  ;;  %v1838_v28 = vadd.f32 %v1830_v59, %v4839_v17  ;;  %v1839_v27 = vadd.f32 %v1831_v20, %v4845_v22  ;;  %v1840_v61 = vadd.f32 %v1832_v19, %v4841_v18 }
0x149e   :  { %1873 = vrot.lane.b32.xlu1 %v1868_v7, %s4731_s4  ;;  %1871 = vrot.lane.b32.xlu0 %v1867_v8, %s4731_s4 }
0x149f   :  { %v3912_v29 = vmul.f32 -1.442695, %v1837_v15  ;;  %v3913_v16 = vmul.f32 -1.442695, %v1838_v28  ;;  %v3914_v63 = vmul.f32 -1.442695, %v1839_v27  ;;  %v858_v15 = vsel %vm430_vm7, %v5049_v33, %v5055_v34 }
0x14a0   :  { %v3915_v48 = vmul.f32 -1.442695, %v1840_v61  ;;  %v859_v19 = vsel %vm432_vm9, %v5049_v33, %v858_v15 }
0x14a1   :  { %4426 = vpow2.f32 %v3912_v29  ;;  %v1935_v29 = vrot.slane %v5282_v12, 7 }
0x14a2   :  { %1877 = vrot.lane.b32.xlu1 %v1870_v50, %s4731_s4  ;;  %1875 = vrot.lane.b32.xlu0 %v1869_v9, %s4731_s4  ;;  %4428 = vpow2.f32 %v3913_v16 }
0x14a3   :  { %4430 = vpow2.f32 %v3914_v63 }
0x14a4   :  { %4432 = vpow2.f32 %v3915_v48 }
0x14ae   :  { %v4427_v32 = vpop.eup %4426 }
0x14af   :  { %v4429_v26 = vpop.eup %4428  ;;  %v1853_v30 = vadd.f32 1.0, %v4427_v32 }
0x14b0   :  { %v4431_v51 = vpop.eup %4430  ;;  %v1854_v23 = vadd.f32 1.0, %v4429_v26 }
0x14b1   :  { %v4433_v35 = vpop.eup %4432  ;;  %v1855_v38 = vadd.f32 1.0, %v4431_v51  ;;  %4434 = vrcp.f32 %v1853_v30 }
0x14b2   :  { %v1856_v41 = vadd.f32 1.0, %v4433_v35  ;;  %4436 = vrcp.f32 %v1854_v23 }
0x14b3   :  { %4438 = vrcp.f32 %v1855_v38 }
0x14b4   :  { %4440 = vrcp.f32 %v1856_v41 }
0x14be   :  { %v4435_v42 = vpop.eup %4434 }
0x14bf   :  { %v4437_v37 = vpop.eup %4436  ;;  %v1943_v63 = vmul.f32 %v4435_v42, %v1935_v29 }
0x14c0   :  { %v4439_v45 = vpop.eup %4438  ;;  %v1912_v28 = vsub.f32 1.0, %v4437_v37 }
0x14c1   :  { %v4441_v46 = vpop.eup %4440  ;;  %v1913_v51 = vsub.f32 1.0, %v4439_v45 }
0x14c2   :  { %v1914_v32 = vsub.f32 1.0, %v4441_v46 }
0x1510   :  { %v1874_v53 = vpop.permute.xlu1 %1873  ;;  %v1872_v44 = vpop.permute.xlu0 %1871 }
0x1511   :  { %v1884_v24 = vmul.f32 %v4437_v37, %v1874_v53  ;;  %v1883_v36 = vmul.f32 %v4435_v42, %v1872_v44 }
0x1513   :  { %1893 = vrot.lane.b32.xlu1 %v1884_v24, %s4731_s4  ;;  %1891 = vrot.lane.b32.xlu0 %v1883_v36, %s4731_s4 }
0x1514   :  { %v1878_v49 = vpop.permute.xlu1 %1877  ;;  %v1876_v52 = vpop.permute.xlu0 %1875 }
0x1515   :  { %v1886_v54 = vmul.f32 %v4441_v46, %v1878_v49  ;;  %v1885_v58 = vmul.f32 %v4439_v45, %v1876_v52 }
0x1517   :  { %1897 = vrot.lane.b32.xlu1 %v1886_v54, %s4731_s4  ;;  %1895 = vrot.lane.b32.xlu0 %v1885_v58, %s4731_s4 }
0x1585   :  { %v1894_v55 = vpop.permute.xlu1 %1893  ;;  %v1892_v57 = vpop.permute.xlu0 %1891 }
0x1586   :  { %v1904_v10 = vadd.f32 %v1894_v55, %v4839_v17  ;;  %v1903_v14 = vadd.f32 %v1892_v57, %v4843_v21 }
0x1588   :  { %4442 = vtanh.f32 %v1904_v10 }
0x1589   :  { %4444 = vtanh.f32 %v1903_v14  ;;  %v1898_v62 = vpop.permute.xlu1 %1897  ;;  %v1896_v7 = vpop.permute.xlu0 %1895 }
0x158a   :  { %v1906_v8 = vadd.f32 %v1898_v62, %v4841_v18  ;;  %v1905_v50 = vadd.f32 %v1896_v7, %v4845_v22 }
0x158c   :  { %4446 = vtanh.f32 %v1906_v8 }
0x158d   :  { %4448 = vtanh.f32 %v1905_v50 }
0x1595   :  { %v4443_v9 = vpop.eup %4442 }
0x1596   :  { %v4445_v11 = vpop.eup %4444  ;;  %1921 = vrot.lane.b32.xlu1 %v4443_v9, %s4733_s15 }
0x1597   :  { %1919 = vrot.lane.b32.xlu0 %v4445_v11, %s4733_s15 }
0x1599   :  { %v4447_v59 = vpop.eup %4446 }
0x159a   :  { %v4449_v20 = vpop.eup %4448  ;;  %1925 = vrot.lane.b32.xlu1 %v4447_v59, %s4733_s15 }
0x159b   :  { %1923 = vrot.lane.b32.xlu0 %v4449_v20, %s4733_s15 }
0x159e   :  { %1295 = vrot.lane.b32.xlu1 %v5186_v56, %s4733_s15  ;;  %v1936_v56 = vrot.slane %v5279_v39, 7 }
0x159f   :  { %434 = vrot.lane.b32.xlu0 %v4937_v0, %s4733_s15  ;;  %v1911_v0 = vsub.f32 1.0, %v4435_v42 }
0x15a0   :  { %v1944_v61 = vmul.f32 %v4437_v37, %v1936_v56 }
0x15a2   :  { %1743 = vrot.lane.b32.xlu1 %v5311_v60, %s4732_s7  ;;  %v1938_v60 = vrot.slane %v5291_v40, 7 }
0x15a3   :  { %860 = vrot.lane.b32.xlu0 %v859_v19, %s4732_s7 }
0x15a4   :  { %v1946_v39 = vmul.f32 %v4441_v46, %v1938_v60 }
0x15a7   :  { %1074 = vrot.lane.b32.xlu0 %v5119_v25, %s4731_s4  ;;  %v1937_v25 = vrot.slane %v5293_v31, 7 }
0x15a9   :  { %v1945_v12 = vmul.f32 %v4439_v45, %v1937_v25 }
0x1608   :  { %v1922_v27 = vpop.permute.xlu1 %1921 }
0x1609   :  { %v1932_v34 = vmul.f32 %v1922_v27, %v1912_v28  ;;  %v1920_v16 = vpop.permute.xlu0 %1919 }
0x160a   :  { %v1931_v33 = vmul.f32 %v1920_v16, %v1911_v0 }
0x160b   :  { %v1948_v48 = vadd.f32 %v1944_v61, %v1932_v34 }
0x160c   :  { %v1947_v26 = vadd.f32 %v1943_v63, %v1931_v33  ;;  %v1926_v30 = vpop.permute.xlu1 %1925 }
0x160d   :  { %v1956_v23 = vcombine.high %v1948_v48, %v1948_v48  ;;  %v1934_v35 = vmul.f32 %v1926_v30, %v1914_v32  ;;  %v1924_v38 = vpop.permute.xlu0 %1923  ;;  %v1972_v46 = vrot.slane %v1948_v48, 7 }
0x160e   :  { %v1955_v41 = vcombine.high %v1947_v26, %v1947_v26  ;;  %v1933_v37 = vmul.f32 %v1924_v38, %v1913_v51  ;;  %1977 = vrot.lane.b32.xlu0 %v1947_v26, %s4733_s15 }
0x160f   :  { %v1960_v42 = vrot.slane %v1956_v23, 2  ;;  %v1950_v53 = vadd.f32 %v1946_v39, %v1934_v35 }
0x1610   :  { %v1959_v44 = vrot.slane %v1955_v41, 3  ;;  %v1949_v24 = vadd.f32 %v1945_v12, %v1933_v37  ;;  %v1296_v40 = vpop.permute.xlu1 %1295 }
0x1611   :  { %v1975_v36 = vrot.slane %v1950_v53, 5  ;;  %1298 = vst.msk [vmem:[%s5950_s8 + $0x4] sm:$0xf] %vm69_vm0, %v1296_v40  ;;  %v435_v31 = vpop.permute.xlu0 %434  ;;  %v1958_v14 = vcombine.high %v1950_v53, %v1950_v53 }
0x1612   :  { %v1961_v45 = vsel %vm420_vm4, %v1960_v42, %v1959_v44  ;;  %v1957_v49 = vcombine.high %v1949_v24, %v1949_v24  ;;  %v1973_v52 = vrot.slane %v1949_v24, 6  ;;  %1521 = vst.msk [vmem:[%s5950_s8 + $0x4] sm:$0xf] %vm649_vm10, %v5253_v43 }
0x1613   :  { %438 = vst.msk [vmem:[%s5950_s8] sm:$0xf] %vm69_vm0, %v435_v31  ;;  %v1962_v54 = vsel %vm422_vm5, %v1960_v42, %v1961_v45 }
0x1614   :  { %650 = vst.msk [vmem:[%s5950_s8] sm:$0xf] %vm649_vm10, %v4999_v47  ;;  %v1963_v58 = vrot.slane %v1957_v49, 1  ;;  %v1744_v55 = vpop.permute.xlu1 %1743  ;;  %v1974_v57 = vsel %vm420_vm4, %v1973_v52, %v1972_v46 }
0x1615   :  { %v861_v10 = vpop.permute.xlu0 %860  ;;  %1746 = vst.msk [vmem:[%s5950_s8 + $0x4] sm:$0xf] %vm863_vm11, %v1744_v55  ;;  %v1976_v43 = vsel %vm425_vm6, %v1975_v36, %v1974_v57 }
0x1616   :  { %v1964_v62 = vsel %vm425_vm6, %v1963_v58, %v1962_v54  ;;  %864 = vst.msk [vmem:[%s5950_s8] sm:$0xf] %vm863_vm11, %v861_v10 }
0x1617   :  { %v1965_v47 = vsel %vm427_vm8, %v1963_v58, %v1964_v62 }
0x1618   :  { %v1966_v7 = vsel %vm430_vm7, %v1958_v14, %v1965_v47 }
0x1619   :  { %v1075_v8 = vpop.permute.xlu0 %1074  ;;  %v1967_v50 = vsel %vm432_vm9, %v1958_v14, %v1966_v7 }
0x161a   :  { %1078 = vst.msk [vmem:[%s5950_s8] sm:$0xf] %vm1077_vm12, %v1075_v8  ;;  %1968 = vrot.lane.b32.xlu1 %v1967_v50, %s4731_s4 }
0x161e   :  { %1979 = vrot.lane.b32.xlu1 %v1976_v43, %s4733_s15 }
0x1680   :  { %v1978_v9 = vpop.permute.xlu0 %1977 }
0x1681   :  { %1984 = vst.msk [vmem:[#allocation9 - $0x7] sm:$0x80] %vm1983_vm13, %v1978_v9 }
0x168c   :  { %v1969_v11 = vpop.permute.xlu1 %1968 }
0x168d   :  { %1971 = vst.msk [vmem:[%s5950_s8 + $0x4] sm:$0xf] %vm1077_vm12, %v1969_v11 }
0x1690   :  { %v1980_v59 = vpop.permute.xlu1 %1979 }
0x1691   :  { %1986 = vst.msk [vmem:[#allocation9 + $0x1] sm:$0x7] %vm1985_vm14, %v1980_v59 }
0x1692 PF:  { %p3916_p5 = scmp.ge.s32.totalorder %s5957_s25, 8 }
0x1693   :  { %s4736_s25 = smov (!%p3916_p5), 64   ;;  %s4737_s30 = smov (!%p3916_p5), 32  }
0x1694   :  { %1990 = sbr.rel (%p3916_p5) target bundleno = 11459 (0x2cc3), region = 49  ;;  %s4739_s10 = smov (!%p3916_p5), 96  }
0x1699   :  { %v2102_v20 = vlaneseq  ;;  %v4734_v15 = vmov 0.0   ;;  %vm4735_vm15 = vmmov 0   ;;  %vm1991_vm1 = vcmask 261120  }
0x169a   :  { %4149 = vmatprep.subr.mxu0 %v4734_v15  ;;  %4157 = vmatprep.mubr.msk.f32.mxu0 %vm4735_vm15, %v4734_v15  ;;  %v2178_v10 = vrot.slane %v4832_v13, 1  ;;  %v2179_v43 = vrot.slane %v4832_v13, 2  ;;  %v4738_v59 = vmov 0   ;;  %vm3922_vm2 = vcmp.gt.s32.totalorder %v4822_v6, 0 }
0x169b   :  { %4150 = vmatpush3.msra.mxu0 %v4812_v4  ;;  %v2103_v19 = vshrl.u32 %v2102_v20, 7  ;;  %4160 = vmatprep.subr.mxu1 %v4734_v15  ;;  %vm2213_vm3 = vcmask 1041409   ;;  %vm2216_vm4 = vcmask 1042434   ;;  %vm2219_vm5 = vcmask 1043459  }
0x169c   :  { %4151 = vmatprep.subr.mxu0 %v4734_v15  ;;  %4161 = vmatpush3.msra.mxu1 %v4812_v4  ;;  %vm3928_vm7 = vcmp.gt.s32.totalorder %v4822_v6, 1  ;;  %vm3934_vm9 = vcmp.gt.s32.totalorder %v4822_v6, 2  ;;  %vm3940_vm11 = vcmp.gt.s32.totalorder %v4822_v6, 3  ;;  %vm3946_vm13 = vcmp.gt.s32.totalorder %v4822_v6, 4 }
0x169d   :  { %4152 = vmatpush3.msra.mxu0 %v4810_v3  ;;  %v2104_v28 = vsub.s32 0, %v2103_v19  ;;  %4162 = vmatprep.subr.mxu1 %v4734_v15 }
0x169e   :  { %4153 = vmatprep.subr.mxu0 %v4734_v15  ;;  %4163 = vmatpush3.msra.mxu1 %v4810_v3 }
0x169f   :  { %4154 = vmatpush3.msra.mxu0 %v4807_v2  ;;  %v2105_v56 = vrot.slane %v4817_v5, %v2104_v28  ;;  %4164 = vmatprep.subr.mxu1 %v4734_v15  ;;  %v2180_v28 = vrot.slane %v4832_v13, 3 }
0x16a0   :  { %4155 = vmatprep.subr.mxu0 %v4734_v15  ;;  %4165 = vmatpush3.msra.mxu1 %v4807_v2 }
0x16a1   :  { %4156 = vmatpush3.msra.mxu0 %v4805_v1  ;;  %2106 = vrot.lane.b32.xlu0 %v2105_v56, %s4736_s25 }
0x16a2   :  { %4158 = vmatmul.mubr.msk.f32.vlgmr.msra.gmra.mxu0 %vm1991_vm1, %v4832_v13  ;;  %4166 = vmatprep.subr.mxu1 %v4734_v15 }
0x16a3   :  { %4167 = vmatpush3.msra.mxu1 %v4805_v1  ;;  %4168 = vmatprep.mubr.msk.f32.mxu1 %vm4735_vm15, %v4734_v15 }
0x16a4   :  { %4171 = vmatprep.subr.mxu0 %v4734_v15  ;;  %4179 = vmatprep.mubr.msk.f32.mxu0 %vm4735_vm15, %v4734_v15 }
0x16a5   :  { %4172 = vmatpush3.msra.mxu0 %v4812_v4  ;;  %4182 = vmatprep.subr.mxu1 %v4734_v15 }
0x16a6   :  { %4173 = vmatprep.subr.mxu0 %v4734_v15  ;;  %4450 = vset.pattern.permute.xlu1 %v4738_v59 }
0x16a7   :  { %4174 = vmatpush3.msra.mxu0 %v4810_v3  ;;  %4451 = vset.pattern.permute.xlu0 %v4738_v59 }
0x16a8   :  { %4175 = vmatprep.subr.mxu0 %v4734_v15 }
0x16a9   :  { %4176 = vmatpush3.msra.mxu0 %v4807_v2 }
0x16aa   :  { %4177 = vmatprep.subr.mxu0 %v4734_v15 }
0x16ab   :  { %4178 = vmatpush3.msra.mxu0 %v4805_v1 }
0x16ac   :  { %4193 = vmatprep.subr.mxu0 %v4734_v15 }
0x1713   :  { %v5431_v5 = vpop.permute.xlu0 %2106 }
0x1762   :  { %v2061_v27 = vpop.f32.mrf.mxu0 }
0x1763   :  { %v2109_v0 = vadd.f32 %v5431_v5, %v2061_v27  ;;  %v2066_v63 = vrot.slane %v2061_v27, 1  ;;  %v2067_v33 = vrot.slane %v2061_v27, 2  ;;  %v2068_v32 = vrot.slane %v2061_v27, 3 }
0x1764   :  { %v4159_v29 = vpop.f32.mrf.mxu0  ;;  %v2073_v26 = vadd.f32 %v2061_v27, %v4843_v21 }
0x1765   :  { %v2112_v61 = vrot.slane %v2109_v0, 2  ;;  %v2111_v34 = vrot.slane %v2109_v0, 1  ;;  %v2113_v16 = vrot.slane %v2109_v0, 3  ;;  %v2074_v48 = vadd.f32 %v2066_v63, %v4839_v17 }
0x1766   :  { %v2075_v60 = vadd.f32 %v2067_v33, %v4845_v22  ;;  %v2076_v51 = vadd.f32 %v2068_v32, %v4841_v18  ;;  %v3918_v23 = vmul.f32 -1.442695, %v2073_v26 }
0x1767   :  { %2118 = vrot.lane.b32.xlu1 %v2112_v61, %s4736_s25  ;;  %2116 = vrot.lane.b32.xlu0 %v2111_v34, %s4736_s25  ;;  %v3919_v30 = vmul.f32 -1.442695, %v2074_v48 }
0x1768   :  { %v3920_v25 = vmul.f32 -1.442695, %v2075_v60  ;;  %v3921_v39 = vmul.f32 -1.442695, %v2076_v51 }
0x1769   :  { %4452 = vpow2.f32 %v3919_v30 }
0x176a   :  { %4454 = vpow2.f32 %v3920_v25 }
0x176b   :  { %2114 = vrot.lane.b32.xlu1 %v2109_v0, %s4736_s25  ;;  %2120 = vrot.lane.b32.xlu0 %v2113_v16, %s4736_s25  ;;  %4456 = vpow2.f32 %v3918_v23  ;;  %v2203_v0 = vsel %vm3922_vm2, 1, %v4738_v59 }
0x176c   :  { %4458 = vpow2.f32 %v3921_v39 }
0x1776   :  { %v4453_v35 = vpop.eup %4452 }
0x1777   :  { %v4455_v38 = vpop.eup %4454  ;;  %v2090_v41 = vadd.f32 1.0, %v4453_v35 }
0x1778   :  { %v4457_v12 = vpop.eup %4456  ;;  %v2091_v37 = vadd.f32 1.0, %v4455_v38 }
0x1779   :  { %v4459_v42 = vpop.eup %4458  ;;  %v2089_v53 = vadd.f32 1.0, %v4457_v12  ;;  %4460 = vrcp.f32 %v2090_v41 }
0x177a   :  { %v2092_v44 = vadd.f32 1.0, %v4459_v42  ;;  %4462 = vrcp.f32 %v2091_v37 }
0x177b   :  { %4464 = vrcp.f32 %v2089_v53 }
0x177c   :  { %4466 = vrcp.f32 %v2092_v44 }
0x1786   :  { %v4461_v24 = vpop.eup %4460 }
0x1787   :  { %v5442_v40 = vpop.eup %4462  ;;  %v2155_v33 = vsub.f32 1.0, %v4461_v24 }
0x1788   :  { %v5445_v49 = vpop.eup %4464  ;;  %v2156_v60 = vsub.f32 1.0, %v5442_v40 }
0x1789   :  { %v4467_v52 = vpop.eup %4466  ;;  %v2154_v38 = vsub.f32 1.0, %v5445_v49 }
0x178a   :  { %v2157_v51 = vsub.f32 1.0, %v4467_v52 }
0x17d9   :  { %v2119_v36 = vpop.permute.xlu1 %2118  ;;  %v2117_v31 = vpop.permute.xlu0 %2116 }
0x17da   :  { %v2128_v46 = vmul.f32 %v5442_v40, %v2119_v36  ;;  %v2127_v45 = vmul.f32 %v4461_v24, %v2117_v31 }
0x17dc   :  { %2138 = vrot.lane.b32.xlu0 %v2128_v46, %s4736_s25  ;;  %2136 = vrot.lane.b32.xlu1 %v2127_v45, %s4736_s25 }
0x17dd   :  { %v2115_v54 = vpop.permute.xlu1 %2114  ;;  %v2121_v58 = vpop.permute.xlu0 %2120 }
0x17de   :  { %v2126_v55 = vmul.f32 %v5445_v49, %v2115_v54  ;;  %v2129_v57 = vmul.f32 %v4467_v52, %v2121_v58 }
0x17e0   :  { %2140 = vrot.lane.b32.xlu0 %v2129_v57, %s4736_s25  ;;  %2134 = vrot.lane.b32.xlu1 %v2126_v55, %s4736_s25 }
0x17e4   :  { %2183 = vrot.lane.b32.xlu0 %v2178_v10, %s4737_s30 }
0x17e8   :  { %2185 = vrot.lane.b32.xlu0 %v2179_v43, %s4737_s30 }
0x184e   :  { %v2139_v14 = vpop.permute.xlu0 %2138  ;;  %v2137_v62 = vpop.permute.xlu1 %2136 }
0x184f   :  { %v2147_v9 = vadd.f32 %v2137_v62, %v4839_v17  ;;  %v2148_v11 = vadd.f32 %v2139_v14, %v4845_v22 }
0x1852   :  { %v2141_v47 = vpop.permute.xlu0 %2140  ;;  %v2135_v7 = vpop.permute.xlu1 %2134 }
0x1853   :  { %v2149_v8 = vadd.f32 %v2141_v47, %v4841_v18  ;;  %v2146_v50 = vadd.f32 %v2135_v7, %v4843_v21 }
0x1855   :  { %4468 = vtanh.f32 %v2149_v8 }
0x1856   :  { %4470 = vtanh.f32 %v2146_v50  ;;  %v2184_v29 = vpop.permute.xlu0 %2183 }
0x1857   :  { %4472 = vtanh.f32 %v2147_v9  ;;  %v2194_v30 = vmul.f32 %v4461_v24, %v2184_v29 }
0x1858   :  { %4474 = vtanh.f32 %v2148_v11 }
0x185a   :  { %v2186_v61 = vpop.permute.xlu0 %2185 }
0x185b   :  { %v2195_v39 = vmul.f32 %v5442_v40, %v2186_v61 }
0x1862   :  { %v4469_v20 = vpop.eup %4468 }
0x1863   :  { %v4471_v19 = vpop.eup %4470  ;;  %2168 = vrot.lane.b32.xlu0 %v4469_v20, %s4739_s10 }
0x1864   :  { %2162 = vrot.lane.b32.xlu1 %v4471_v19, %s4739_s10  ;;  %v4473_v56 = vpop.eup %4472 }
0x1865   :  { %v4475_v27 = vpop.eup %4474 }
0x1867   :  { %2187 = vrot.lane.b32.xlu0 %v2180_v28, %s4737_s30 }
0x1868   :  { %2164 = vrot.lane.b32.xlu1 %v4473_v56, %s4739_s10 }
0x186c   :  { %2166 = vrot.lane.b32.xlu1 %v4475_v27, %s4739_s10 }
0x1870   :  { %2181 = vrot.lane.b32.xlu1 %v4832_v13, %s4737_s30 }
0x1874   :  { %2205 = vperm.xlu1 %4450, %v2203_v0  }
0x18d5   :  { %v2169_v34 = vpop.permute.xlu0 %2168 }
0x18d6   :  { %v2163_v16 = vpop.permute.xlu1 %2162  ;;  %v2177_v35 = vmul.f32 %v2169_v34, %v2157_v51 }
0x18d7   :  { %v2174_v42 = vmul.f32 %v2163_v16, %v2154_v38 }
0x18d9   :  { %v2188_v48 = vpop.permute.xlu0 %2187 }
0x18da   :  { %v2165_v63 = vpop.permute.xlu1 %2164  ;;  %v2196_v25 = vmul.f32 %v4467_v52, %v2188_v48 }
0x18db   :  { %v2175_v32 = vmul.f32 %v2165_v63, %v2155_v33 }
0x18dc   :  { %v2200_v53 = vadd.f32 %v2196_v25, %v2177_v35 }
0x18dd   :  { %v2198_v41 = vadd.f32 %v2194_v30, %v2175_v32 }
0x18de   :  { %v2167_v26 = vpop.permute.xlu1 %2166  ;;  %v2218_v46 = vrot.slane %v2200_v53, 5 }
0x18df   :  { %v2176_v23 = vmul.f32 %v2167_v26, %v2156_v60  ;;  %v2212_v36 = vrot.slane %v2198_v41, 7 }
0x18e1   :  { %v2199_v12 = vadd.f32 %v2195_v39, %v2176_v23 }
0x18e2   :  { %v2182_v37 = vpop.permute.xlu1 %2181 }
0x18e3   :  { %v2193_v44 = vmul.f32 %v5445_v49, %v2182_v37  ;;  %v2215_v24 = vrot.slane %v2199_v12, 6 }
0x18e5   :  { %v2197_v31 = vadd.f32 %v2193_v44, %v2174_v42 }
0x18e7   :  { %v2214_v45 = vsel %vm2213_vm3, %v2212_v36, %v2197_v31 }
0x18e8   :  { %v2217_v40 = vsel %vm2216_vm4, %v2215_v24, %v2214_v45 }
0x18e9   :  { %v2220_v52 = vsel %vm2219_vm5, %v2218_v46, %v2217_v40 }
0x18ea   :  { %2221 = vrot.lane.b32.xlu0 %v2220_v52, %s4739_s10 }
0x18ef   :  { %v2206_v54 = vpop.permute.xlu1 %2205 }
0x18f0   :  { %vm2207_vm6 = vcmp.eq.s32.totalorder %v2206_v54, 1 }
0x195c   :  { %v2222_v58 = vpop.permute.xlu0 %2221 }
0x195d   :  { %v2224_v55 = vsel %vm2207_vm6, %v2222_v58, 0.0  ;;  %v5481_v49 = vsel %vm2207_vm6, %v2222_v58, %v4832_v13  ;;  %vm3958_vm6 = vcmp.gt.s32.totalorder %v4822_v6, 6 }
0x195e   :  { %2226 = vst.msk [vmem:[%s5950_s8] sm:$0xf] %vm69_vm0, %v2224_v55  ;;  %4169 = vmatmul.mubr.msk.f32.vlgmr.msra.gmra.mxu1 %vm1991_vm1, %v5481_v49  ;;  %v2406_v37 = vrot.slane %v5481_v49, 7  ;;  %v2407_v42 = vrot.slane %v5481_v49, 1  ;;  %v2408_v58 = vrot.slane %v5481_v49, 2 }
0x195f   :  { %4183 = vmatpush3.msra.mxu1 %v4812_v4  ;;  %4190 = vmatprep.mubr.msk.f32.mxu1 %vm4735_vm15, %v4734_v15 }
0x1960   :  { %4184 = vmatprep.subr.mxu1 %v4734_v15 }
0x1961   :  { %4185 = vmatpush3.msra.mxu1 %v4810_v3 }
0x1962   :  { %4186 = vmatprep.subr.mxu1 %v4734_v15 }
0x1963   :  { %4187 = vmatpush3.msra.mxu1 %v4807_v2 }
0x1964   :  { %4188 = vmatprep.subr.mxu1 %v4734_v15 }
0x1965   :  { %4189 = vmatpush3.msra.mxu1 %v4805_v1 }
0x1966   :  { %4204 = vmatprep.subr.mxu1 %v4734_v15 }
0x1a1e   :  { %v2297_v13 = vpop.f32.mrf.mxu1 }
0x1a1f   :  { %v2337_v57 = vadd.f32 %v2297_v13, %v5431_v5  ;;  %v2302_v47 = vrot.slane %v2297_v13, 7  ;;  %v2303_v7 = vrot.slane %v2297_v13, 1  ;;  %v2304_v50 = vrot.slane %v2297_v13, 2 }
0x1a20   :  { %v4170_v10 = vpop.f32.mrf.mxu1  ;;  %v2310_v11 = vadd.f32 %v2297_v13, %v4839_v17 }
0x1a21   :  { %v2340_v43 = vrot.slane %v2337_v57, 1  ;;  %v2339_v14 = vrot.slane %v2337_v57, 7  ;;  %v2341_v62 = vrot.slane %v2337_v57, 2  ;;  %v2309_v8 = vadd.f32 %v2302_v47, %v4843_v21 }
0x1a22   :  { %v2311_v9 = vadd.f32 %v2303_v7, %v4845_v22  ;;  %v2312_v19 = vadd.f32 %v2304_v50, %v4841_v18  ;;  %v3925_v56 = vmul.f32 -1.442695, %v2310_v11 }
0x1a23   :  { %2346 = vrot.lane.b32.xlu0 %v2340_v43, %s4736_s25  ;;  %2342 = vrot.lane.b32.xlu1 %v2339_v14, %s4736_s25  ;;  %v3924_v20 = vmul.f32 -1.442695, %v2309_v8 }
0x1a24   :  { %v3926_v28 = vmul.f32 -1.442695, %v2311_v9  ;;  %v3927_v27 = vmul.f32 -1.442695, %v2312_v19 }
0x1a25   :  { %4476 = vpow2.f32 %v3924_v20 }
0x1a26   :  { %4478 = vpow2.f32 %v3926_v28 }
0x1a27   :  { %2348 = vrot.lane.b32.xlu0 %v2341_v62, %s4736_s25  ;;  %2344 = vrot.lane.b32.xlu1 %v2337_v57, %s4736_s25  ;;  %4480 = vpow2.f32 %v3925_v56  ;;  %v2432_v57 = vsel %vm3928_vm7, 1, %v4738_v59 }
0x1a28   :  { %4482 = vpow2.f32 %v3927_v27 }
0x1a32   :  { %v4477_v0 = vpop.eup %4476 }
0x1a33   :  { %v4479_v29 = vpop.eup %4478  ;;  %v2325_v61 = vadd.f32 1.0, %v4477_v0 }
0x1a34   :  { %v4481_v34 = vpop.eup %4480  ;;  %v2327_v16 = vadd.f32 1.0, %v4479_v29 }
0x1a35   :  { %v4483_v63 = vpop.eup %4482  ;;  %v2326_v33 = vadd.f32 1.0, %v4481_v34  ;;  %4484 = vrcp.f32 %v2325_v61 }
0x1a36   :  { %v2328_v48 = vadd.f32 1.0, %v4483_v63  ;;  %4486 = vrcp.f32 %v2327_v16 }
0x1a37   :  { %4488 = vrcp.f32 %v2326_v33 }
0x1a38   :  { %4490 = vrcp.f32 %v2328_v48 }
0x1a42   :  { %v4485_v32 = vpop.eup %4484 }
0x1a43   :  { %v4487_v60 = vpop.eup %4486  ;;  %v2382_v7 = vsub.f32 1.0, %v4485_v32 }
0x1a44   :  { %v4489_v23 = vpop.eup %4488  ;;  %v2384_v9 = vsub.f32 1.0, %v4487_v60 }
0x1a45   :  { %v4491_v39 = vpop.eup %4490  ;;  %v2383_v29 = vsub.f32 1.0, %v4489_v23 }
0x1a46   :  { %v2385_v19 = vsub.f32 1.0, %v4491_v39 }
0x1a95   :  { %v2347_v26 = vpop.permute.xlu0 %2346  ;;  %v2343_v30 = vpop.permute.xlu1 %2342 }
0x1a96   :  { %v2356_v51 = vmul.f32 %v4487_v60, %v2347_v26  ;;  %v2354_v25 = vmul.f32 %v4485_v32, %v2343_v30 }
0x1a98   :  { %2366 = vrot.lane.b32.xlu0 %v2356_v51, %s4736_s25  ;;  %2362 = vrot.lane.b32.xlu1 %v2354_v25, %s4736_s25 }
0x1a99   :  { %v2349_v35 = vpop.permute.xlu0 %2348  ;;  %v2345_v38 = vpop.permute.xlu1 %2344 }
0x1a9a   :  { %v2357_v41 = vmul.f32 %v4491_v39, %v2349_v35  ;;  %v2355_v12 = vmul.f32 %v4489_v23, %v2345_v38 }
0x1a9c   :  { %2368 = vrot.lane.b32.xlu0 %v2357_v41, %s4736_s25  ;;  %2364 = vrot.lane.b32.xlu1 %v2355_v12, %s4736_s25 }
0x1aa0   :  { %2409 = vrot.lane.b32.xlu0 %v2406_v37, %s4737_s30 }
0x1aa4   :  { %2413 = vrot.lane.b32.xlu0 %v2407_v42, %s4737_s30 }
0x1b0a   :  { %v2367_v53 = vpop.permute.xlu0 %2366  ;;  %v2363_v44 = vpop.permute.xlu1 %2362 }
0x1b0b   :  { %v2374_v45 = vadd.f32 %v2363_v44, %v4843_v21  ;;  %v2376_v40 = vadd.f32 %v2367_v53, %v4845_v22 }
0x1b0e   :  { %v2369_v36 = vpop.permute.xlu0 %2368  ;;  %v2365_v31 = vpop.permute.xlu1 %2364 }
0x1b0f   :  { %v2377_v24 = vadd.f32 %v2369_v36, %v4841_v18  ;;  %v2375_v46 = vadd.f32 %v2365_v31, %v4839_v17 }
0x1b11   :  { %4492 = vtanh.f32 %v2377_v24 }
0x1b12   :  { %4494 = vtanh.f32 %v2375_v46  ;;  %v2410_v10 = vpop.permute.xlu0 %2409 }
0x1b13   :  { %4496 = vtanh.f32 %v2374_v45  ;;  %v2421_v20 = vmul.f32 %v4485_v32, %v2410_v10 }
0x1b14   :  { %4498 = vtanh.f32 %v2376_v40 }
0x1b16   :  { %v2414_v43 = vpop.permute.xlu0 %2413 }
0x1b17   :  { %v2423_v27 = vmul.f32 %v4487_v60, %v2414_v43 }
0x1b1e   :  { %v4493_v52 = vpop.eup %4492 }
0x1b1f   :  { %v4495_v54 = vpop.eup %4494  ;;  %2396 = vrot.lane.b32.xlu0 %v4493_v52, %s4739_s10 }
0x1b20   :  { %2392 = vrot.lane.b32.xlu1 %v4495_v54, %s4739_s10  ;;  %v4497_v55 = vpop.eup %4496 }
0x1b21   :  { %v4499_v13 = vpop.eup %4498 }
0x1b23   :  { %2415 = vrot.lane.b32.xlu0 %v2408_v58, %s4737_s30 }
0x1b24   :  { %2390 = vrot.lane.b32.xlu1 %v4497_v55, %s4739_s10 }
0x1b28   :  { %2394 = vrot.lane.b32.xlu1 %v4499_v13, %s4739_s10 }
0x1b2c   :  { %2411 = vrot.lane.b32.xlu1 %v5481_v49, %s4737_s30 }
0x1b30   :  { %2434 = vperm.xlu1 %4450, %v2432_v57  }
0x1b91   :  { %v2397_v14 = vpop.permute.xlu0 %2396 }
0x1b92   :  { %v2393_v62 = vpop.permute.xlu1 %2392  ;;  %v2405_v0 = vmul.f32 %v2397_v14, %v2385_v19 }
0x1b93   :  { %v2403_v63 = vmul.f32 %v2393_v62, %v2383_v29 }
0x1b95   :  { %v2416_v8 = vpop.permute.xlu0 %2415 }
0x1b96   :  { %v2391_v47 = vpop.permute.xlu1 %2390  ;;  %v2424_v28 = vmul.f32 %v4491_v39, %v2416_v8 }
0x1b97   :  { %v2402_v50 = vmul.f32 %v2391_v47, %v2382_v7 }
0x1b98   :  { %v2428_v33 = vadd.f32 %v2424_v28, %v2405_v0 }
0x1b99   :  { %v2425_v61 = vadd.f32 %v2421_v20, %v2402_v50 }
0x1b9a   :  { %v2395_v11 = vpop.permute.xlu1 %2394  ;;  %v2445_v25 = vrot.slane %v2428_v33, 6 }
0x1b9b   :  { %v2404_v56 = vmul.f32 %v2395_v11, %v2384_v9  ;;  %v2441_v26 = vrot.slane %v2425_v61, 1 }
0x1b9d   :  { %v2427_v34 = vadd.f32 %v2423_v27, %v2404_v56 }
0x1b9e   :  { %v2412_v16 = vpop.permute.xlu1 %2411 }
0x1b9f   :  { %v2422_v48 = vmul.f32 %v4489_v23, %v2412_v16  ;;  %v2443_v51 = vrot.slane %v2427_v34, 7 }
0x1ba1   :  { %v2426_v30 = vadd.f32 %v2422_v48, %v2403_v63 }
0x1ba3   :  { %v2442_v35 = vsel %vm2213_vm3, %v2426_v30, %v2441_v26 }
0x1ba4   :  { %v2444_v32 = vsel %vm2216_vm4, %v2443_v51, %v2442_v35 }
0x1ba5   :  { %v2446_v39 = vsel %vm2219_vm5, %v2445_v25, %v2444_v32 }
0x1ba6   :  { %2447 = vrot.lane.b32.xlu0 %v2446_v39, %s4739_s10 }
0x1bab   :  { %v5534_v60 = vpop.permute.xlu1 %2434 }
0x1bac   :  { %vm2436_vm8 = vcmp.eq.s32.totalorder %v5534_v60, 1 }
0x1c18   :  { %v5537_v38 = vpop.permute.xlu0 %2447 }
0x1c19   :  { %v5543_v23 = vsel %vm2436_vm8, %v5537_v38, %v5481_v49 }
0x1c1a   :  { %4180 = vmatmul.mubr.msk.f32.vlgmr.msra.gmra.mxu0 %vm1991_vm1, %v5543_v23  ;;  %v2637_v34 = vrot.slane %v5543_v23, 7  ;;  %v2636_v16 = vrot.slane %v5543_v23, 6  ;;  %v2638_v63 = vrot.slane %v5543_v23, 1 }
0x1c1b   :  { %4194 = vmatpush3.msra.mxu0 %v4812_v4  ;;  %4201 = vmatprep.mubr.msk.f32.mxu0 %vm4735_vm15, %v4734_v15 }
0x1c1c   :  { %4195 = vmatprep.subr.mxu0 %v4734_v15 }
0x1c1d   :  { %4196 = vmatpush3.msra.mxu0 %v4810_v3 }
0x1c1e   :  { %4197 = vmatprep.subr.mxu0 %v4734_v15 }
0x1c1f   :  { %4198 = vmatpush3.msra.mxu0 %v4807_v2 }
0x1c20   :  { %4199 = vmatprep.subr.mxu0 %v4734_v15 }
0x1c21   :  { %4200 = vmatpush3.msra.mxu0 %v4805_v1 }
0x1c22   :  { %4215 = vmatprep.subr.mxu0 %v4734_v15 }
0x1cda   :  { %v2527_v49 = vpop.f32.mrf.mxu0 }
0x1cdb   :  { %v2567_v41 = vadd.f32 %v2527_v49, %v5431_v5  ;;  %v2532_v44 = vrot.slane %v2527_v49, 6  ;;  %v2533_v36 = vrot.slane %v2527_v49, 7  ;;  %v2534_v24 = vrot.slane %v2527_v49, 1 }
0x1cdc   :  { %v4181_v12 = vpop.f32.mrf.mxu0  ;;  %v2541_v45 = vadd.f32 %v2527_v49, %v4845_v22 }
0x1cdd   :  { %v2570_v37 = vrot.slane %v2567_v41, 7  ;;  %v2569_v42 = vrot.slane %v2567_v41, 6  ;;  %v2571_v53 = vrot.slane %v2567_v41, 1  ;;  %v2539_v31 = vadd.f32 %v2532_v44, %v4843_v21 }
0x1cde   :  { %v2540_v46 = vadd.f32 %v2533_v36, %v4839_v17  ;;  %v2542_v52 = vadd.f32 %v2534_v24, %v4841_v18  ;;  %v3932_v58 = vmul.f32 -1.442695, %v2541_v45 }
0x1cdf   :  { %2574 = vrot.lane.b32.xlu0 %v2570_v37, %s4736_s25  ;;  %2572 = vrot.lane.b32.xlu1 %v2569_v42, %s4736_s25  ;;  %v3930_v40 = vmul.f32 -1.442695, %v2539_v31  ;;  %v2662_v37 = vsel %vm3934_vm9, 1, %v4738_v59 }
0x1ce0   :  { %v3931_v54 = vmul.f32 -1.442695, %v2540_v46  ;;  %v3933_v55 = vmul.f32 -1.442695, %v2542_v52 }
0x1ce1   :  { %4500 = vpow2.f32 %v3930_v40 }
0x1ce2   :  { %4502 = vpow2.f32 %v3931_v54 }
0x1ce3   :  { %2576 = vrot.lane.b32.xlu0 %v2567_v41, %s4736_s25  ;;  %2578 = vrot.lane.b32.xlu1 %v2571_v53, %s4736_s25  ;;  %4504 = vpow2.f32 %v3932_v58 }
0x1ce4   :  { %4506 = vpow2.f32 %v3933_v55 }
0x1cee   :  { %v4501_v13 = vpop.eup %4500 }
0x1cef   :  { %v4503_v57 = vpop.eup %4502  ;;  %v2555_v10 = vadd.f32 1.0, %v4501_v13 }
0x1cf0   :  { %v4505_v43 = vpop.eup %4504  ;;  %v2556_v14 = vadd.f32 1.0, %v4503_v57 }
0x1cf1   :  { %v4507_v62 = vpop.eup %4506  ;;  %v2557_v47 = vadd.f32 1.0, %v4505_v43  ;;  %4508 = vrcp.f32 %v2555_v10 }
0x1cf2   :  { %v2558_v7 = vadd.f32 1.0, %v4507_v62  ;;  %4510 = vrcp.f32 %v2556_v14 }
0x1cf3   :  { %4512 = vrcp.f32 %v2557_v47 }
0x1cf4   :  { %4514 = vrcp.f32 %v2558_v7 }
0x1cfe   :  { %v4509_v8 = vpop.eup %4508 }
0x1cff   :  { %v4511_v50 = vpop.eup %4510  ;;  %v2612_v24 = vsub.f32 1.0, %v4509_v8 }
0x1d00   :  { %v5566_v28 = vpop.eup %4512  ;;  %v2613_v36 = vsub.f32 1.0, %v4511_v50 }
0x1d01   :  { %v4515_v56 = vpop.eup %4514  ;;  %v2614_v62 = vsub.f32 1.0, %v5566_v28 }
0x1d02   :  { %v2615_v58 = vsub.f32 1.0, %v4515_v56 }
0x1d51   :  { %v2575_v9 = vpop.permute.xlu0 %2574  ;;  %v2573_v11 = vpop.permute.xlu1 %2572 }
0x1d52   :  { %v2585_v20 = vmul.f32 %v4511_v50, %v2575_v9  ;;  %v2584_v19 = vmul.f32 %v4509_v8, %v2573_v11 }
0x1d54   :  { %2594 = vrot.lane.b32.xlu0 %v2585_v20, %s4736_s25  ;;  %2592 = vrot.lane.b32.xlu1 %v2584_v19, %s4736_s25 }
0x1d55   :  { %v2577_v27 = vpop.permute.xlu0 %2576  ;;  %v2579_v0 = vpop.permute.xlu1 %2578 }
0x1d56   :  { %v2586_v29 = vmul.f32 %v5566_v28, %v2577_v27  ;;  %v2587_v61 = vmul.f32 %v4515_v56, %v2579_v0 }
0x1d58   :  { %2596 = vrot.lane.b32.xlu0 %v2586_v29, %s4736_s25  ;;  %2598 = vrot.lane.b32.xlu1 %v2587_v61, %s4736_s25 }
0x1d5c   :  { %2641 = vrot.lane.b32.xlu0 %v2637_v34, %s4737_s30  ;;  %2639 = vrot.lane.b32.xlu1 %v2636_v16, %s4737_s30 }
0x1d60   :  { %2645 = vrot.lane.b32.xlu0 %v2638_v63, %s4737_s30 }
0x1dc6   :  { %v2595_v33 = vpop.permute.xlu0 %2594  ;;  %v2593_v48 = vpop.permute.xlu1 %2592 }
0x1dc7   :  { %v2605_v26 = vadd.f32 %v2595_v33, %v4839_v17  ;;  %v2604_v30 = vadd.f32 %v2593_v48, %v4843_v21 }
0x1dc9   :  { %4516 = vtanh.f32 %v2605_v26 }
0x1dca   :  { %4518 = vtanh.f32 %v2604_v30  ;;  %v2599_v51 = vpop.permute.xlu1 %2598  ;;  %v2597_v25 = vpop.permute.xlu0 %2596 }
0x1dcb   :  { %v2607_v35 = vadd.f32 %v2599_v51, %v4841_v18  ;;  %v2606_v32 = vadd.f32 %v2597_v25, %v4845_v22 }
0x1dcd   :  { %4520 = vtanh.f32 %v2607_v35 }
0x1dce   :  { %4522 = vtanh.f32 %v2606_v32  ;;  %v2642_v42 = vpop.permute.xlu0 %2641  ;;  %v2640_v44 = vpop.permute.xlu1 %2639 }
0x1dcf   :  { %v2652_v52 = vmul.f32 %v4511_v50, %v2642_v42  ;;  %v2651_v54 = vmul.f32 %v4509_v8, %v2640_v44 }
0x1dd2   :  { %v2646_v53 = vpop.permute.xlu0 %2645 }
0x1dd3   :  { %v2654_v43 = vmul.f32 %v4515_v56, %v2646_v53 }
0x1dd6   :  { %v4517_v39 = vpop.eup %4516 }
0x1dd7   :  { %v4519_v49 = vpop.eup %4518  ;;  %2622 = vrot.lane.b32.xlu0 %v4517_v39, %s4739_s10 }
0x1dd8   :  { %2620 = vrot.lane.b32.xlu1 %v4519_v49, %s4739_s10 }
0x1dda   :  { %v4521_v41 = vpop.eup %4520 }
0x1ddb   :  { %2643 = vrot.lane.b32.xlu0 %v5543_v23, %s4737_s30  ;;  %v4523_v12 = vpop.eup %4522 }
0x1ddc   :  { %2626 = vrot.lane.b32.xlu1 %v4521_v41, %s4739_s10 }
0x1de0   :  { %2624 = vrot.lane.b32.xlu1 %v4523_v12, %s4739_s10 }
0x1de4   :  { %2664 = vperm.xlu1 %4450, %v2662_v37  }
0x1e49   :  { %v2623_v31 = vpop.permute.xlu0 %2622 }
0x1e4a   :  { %v2633_v46 = vmul.f32 %v2623_v31, %v2613_v36  ;;  %v2621_v45 = vpop.permute.xlu1 %2620 }
0x1e4b   :  { %v2632_v40 = vmul.f32 %v2621_v45, %v2612_v24 }
0x1e4c   :  { %v2656_v55 = vadd.f32 %v2652_v52, %v2633_v46 }
0x1e4d   :  { %v2655_v13 = vadd.f32 %v2651_v54, %v2632_v40  ;;  %v2644_v14 = vpop.permute.xlu0 %2643 }
0x1e4e   :  { %v2627_v57 = vpop.permute.xlu1 %2626  ;;  %v2672_v47 = vrot.slane %v2656_v55, 1  ;;  %v2653_v20 = vmul.f32 %v5566_v28, %v2644_v14 }
0x1e4f   :  { %v2635_v10 = vmul.f32 %v2627_v57, %v2615_v58  ;;  %v2671_v7 = vrot.slane %v2655_v13, 2 }
0x1e51   :  { %v2658_v9 = vadd.f32 %v2654_v43, %v2635_v10  ;;  %v2673_v8 = vsel %vm2213_vm3, %v2672_v47, %v2671_v7 }
0x1e52   :  { %v2625_v11 = vpop.permute.xlu1 %2624 }
0x1e53   :  { %v2634_v19 = vmul.f32 %v2625_v11, %v2614_v62  ;;  %v2675_v0 = vrot.slane %v2658_v9, 7 }
0x1e55   :  { %v2657_v27 = vadd.f32 %v2653_v20, %v2634_v19 }
0x1e57   :  { %v2674_v50 = vsel %vm2216_vm4, %v2657_v27, %v2673_v8 }
0x1e58   :  { %v2676_v29 = vsel %vm2219_vm5, %v2675_v0, %v2674_v50 }
0x1e59   :  { %2677 = vrot.lane.b32.xlu0 %v2676_v29, %s4739_s10 }
0x1e5f   :  { %v5597_v56 = vpop.permute.xlu1 %2664 }
0x1e60   :  { %vm2666_vm10 = vcmp.eq.s32.totalorder %v5597_v56, 1 }
0x1ecb   :  { %v5600_v61 = vpop.permute.xlu0 %2677 }
0x1ecc   :  { %v5606_v28 = vsel %vm2666_vm10, %v5600_v61, %v5543_v23 }
0x1ecd   :  { %4191 = vmatmul.mubr.msk.f32.vlgmr.msra.gmra.mxu1 %vm1991_vm1, %v5606_v28  ;;  %v2867_v7 = vrot.slane %v5606_v28, 6  ;;  %v2866_v9 = vrot.slane %v5606_v28, 5  ;;  %v2868_v11 = vrot.slane %v5606_v28, 7 }
0x1ece   :  { %4205 = vmatpush3.msra.mxu1 %v4812_v4  ;;  %4212 = vmatprep.mubr.msk.f32.mxu1 %vm4735_vm15, %v4734_v15 }
0x1ecf   :  { %4206 = vmatprep.subr.mxu1 %v4734_v15 }
0x1ed0   :  { %4207 = vmatpush3.msra.mxu1 %v4810_v3 }
0x1ed1   :  { %4208 = vmatprep.subr.mxu1 %v4734_v15 }
0x1ed2   :  { %4209 = vmatpush3.msra.mxu1 %v4807_v2 }
0x1ed3   :  { %4210 = vmatprep.subr.mxu1 %v4734_v15 }
0x1ed4   :  { %4211 = vmatpush3.msra.mxu1 %v4805_v1 }
0x1ed5   :  { %4226 = vmatprep.subr.mxu1 %v4734_v15 }
0x1f8d   :  { %v2757_v23 = vpop.f32.mrf.mxu1 }
0x1f8e   :  { %v2797_v34 = vadd.f32 %v2757_v23, %v5431_v5  ;;  %v2762_v26 = vrot.slane %v2757_v23, 5  ;;  %v2763_v30 = vrot.slane %v2757_v23, 6  ;;  %v2764_v25 = vrot.slane %v2757_v23, 7 }
0x1f8f   :  { %v4192_v16 = vpop.f32.mrf.mxu1  ;;  %v2772_v32 = vadd.f32 %v2757_v23, %v4841_v18 }
0x1f90   :  { %v2800_v63 = vrot.slane %v2797_v34, 6  ;;  %v2799_v33 = vrot.slane %v2797_v34, 5  ;;  %v2801_v48 = vrot.slane %v2797_v34, 7  ;;  %v2769_v51 = vadd.f32 %v2762_v26, %v4843_v21 }
0x1f91   :  { %v2770_v35 = vadd.f32 %v2763_v30, %v4839_v17  ;;  %v2771_v49 = vadd.f32 %v2764_v25, %v4845_v22  ;;  %v3939_v12 = vmul.f32 -1.442695, %v2772_v32 }
0x1f92   :  { %2804 = vrot.lane.b32.xlu0 %v2800_v63, %s4736_s25  ;;  %2802 = vrot.lane.b32.xlu1 %v2799_v33, %s4736_s25  ;;  %v3936_v39 = vmul.f32 -1.442695, %v2769_v51 }
0x1f93   :  { %v3937_v41 = vmul.f32 -1.442695, %v2770_v35  ;;  %v3938_v37 = vmul.f32 -1.442695, %v2771_v49 }
0x1f94   :  { %4524 = vpow2.f32 %v3936_v39 }
0x1f95   :  { %4526 = vpow2.f32 %v3937_v41 }
0x1f96   :  { %2808 = vrot.lane.b32.xlu0 %v2797_v34, %s4736_s25  ;;  %2806 = vrot.lane.b32.xlu1 %v2801_v48, %s4736_s25  ;;  %4528 = vpow2.f32 %v3939_v12  ;;  %v2892_v48 = vsel %vm3940_vm11, 1, %v4738_v59 }
0x1f97   :  { %4530 = vpow2.f32 %v3938_v37 }
0x1fa1   :  { %v4525_v42 = vpop.eup %4524 }
0x1fa2   :  { %v4527_v53 = vpop.eup %4526  ;;  %v2785_v44 = vadd.f32 1.0, %v4525_v42 }
0x1fa3   :  { %v4529_v36 = vpop.eup %4528  ;;  %v2786_v31 = vadd.f32 1.0, %v4527_v53 }
0x1fa4   :  { %v4531_v24 = vpop.eup %4530  ;;  %v2788_v46 = vadd.f32 1.0, %v4529_v36  ;;  %4532 = vrcp.f32 %v2785_v44 }
0x1fa5   :  { %v2787_v45 = vadd.f32 1.0, %v4531_v24  ;;  %4534 = vrcp.f32 %v2786_v31 }
0x1fa6   :  { %4536 = vrcp.f32 %v2788_v46 }
0x1fa7   :  { %4538 = vrcp.f32 %v2787_v45 }
0x1fb1   :  { %v4533_v40 = vpop.eup %4532 }
0x1fb2   :  { %v4535_v52 = vpop.eup %4534  ;;  %v2842_v32 = vsub.f32 1.0, %v4533_v40 }
0x1fb3   :  { %v5629_v57 = vpop.eup %4536  ;;  %v2843_v25 = vsub.f32 1.0, %v4535_v52 }
0x1fb4   :  { %v4539_v10 = vpop.eup %4538 }
0x1fb5   :  { %v2844_v44 = vsub.f32 1.0, %v4539_v10 }
0x2004   :  { %v2805_v54 = vpop.permute.xlu0 %2804  ;;  %v2803_v58 = vpop.permute.xlu1 %2802 }
0x2005   :  { %v2815_v55 = vmul.f32 %v4535_v52, %v2805_v54  ;;  %v2814_v13 = vmul.f32 %v4533_v40, %v2803_v58 }
0x2007   :  { %2824 = vrot.lane.b32.xlu0 %v2815_v55, %s4736_s25  ;;  %2822 = vrot.lane.b32.xlu1 %v2814_v13, %s4736_s25  ;;  %v2845_v55 = vsub.f32 1.0, %v5629_v57 }
0x2008   :  { %v2809_v43 = vpop.permute.xlu0 %2808  ;;  %v2807_v14 = vpop.permute.xlu1 %2806 }
0x2009   :  { %v2817_v62 = vmul.f32 %v5629_v57, %v2809_v43  ;;  %v2816_v47 = vmul.f32 %v4539_v10, %v2807_v14 }
0x200b   :  { %2828 = vrot.lane.b32.xlu0 %v2817_v62, %s4736_s25  ;;  %2826 = vrot.lane.b32.xlu1 %v2816_v47, %s4736_s25 }
0x200f   :  { %2871 = vrot.lane.b32.xlu0 %v2867_v7, %s4737_s30  ;;  %2869 = vrot.lane.b32.xlu1 %v2866_v9, %s4737_s30 }
0x2013   :  { %2873 = vrot.lane.b32.xlu0 %v2868_v11, %s4737_s30 }
0x2079   :  { %v2825_v20 = vpop.permute.xlu0 %2824  ;;  %v2823_v19 = vpop.permute.xlu1 %2822 }
0x207a   :  { %v2835_v27 = vadd.f32 %v2825_v20, %v4839_v17  ;;  %v2834_v0 = vadd.f32 %v2823_v19, %v4843_v21 }
0x207c   :  { %4540 = vtanh.f32 %v2835_v27 }
0x207d   :  { %4542 = vtanh.f32 %v2834_v0  ;;  %v2827_v8 = vpop.permute.xlu1 %2826  ;;  %v2829_v50 = vpop.permute.xlu0 %2828 }
0x207e   :  { %v2836_v29 = vadd.f32 %v2827_v8, %v4845_v22  ;;  %v2837_v23 = vadd.f32 %v2829_v50, %v4841_v18 }
0x2080   :  { %4544 = vtanh.f32 %v2836_v29 }
0x2081   :  { %4546 = vtanh.f32 %v2837_v23  ;;  %v2872_v26 = vpop.permute.xlu0 %2871  ;;  %v2870_v51 = vpop.permute.xlu1 %2869 }
0x2082   :  { %v2882_v39 = vmul.f32 %v4535_v52, %v2872_v26  ;;  %v2881_v12 = vmul.f32 %v4533_v40, %v2870_v51 }
0x2085   :  { %v2874_v30 = vpop.permute.xlu0 %2873 }
0x2086   :  { %v2883_v31 = vmul.f32 %v4539_v10, %v2874_v30 }
0x2089   :  { %v4541_v34 = vpop.eup %4540 }
0x208a   :  { %v4543_v16 = vpop.eup %4542  ;;  %2852 = vrot.lane.b32.xlu0 %v4541_v34, %s4739_s10 }
0x208b   :  { %2850 = vrot.lane.b32.xlu1 %v4543_v16, %s4739_s10 }
0x208d   :  { %v4545_v63 = vpop.eup %4544 }
0x208e   :  { %2875 = vrot.lane.b32.xlu0 %v5606_v28, %s4737_s30  ;;  %v4547_v33 = vpop.eup %4546 }
0x208f   :  { %2854 = vrot.lane.b32.xlu1 %v4545_v63, %s4739_s10 }
0x2093   :  { %2856 = vrot.lane.b32.xlu1 %v4547_v33, %s4739_s10 }
0x2097   :  { %2894 = vperm.xlu1 %4450, %v2892_v48  }
0x20fc   :  { %v2853_v35 = vpop.permute.xlu0 %2852 }
0x20fd   :  { %v2863_v49 = vmul.f32 %v2853_v35, %v2843_v25  ;;  %v2851_v41 = vpop.permute.xlu1 %2850 }
0x20fe   :  { %v2862_v37 = vmul.f32 %v2851_v41, %v2842_v32 }
0x20ff   :  { %v2886_v42 = vadd.f32 %v2882_v39, %v2863_v49 }
0x2100   :  { %v2885_v53 = vadd.f32 %v2881_v12, %v2862_v37  ;;  %v2876_v54 = vpop.permute.xlu0 %2875 }
0x2101   :  { %v2855_v36 = vpop.permute.xlu1 %2854  ;;  %v2902_v46 = vrot.slane %v2886_v42, 2  ;;  %v2884_v43 = vmul.f32 %v5629_v57, %v2876_v54 }
0x2102   :  { %v2864_v24 = vmul.f32 %v2855_v36, %v2844_v44  ;;  %v2901_v45 = vrot.slane %v2885_v53, 3 }
0x2104   :  { %v2887_v58 = vadd.f32 %v2883_v31, %v2864_v24  ;;  %v2903_v40 = vsel %vm2213_vm3, %v2902_v46, %v2901_v45 }
0x2105   :  { %v2857_v13 = vpop.permute.xlu1 %2856 }
0x2106   :  { %v2904_v52 = vrot.slane %v2887_v58, 1  ;;  %v2865_v14 = vmul.f32 %v2857_v13, %v2845_v55 }
0x2108   :  { %v2888_v62 = vadd.f32 %v2884_v43, %v2865_v14  ;;  %v2905_v47 = vsel %vm2216_vm4, %v2904_v52, %v2903_v40 }
0x210a   :  { %v2906_v7 = vsel %vm2219_vm5, %v2888_v62, %v2905_v47 }
0x210b   :  { %2907 = vrot.lane.b32.xlu0 %v2906_v7, %s4739_s10 }
0x2112   :  { %v5660_v10 = vpop.permute.xlu1 %2894 }
0x2113   :  { %vm2896_vm12 = vcmp.eq.s32.totalorder %v5660_v10, 1 }
0x217d   :  { %v5663_v9 = vpop.permute.xlu0 %2907 }
0x217e   :  { %v5669_v57 = vsel %vm2896_vm12, %v5663_v9, %v5606_v28 }
0x217f   :  { %4202 = vmatmul.mubr.msk.f32.vlgmr.msra.gmra.mxu0 %vm1991_vm1, %v5669_v57  ;;  %v3099_v52 = vrot.slane %v5669_v57, 5  ;;  %v3098_v14 = vrot.slane %v5669_v57, 4  ;;  %v3100_v40 = vrot.slane %v5669_v57, 6 }
0x2180   :  { %4216 = vmatpush3.msra.mxu0 %v4812_v4  ;;  %4223 = vmatprep.mubr.msk.f32.mxu0 %vm4735_vm15, %v4734_v15 }
0x2181   :  { %4217 = vmatprep.subr.mxu0 %v4734_v15 }
0x2182   :  { %4218 = vmatpush3.msra.mxu0 %v4810_v3 }
0x2183   :  { %4219 = vmatprep.subr.mxu0 %v4734_v15 }
0x2184   :  { %4220 = vmatpush3.msra.mxu0 %v4807_v2 }
0x2185   :  { %4221 = vmatprep.subr.mxu0 %v4734_v15 }
0x2186   :  { %4222 = vmatpush3.msra.mxu0 %v4805_v1 }
0x223f   :  { %v2987_v28 = vpop.f32.mrf.mxu0 }
0x2240   :  { %v3028_v11 = vadd.f32 %v2987_v28, %v5431_v5  ;;  %v2992_v50 = vrot.slane %v2987_v28, 4  ;;  %v2993_v29 = vrot.slane %v2987_v28, 5  ;;  %v2994_v23 = vrot.slane %v2987_v28, 6 }
0x2241   :  { %v4203_v20 = vpop.f32.mrf.mxu0  ;;  %v2995_v16 = vrot.slane %v2987_v28, 7 }
0x2242   :  { %v3031_v19 = vrot.slane %v3028_v11, 5  ;;  %v3030_v27 = vrot.slane %v3028_v11, 4  ;;  %v3033_v0 = vrot.slane %v3028_v11, 7  ;;  %v3032_v8 = vrot.slane %v3028_v11, 6 }
0x2243   :  { %v3000_v34 = vadd.f32 %v2992_v50, %v4843_v21  ;;  %v3001_v63 = vadd.f32 %v2993_v29, %v4839_v17  ;;  %v3002_v33 = vadd.f32 %v2994_v23, %v4845_v22  ;;  %v3003_v26 = vadd.f32 %v2995_v16, %v4841_v18 }
0x2244   :  { %3036 = vrot.lane.b32.xlu0 %v3031_v19, %s4736_s25  ;;  %3034 = vrot.lane.b32.xlu1 %v3030_v27, %s4736_s25  ;;  %v3101_v50 = vrot.slane %v5669_v57, 7 }
0x2245   :  { %v3942_v48 = vmul.f32 -1.442695, %v3000_v34  ;;  %v3943_v30 = vmul.f32 -1.442695, %v3001_v63  ;;  %v3944_v51 = vmul.f32 -1.442695, %v3002_v33 }
0x2246   :  { %v3945_v25 = vmul.f32 -1.442695, %v3003_v26  ;;  %v3125_v34 = vsel %vm3946_vm13, 1, %v4738_v59 }
0x2247   :  { %4548 = vpow2.f32 %v3942_v48 }
0x2248   :  { %3040 = vrot.lane.b32.xlu0 %v3033_v0, %s4736_s25  ;;  %3038 = vrot.lane.b32.xlu1 %v3032_v8, %s4736_s25  ;;  %4550 = vpow2.f32 %v3943_v30 }
0x2249   :  { %4552 = vpow2.f32 %v3944_v51 }
0x224a   :  { %4554 = vpow2.f32 %v3945_v25 }
0x2254   :  { %v4549_v35 = vpop.eup %4548 }
0x2255   :  { %v4551_v32 = vpop.eup %4550  ;;  %v3016_v39 = vadd.f32 1.0, %v4549_v35 }
0x2256   :  { %v4553_v49 = vpop.eup %4552  ;;  %v3017_v41 = vadd.f32 1.0, %v4551_v32 }
0x2257   :  { %v4555_v12 = vpop.eup %4554  ;;  %v3018_v37 = vadd.f32 1.0, %v4553_v49  ;;  %4556 = vrcp.f32 %v3016_v39 }
0x2258   :  { %v3019_v42 = vadd.f32 1.0, %v4555_v12  ;;  %4558 = vrcp.f32 %v3017_v41 }
0x2259   :  { %4560 = vrcp.f32 %v3018_v37 }
0x225a   :  { %4562 = vrcp.f32 %v3019_v42 }
0x2264   :  { %v4557_v53 = vpop.eup %4556 }
0x2265   :  { %v4559_v44 = vpop.eup %4558  ;;  %v3074_v30 = vsub.f32 1.0, %v4557_v53 }
0x2266   :  { %v4561_v45 = vpop.eup %4560  ;;  %v3075_v48 = vsub.f32 1.0, %v4559_v44 }
0x2267   :  { %v5693_v54 = vpop.eup %4562  ;;  %v3076_v49 = vsub.f32 1.0, %v4561_v45 }
0x22b6   :  { %v3037_v36 = vpop.permute.xlu0 %3036  ;;  %v3035_v31 = vpop.permute.xlu1 %3034 }
0x22b7   :  { %v3047_v24 = vmul.f32 %v4559_v44, %v3037_v36  ;;  %v3046_v46 = vmul.f32 %v4557_v53, %v3035_v31 }
0x22b9   :  { %3056 = vrot.lane.b32.xlu0 %v3047_v24, %s4736_s25  ;;  %3054 = vrot.lane.b32.xlu1 %v3046_v46, %s4736_s25  ;;  %v3077_v46 = vsub.f32 1.0, %v5693_v54 }
0x22ba   :  { %v3041_v58 = vpop.permute.xlu0 %3040  ;;  %v3039_v55 = vpop.permute.xlu1 %3038 }
0x22bb   :  { %v3049_v13 = vmul.f32 %v5693_v54, %v3041_v58  ;;  %v3048_v43 = vmul.f32 %v4561_v45, %v3039_v55 }
0x22bd   :  { %3060 = vrot.lane.b32.xlu0 %v3049_v13, %s4736_s25  ;;  %3058 = vrot.lane.b32.xlu1 %v3048_v43, %s4736_s25 }
0x22c1   :  { %3104 = vrot.lane.b32.xlu0 %v3099_v52, %s4737_s30  ;;  %3102 = vrot.lane.b32.xlu1 %v3098_v14, %s4737_s30 }
0x22c5   :  { %3106 = vrot.lane.b32.xlu0 %v3100_v40, %s4737_s30 }
0x232b   :  { %v3057_v62 = vpop.permute.xlu0 %3056  ;;  %v3055_v47 = vpop.permute.xlu1 %3054 }
0x232c   :  { %v3067_v7 = vadd.f32 %v3057_v62, %v4839_v17  ;;  %v3066_v28 = vadd.f32 %v3055_v47, %v4843_v21 }
0x232e   :  { %4564 = vtanh.f32 %v3067_v7 }
0x232f   :  { %4566 = vtanh.f32 %v3066_v28  ;;  %v3059_v11 = vpop.permute.xlu1 %3058  ;;  %v3061_v20 = vpop.permute.xlu0 %3060 }
0x2330   :  { %v3068_v19 = vadd.f32 %v3059_v11, %v4845_v22  ;;  %v3069_v27 = vadd.f32 %v3061_v20, %v4841_v18 }
0x2332   :  { %4568 = vtanh.f32 %v3068_v19 }
0x2333   :  { %4570 = vtanh.f32 %v3069_v27  ;;  %v3105_v16 = vpop.permute.xlu0 %3104  ;;  %v3103_v33 = vpop.permute.xlu1 %3102 }
0x2334   :  { %v3115_v32 = vmul.f32 %v4559_v44, %v3105_v16  ;;  %v3114_v39 = vmul.f32 %v4557_v53, %v3103_v33 }
0x2337   :  { %v3107_v63 = vpop.permute.xlu0 %3106 }
0x2338   :  { %v3116_v12 = vmul.f32 %v4561_v45, %v3107_v63 }
0x233b   :  { %v4565_v0 = vpop.eup %4564 }
0x233c   :  { %v4567_v8 = vpop.eup %4566  ;;  %3084 = vrot.lane.b32.xlu0 %v4565_v0, %s4739_s10 }
0x233d   :  { %3082 = vrot.lane.b32.xlu1 %v4567_v8, %s4739_s10 }
0x233f   :  { %v4569_v29 = vpop.eup %4568 }
0x2340   :  { %3108 = vrot.lane.b32.xlu0 %v3101_v50, %s4737_s30  ;;  %v4571_v23 = vpop.eup %4570 }
0x2341   :  { %3086 = vrot.lane.b32.xlu1 %v4569_v29, %s4739_s10 }
0x2345   :  { %3088 = vrot.lane.b32.xlu1 %v4571_v23, %s4739_s10 }
0x2349   :  { %3127 = vperm.xlu1 %4450, %v3125_v34  }
0x23ae   :  { %v3085_v26 = vpop.permute.xlu0 %3084 }
0x23af   :  { %v3083_v51 = vpop.permute.xlu1 %3082  ;;  %v3095_v25 = vmul.f32 %v3085_v26, %v3075_v48 }
0x23b0   :  { %v3094_v35 = vmul.f32 %v3083_v51, %v3074_v30 }
0x23b1   :  { %v3119_v37 = vadd.f32 %v3115_v32, %v3095_v25 }
0x23b2   :  { %v3118_v42 = vadd.f32 %v3114_v39, %v3094_v35  ;;  %v3109_v31 = vpop.permute.xlu0 %3108 }
0x23b3   :  { %v3087_v41 = vpop.permute.xlu1 %3086  ;;  %v3135_v55 = vrot.slane %v3119_v37, 3  ;;  %v3117_v43 = vmul.f32 %v5693_v54, %v3109_v31 }
0x23b4   :  { %v3096_v36 = vmul.f32 %v3087_v41, %v3076_v49  ;;  %v3134_v13 = vrot.slane %v3118_v42, 4 }
0x23b6   :  { %v3120_v24 = vadd.f32 %v3116_v12, %v3096_v36  ;;  %v3136_v53 = vsel %vm2213_vm3, %v3135_v55, %v3134_v13 }
0x23b7   :  { %v3089_v58 = vpop.permute.xlu1 %3088 }
0x23b8   :  { %v3097_v52 = vmul.f32 %v3089_v58, %v3077_v46  ;;  %v3137_v14 = vrot.slane %v3120_v24, 2 }
0x23ba   :  { %v3121_v40 = vadd.f32 %v3117_v43, %v3097_v52  ;;  %v3138_v45 = vsel %vm2216_vm4, %v3137_v14, %v3136_v53 }
0x23bc   :  { %v3139_v44 = vrot.slane %v3121_v40, 1 }
0x23be   :  { %v3140_v62 = vsel %vm2219_vm5, %v3139_v44, %v3138_v45 }
0x23bf   :  { %3141 = vrot.lane.b32.xlu0 %v3140_v62, %s4739_s10 }
0x23c4   :  { %v3128_v47 = vpop.permute.xlu1 %3127 }
0x23c5   :  { %vm3129_vm14 = vcmp.eq.s32.totalorder %v3128_v47, 1 }
0x2431   :  { %v3142_v7 = vpop.permute.xlu0 %3141 }
0x2432   :  { %v3144_v28 = vsel %vm3129_vm14, %v3142_v7, 0.0  ;;  %v5723_v11 = vsel %vm3129_vm14, %v3142_v7, %v5669_v57 }
0x2433   :  { %3145 = vst.msk [vmem:[%s5950_s8 + $0x4] sm:$0xf] %vm69_vm0, %v3144_v28  ;;  %4213 = vmatmul.mubr.msk.f32.vlgmr.msra.gmra.mxu1 %vm1991_vm1, %v5723_v11  ;;  %v3328_v43 = vrot.slane %v5723_v11, 4  ;;  %v3327_v52 = vrot.slane %v5723_v11, 3  ;;  %v3329_v14 = vrot.slane %v5723_v11, 5 }
0x2434   :  { %4227 = vmatpush3.msra.mxu1 %v4812_v4  ;;  %4234 = vmatprep.mubr.msk.f32.mxu1 %vm4735_vm15, %v4734_v15  ;;  %vm3952_vm15 = vcmp.gt.s32.totalorder %v4822_v6, 5 }
0x2435   :  { %4228 = vmatprep.subr.mxu1 %v4734_v15 }
0x2436   :  { %4229 = vmatpush3.msra.mxu1 %v4810_v3 }
0x2437   :  { %4230 = vmatprep.subr.mxu1 %v4734_v15 }
0x2438   :  { %4231 = vmatpush3.msra.mxu1 %v4807_v2 }
0x2439   :  { %4232 = vmatprep.subr.mxu1 %v4734_v15 }
0x243a   :  { %4233 = vmatpush3.msra.mxu1 %v4805_v1 }
0x24f3   :  { %v3216_v57 = vpop.f32.mrf.mxu1 }
0x24f4   :  { %v3257_v54 = vadd.f32 %v3216_v57, %v5431_v5  ;;  %v3221_v2 = vrot.slane %v3216_v57, 3  ;;  %v3222_v15 = vrot.slane %v3216_v57, 4  ;;  %v3223_v0 = vrot.slane %v3216_v57, 5 }
0x24f5   :  { %v4214_v20 = vpop.f32.mrf.mxu1  ;;  %v3224_v8 = vrot.slane %v3216_v57, 6 }
0x24f6   :  { %v3260_v4 = vrot.slane %v3257_v54, 4  ;;  %v3259_v19 = vrot.slane %v3257_v54, 3  ;;  %v3262_v27 = vrot.slane %v3257_v54, 6  ;;  %v3261_v3 = vrot.slane %v3257_v54, 5 }
0x24f7   :  { %v3229_v1 = vadd.f32 %v3221_v2, %v4843_v21  ;;  %v3230_v50 = vadd.f32 %v3222_v15, %v4839_v17  ;;  %v3231_v29 = vadd.f32 %v3223_v0, %v4845_v22  ;;  %v3232_v34 = vadd.f32 %v3224_v8, %v4841_v18 }
0x24f8   :  { %3265 = vrot.lane.b32.xlu0 %v3260_v4, %s4736_s25  ;;  %3263 = vrot.lane.b32.xlu1 %v3259_v19, %s4736_s25  ;;  %v3330_v20 = vrot.slane %v5723_v11, 6 }
0x24f9   :  { %v3948_v23 = vmul.f32 -1.442695, %v3229_v1  ;;  %v3949_v16 = vmul.f32 -1.442695, %v3230_v50  ;;  %v3950_v63 = vmul.f32 -1.442695, %v3231_v29 }
0x24fa   :  { %v3951_v33 = vmul.f32 -1.442695, %v3232_v34 }
0x24fb   :  { %4572 = vpow2.f32 %v3948_v23 }
0x24fc   :  { %3269 = vrot.lane.b32.xlu0 %v3262_v27, %s4736_s25  ;;  %3267 = vrot.lane.b32.xlu1 %v3261_v3, %s4736_s25  ;;  %4574 = vpow2.f32 %v3949_v16  ;;  %v3354_v27 = vsel %vm3952_vm15, 1, %v4738_v59 }
0x24fd   :  { %4576 = vpow2.f32 %v3950_v63 }
0x24fe   :  { %4578 = vpow2.f32 %v3951_v33 }
0x2508   :  { %v4573_v48 = vpop.eup %4572 }
0x2509   :  { %v4575_v26 = vpop.eup %4574  ;;  %v3245_v30 = vadd.f32 1.0, %v4573_v48 }
0x250a   :  { %v4577_v51 = vpop.eup %4576  ;;  %v3246_v25 = vadd.f32 1.0, %v4575_v26 }
0x250b   :  { %v4579_v35 = vpop.eup %4578  ;;  %v3247_v32 = vadd.f32 1.0, %v4577_v51  ;;  %4580 = vrcp.f32 %v3245_v30 }
0x250c   :  { %v3248_v39 = vadd.f32 1.0, %v4579_v35  ;;  %4582 = vrcp.f32 %v3246_v25 }
0x250d   :  { %4584 = vrcp.f32 %v3247_v32 }
0x250e   :  { %4586 = vrcp.f32 %v3248_v39 }
0x2518   :  { %v4581_v49 = vpop.eup %4580 }
0x2519   :  { %v4583_v41 = vpop.eup %4582  ;;  %v3303_v8 = vsub.f32 1.0, %v4581_v49 }
0x251a   :  { %v4585_v31 = vpop.eup %4584  ;;  %v3304_v0 = vsub.f32 1.0, %v4583_v41 }
0x251b   :  { %v5751_v24 = vpop.eup %4586  ;;  %v3305_v63 = vsub.f32 1.0, %v4585_v31 }
0x251c   :  { %v3306_v32 = vsub.f32 1.0, %v5751_v24 }
0x256a   :  { %v3266_v12 = vpop.permute.xlu0 %3265  ;;  %v3264_v37 = vpop.permute.xlu1 %3263 }
0x256b   :  { %v3276_v42 = vmul.f32 %v4583_v41, %v3266_v12  ;;  %v3275_v36 = vmul.f32 %v4581_v49, %v3264_v37 }
0x256d   :  { %3285 = vrot.lane.b32.xlu0 %v3276_v42, %s4736_s25  ;;  %3283 = vrot.lane.b32.xlu1 %v3275_v36, %s4736_s25 }
0x256e   :  { %v3270_v46 = vpop.permute.xlu0 %3269  ;;  %v3268_v58 = vpop.permute.xlu1 %3267 }
0x256f   :  { %v3278_v55 = vmul.f32 %v5751_v24, %v3270_v46  ;;  %v3277_v13 = vmul.f32 %v4585_v31, %v3268_v58 }
0x2571   :  { %3289 = vrot.lane.b32.xlu0 %v3278_v55, %s4736_s25  ;;  %3287 = vrot.lane.b32.xlu1 %v3277_v13, %s4736_s25 }
0x2575   :  { %3333 = vrot.lane.b32.xlu0 %v3328_v43, %s4737_s30  ;;  %3331 = vrot.lane.b32.xlu1 %v3327_v52, %s4737_s30 }
0x2579   :  { %3335 = vrot.lane.b32.xlu0 %v3329_v14, %s4737_s30 }
0x25df   :  { %v3286_v40 = vpop.permute.xlu0 %3285  ;;  %v3284_v44 = vpop.permute.xlu1 %3283 }
0x25e0   :  { %v3296_v53 = vadd.f32 %v3286_v40, %v4839_v17  ;;  %v3295_v45 = vadd.f32 %v3284_v44, %v4843_v21 }
0x25e2   :  { %4588 = vtanh.f32 %v3296_v53 }
0x25e3   :  { %4590 = vtanh.f32 %v3295_v45  ;;  %v3288_v62 = vpop.permute.xlu1 %3287  ;;  %v3290_v47 = vpop.permute.xlu0 %3289 }
0x25e4   :  { %v3297_v7 = vadd.f32 %v3288_v62, %v4845_v22  ;;  %v3298_v28 = vadd.f32 %v3290_v47, %v4841_v18 }
0x25e6   :  { %4592 = vtanh.f32 %v3297_v7 }
0x25e7   :  { %4594 = vtanh.f32 %v3298_v28  ;;  %v3334_v3 = vpop.permute.xlu0 %3333  ;;  %v3332_v15 = vpop.permute.xlu1 %3331 }
0x25e8   :  { %v3344_v34 = vmul.f32 %v4583_v41, %v3334_v3  ;;  %v3343_v16 = vmul.f32 %v4581_v49, %v3332_v15 }
0x25eb   :  { %v3336_v2 = vpop.permute.xlu0 %3335 }
0x25ec   :  { %v3345_v48 = vmul.f32 %v4585_v31, %v3336_v2 }
0x25ef   :  { %v4589_v57 = vpop.eup %4588 }
0x25f0   :  { %v4591_v54 = vpop.eup %4590  ;;  %3313 = vrot.lane.b32.xlu0 %v4589_v57, %s4739_s10 }
0x25f1   :  { %3311 = vrot.lane.b32.xlu1 %v4591_v54, %s4739_s10 }
0x25f3   :  { %v4593_v4 = vpop.eup %4592 }
0x25f4   :  { %3337 = vrot.lane.b32.xlu0 %v3330_v20, %s4737_s30  ;;  %v4595_v19 = vpop.eup %4594 }
0x25f5   :  { %3315 = vrot.lane.b32.xlu1 %v4593_v4, %s4739_s10 }
0x25f9   :  { %3317 = vrot.lane.b32.xlu1 %v4595_v19, %s4739_s10 }
0x25fd   :  { %3356 = vperm.xlu1 %4450, %v3354_v27  }
0x2662   :  { %v3314_v1 = vpop.permute.xlu0 %3313 }
0x2663   :  { %v3312_v50 = vpop.permute.xlu1 %3311  ;;  %v3324_v29 = vmul.f32 %v3314_v1, %v3304_v0 }
0x2664   :  { %v3323_v23 = vmul.f32 %v3312_v50, %v3303_v8 }
0x2665   :  { %v3348_v26 = vadd.f32 %v3344_v34, %v3324_v29 }
0x2666   :  { %v3347_v30 = vadd.f32 %v3343_v16, %v3323_v23  ;;  %v3338_v25 = vpop.permute.xlu0 %3337 }
0x2667   :  { %v3316_v33 = vpop.permute.xlu1 %3315  ;;  %v3364_v12 = vrot.slane %v3348_v26, 4  ;;  %v3346_v42 = vmul.f32 %v5751_v24, %v3338_v25 }
0x2668   :  { %v3325_v51 = vmul.f32 %v3316_v33, %v3305_v63  ;;  %v3363_v37 = vrot.slane %v3347_v30, 5 }
0x266a   :  { %v3349_v35 = vadd.f32 %v3345_v48, %v3325_v51  ;;  %v3365_v49 = vsel %vm2213_vm3, %v3364_v12, %v3363_v37 }
0x266b   :  { %v3318_v39 = vpop.permute.xlu1 %3317 }
0x266c   :  { %v3326_v36 = vmul.f32 %v3318_v39, %v3306_v32  ;;  %v3366_v46 = vrot.slane %v3349_v35, 3 }
0x266e   :  { %v3350_v58 = vadd.f32 %v3346_v42, %v3326_v36  ;;  %v3367_v31 = vsel %vm2216_vm4, %v3366_v46, %v3365_v49 }
0x2670   :  { %v3368_v41 = vrot.slane %v3350_v58, 2 }
0x2672   :  { %v3369_v55 = vsel %vm2219_vm5, %v3368_v41, %v3367_v31 }
0x2673   :  { %3370 = vrot.lane.b32.xlu0 %v3369_v55, %s4739_s10 }
0x2678   :  { %v5780_v13 = vpop.permute.xlu1 %3356 }
0x2679   :  { %vm3358_vm2 = vcmp.eq.s32.totalorder %v5780_v13, 1 }
0x26e5   :  { %v5783_v43 = vpop.permute.xlu0 %3370 }
0x26e6   :  { %v5789_v24 = vsel %vm3358_vm2, %v5783_v43, %v5723_v11 }
0x26e7   :  { %4224 = vmatmul.mubr.msk.f32.vlgmr.msra.gmra.mxu0 %vm1991_vm1, %v5789_v24  ;;  %v3561_v37 = vrot.slane %v5789_v24, 3  ;;  %v3560_v42 = vrot.slane %v5789_v24, 2  ;;  %v3562_v36 = vrot.slane %v5789_v24, 4 }
0x27a7   :  { %v3449_v52 = vpop.f32.mrf.mxu0 }
0x27a8   :  { %v3490_v14 = vadd.f32 %v3449_v52, %v5431_v5  ;;  %v3454_v11 = vrot.slane %v3449_v52, 2  ;;  %v3455_v47 = vrot.slane %v3449_v52, 3  ;;  %v3456_v7 = vrot.slane %v3449_v52, 4 }
0x27a9   :  { %v4225_v40 = vpop.f32.mrf.mxu0  ;;  %v3457_v57 = vrot.slane %v3449_v52, 5 }
0x27aa   :  { %v3493_v44 = vrot.slane %v3490_v14, 3  ;;  %v3492_v53 = vrot.slane %v3490_v14, 2  ;;  %v3495_v45 = vrot.slane %v3490_v14, 5  ;;  %v3494_v62 = vrot.slane %v3490_v14, 4 }
0x27ab   :  { %v3462_v28 = vadd.f32 %v3454_v11, %v4843_v21  ;;  %v3463_v54 = vadd.f32 %v3455_v47, %v4839_v17  ;;  %v3464_v20 = vadd.f32 %v3456_v7, %v4845_v22  ;;  %v3465_v19 = vadd.f32 %v3457_v57, %v4841_v18 }
0x27ac   :  { %3498 = vrot.lane.b32.xlu0 %v3493_v44, %s4736_s25  ;;  %3496 = vrot.lane.b32.xlu1 %v3492_v53, %s4736_s25  ;;  %v3563_v53 = vrot.slane %v5789_v24, 5  ;;  %v3587_v11 = vsel %vm3958_vm6, 1, %v4738_v59 }
0x27ad   :  { %v3954_v4 = vmul.f32 -1.442695, %v3462_v28  ;;  %v3955_v27 = vmul.f32 -1.442695, %v3463_v54  ;;  %v3956_v3 = vmul.f32 -1.442695, %v3464_v20 }
0x27ae   :  { %v3957_v2 = vmul.f32 -1.442695, %v3465_v19 }
0x27af   :  { %4596 = vpow2.f32 %v3954_v4 }
0x27b0   :  { %3502 = vrot.lane.b32.xlu0 %v3495_v45, %s4736_s25  ;;  %3500 = vrot.lane.b32.xlu1 %v3494_v62, %s4736_s25  ;;  %4598 = vpow2.f32 %v3955_v27 }
0x27b1   :  { %4600 = vpow2.f32 %v3956_v3 }
0x27b2   :  { %4602 = vpow2.f32 %v3957_v2 }
0x27bc   :  { %v4597_v15 = vpop.eup %4596 }
0x27bd   :  { %v4599_v0 = vpop.eup %4598  ;;  %v3478_v1 = vadd.f32 1.0, %v4597_v15 }
0x27be   :  { %v4601_v8 = vpop.eup %4600  ;;  %v3479_v50 = vadd.f32 1.0, %v4599_v0 }
0x27bf   :  { %v4603_v29 = vpop.eup %4602  ;;  %v3480_v23 = vadd.f32 1.0, %v4601_v8  ;;  %4604 = vrcp.f32 %v3478_v1 }
0x27c0   :  { %v3481_v34 = vadd.f32 1.0, %v4603_v29  ;;  %4606 = vrcp.f32 %v3479_v50 }
0x27c1   :  { %4608 = vrcp.f32 %v3480_v23 }
0x27c2   :  { %4610 = vrcp.f32 %v3481_v34 }
0x27cc   :  { %v4605_v16 = vpop.eup %4604 }
0x27cd   :  { %v4607_v63 = vpop.eup %4606  ;;  %v3536_v20 = vsub.f32 1.0, %v4605_v16 }
0x27ce   :  { %v4609_v51 = vpop.eup %4608  ;;  %v3537_v57 = vsub.f32 1.0, %v4607_v63 }
0x27cf   :  { %v5804_v25 = vpop.eup %4610  ;;  %v3538_v15 = vsub.f32 1.0, %v4609_v51 }
0x281e   :  { %v3499_v33 = vpop.permute.xlu0 %3498  ;;  %v3497_v48 = vpop.permute.xlu1 %3496 }
0x281f   :  { %v3509_v26 = vmul.f32 %v4607_v63, %v3499_v33  ;;  %v3508_v30 = vmul.f32 %v4605_v16, %v3497_v48  ;;  %v3539_v33 = vsub.f32 1.0, %v5804_v25 }
0x2821   :  { %3518 = vrot.lane.b32.xlu0 %v3509_v26, %s4736_s25  ;;  %3516 = vrot.lane.b32.xlu1 %v3508_v30, %s4736_s25 }
0x2822   :  { %v3503_v35 = vpop.permute.xlu0 %3502  ;;  %v3501_v32 = vpop.permute.xlu1 %3500 }
0x2823   :  { %v3511_v39 = vmul.f32 %v5804_v25, %v3503_v35  ;;  %v3510_v12 = vmul.f32 %v4609_v51, %v3501_v32 }
0x2825   :  { %3522 = vrot.lane.b32.xlu0 %v3511_v39, %s4736_s25  ;;  %3520 = vrot.lane.b32.xlu1 %v3510_v12, %s4736_s25 }
0x2829   :  { %3566 = vrot.lane.b32.xlu0 %v3561_v37, %s4737_s30  ;;  %3564 = vrot.lane.b32.xlu1 %v3560_v42, %s4737_s30 }
0x282d   :  { %3568 = vrot.lane.b32.xlu0 %v3562_v36, %s4737_s30 }
0x2893   :  { %v3519_v46 = vpop.permute.xlu0 %3518  ;;  %v3517_v58 = vpop.permute.xlu1 %3516 }
0x2894   :  { %v3529_v49 = vadd.f32 %v3519_v46, %v4839_v17  ;;  %v3528_v41 = vadd.f32 %v3517_v58, %v4843_v21 }
0x2896   :  { %4612 = vtanh.f32 %v3529_v49 }
0x2897   :  { %4614 = vtanh.f32 %v3528_v41  ;;  %v3521_v31 = vpop.permute.xlu1 %3520  ;;  %v3523_v55 = vpop.permute.xlu0 %3522 }
0x2898   :  { %v3530_v52 = vadd.f32 %v3521_v31, %v4845_v22  ;;  %v3531_v14 = vadd.f32 %v3523_v55, %v4841_v18 }
0x289a   :  { %4616 = vtanh.f32 %v3530_v52 }
0x289b   :  { %4618 = vtanh.f32 %v3531_v14  ;;  %v3567_v47 = vpop.permute.xlu0 %3566  ;;  %v3565_v28 = vpop.permute.xlu1 %3564 }
0x289c   :  { %v3577_v3 = vmul.f32 %v4607_v63, %v3567_v47  ;;  %v3576_v2 = vmul.f32 %v4605_v16, %v3565_v28 }
0x289f   :  { %v3569_v7 = vpop.permute.xlu0 %3568 }
0x28a0   :  { %v3578_v1 = vmul.f32 %v4609_v51, %v3569_v7 }
0x28a3   :  { %v4613_v40 = vpop.eup %4612 }
0x28a4   :  { %v4615_v44 = vpop.eup %4614  ;;  %3546 = vrot.lane.b32.xlu0 %v4613_v40, %s4739_s10 }
0x28a5   :  { %3544 = vrot.lane.b32.xlu1 %v4615_v44, %s4739_s10 }
0x28a7   :  { %v4617_v45 = vpop.eup %4616 }
0x28a8   :  { %3570 = vrot.lane.b32.xlu0 %v3563_v53, %s4737_s30  ;;  %v4619_v62 = vpop.eup %4618 }
0x28a9   :  { %3548 = vrot.lane.b32.xlu1 %v4617_v45, %s4739_s10 }
0x28ad   :  { %3550 = vrot.lane.b32.xlu1 %v4619_v62, %s4739_s10 }
0x28b1   :  { %3589 = vperm.xlu1 %4450, %v3587_v11  }
0x2916   :  { %v3547_v54 = vpop.permute.xlu0 %3546 }
0x2917   :  { %v3545_v4 = vpop.permute.xlu1 %3544  ;;  %v3557_v19 = vmul.f32 %v3547_v54, %v3537_v57 }
0x2918   :  { %v3556_v27 = vmul.f32 %v3545_v4, %v3536_v20 }
0x2919   :  { %v3581_v8 = vadd.f32 %v3577_v3, %v3557_v19 }
0x291a   :  { %v3580_v50 = vadd.f32 %v3576_v2, %v3556_v27  ;;  %v3571_v23 = vpop.permute.xlu0 %3570 }
0x291b   :  { %v3549_v0 = vpop.permute.xlu1 %3548  ;;  %v3597_v26 = vrot.slane %v3581_v8, 5  ;;  %v3579_v35 = vmul.f32 %v5804_v25, %v3571_v23 }
0x291c   :  { %v3558_v29 = vmul.f32 %v3549_v0, %v3538_v15  ;;  %v3596_v30 = vrot.slane %v3580_v50, 6 }
0x291e   :  { %v3582_v34 = vadd.f32 %v3578_v1, %v3558_v29  ;;  %v3598_v16 = vsel %vm2213_vm3, %v3597_v26, %v3596_v30 }
0x291f   :  { %v3551_v48 = vpop.permute.xlu1 %3550 }
0x2920   :  { %v3559_v32 = vmul.f32 %v3551_v48, %v3539_v33  ;;  %v3599_v39 = vrot.slane %v3582_v34, 4 }
0x2922   :  { %v3583_v12 = vadd.f32 %v3579_v35, %v3559_v32  ;;  %v3600_v51 = vsel %vm2216_vm4, %v3599_v39, %v3598_v16 }
0x2924   :  { %v3601_v63 = vrot.slane %v3583_v12, 3 }
0x2926   :  { %v3602_v37 = vsel %vm2219_vm5, %v3601_v63, %v3600_v51 }
0x2927   :  { %3603 = vrot.lane.b32.xlu0 %v3602_v37, %s4739_s10 }
0x292c   :  { %v5833_v42 = vpop.permute.xlu1 %3589 }
0x292d   :  { %vm3591_vm7 = vcmp.eq.s32.totalorder %v5833_v42, 1 }
0x2999   :  { %v5836_v36 = vpop.permute.xlu0 %3603 }
0x299a   :  { %v5842_v25 = vsel %vm3591_vm7, %v5836_v36, %v5789_v24 }
0x299b   :  { %4235 = vmatmul.mubr.msk.f32.vlgmr.msra.gmra.mxu1 %vm1991_vm1, %v5842_v25  ;;  %v3794_v35 = vrot.slane %v5842_v25, 2  ;;  %v3793_v32 = vrot.slane %v5842_v25, 1  ;;  %v3795_v39 = vrot.slane %v5842_v25, 3  ;;  %vm3964_vm1 = vcmp.gt.s32.totalorder %v4822_v6, 7 }
0x299c   :  { %v2910_v6 = vsel %vm2896_vm12, %v5663_v9, 0.0 }
0x2a5b   :  { %v3682_v46 = vpop.f32.mrf.mxu1 }
0x2a5c   :  { %v3723_v58 = vadd.f32 %v3682_v46, %v5431_v5  ;;  %v3687_v24 = vrot.slane %v3682_v46, 1  ;;  %v3688_v14 = vrot.slane %v3682_v46, 2  ;;  %v3689_v40 = vrot.slane %v3682_v46, 3 }
0x2a5d   :  { %v4236_v49 = vpop.f32.mrf.mxu1  ;;  %v3690_v53 = vrot.slane %v3682_v46, 4 }
0x2a5e   :  { %v3726_v41 = vrot.slane %v3723_v58, 2  ;;  %v3725_v31 = vrot.slane %v3723_v58, 1  ;;  %v3728_v55 = vrot.slane %v3723_v58, 4  ;;  %v3727_v52 = vrot.slane %v3723_v58, 3 }
0x2a5f   :  { %v3695_v44 = vadd.f32 %v3687_v24, %v4843_v21  ;;  %v3696_v5 = vadd.f32 %v3688_v14, %v4839_v17  ;;  %v3697_v45 = vadd.f32 %v3689_v40, %v4845_v22  ;;  %v3698_v11 = vadd.f32 %v3690_v53, %v4841_v18 }
0x2a60   :  { %3731 = vrot.lane.b32.xlu0 %v3726_v41, %s4736_s25  ;;  %3729 = vrot.lane.b32.xlu1 %v3725_v31, %s4736_s25 }
0x2a61   :  { %v3960_v62 = vmul.f32 -1.442695, %v3695_v44  ;;  %v3961_v47 = vmul.f32 -1.442695, %v3696_v5  ;;  %v3962_v7 = vmul.f32 -1.442695, %v3697_v45 }
0x2a62   :  { %v3963_v28 = vmul.f32 -1.442695, %v3698_v11 }
0x2a63   :  { %4620 = vpow2.f32 %v3960_v62 }
0x2a64   :  { %3735 = vrot.lane.b32.xlu0 %v3728_v55, %s4736_s25  ;;  %3733 = vrot.lane.b32.xlu1 %v3727_v52, %s4736_s25  ;;  %4622 = vpow2.f32 %v3961_v47  ;;  %v2680_v52 = vsel %vm2666_vm10, %v5600_v61, 0.0 }
0x2a65   :  { %4624 = vpow2.f32 %v3962_v7 }
0x2a66   :  { %4626 = vpow2.f32 %v3963_v28 }
0x2a70   :  { %v4621_v57 = vpop.eup %4620 }
0x2a71   :  { %v4623_v54 = vpop.eup %4622  ;;  %v3711_v20 = vadd.f32 1.0, %v4621_v57 }
0x2a72   :  { %v4625_v4 = vpop.eup %4624  ;;  %v3712_v19 = vadd.f32 1.0, %v4623_v54 }
0x2a73   :  { %v4627_v27 = vpop.eup %4626  ;;  %v3713_v3 = vadd.f32 1.0, %v4625_v4  ;;  %4628 = vrcp.f32 %v3711_v20 }
0x2a74   :  { %v3714_v2 = vadd.f32 1.0, %v4627_v27  ;;  %4630 = vrcp.f32 %v3712_v19 }
0x2a75   :  { %4632 = vrcp.f32 %v3713_v3 }
0x2a76   :  { %4634 = vrcp.f32 %v3714_v2 }
0x2a80   :  { %v5855_v15 = vpop.eup %4628 }
0x2a81   :  { %v4631_v0 = vpop.eup %4630 }
0x2a82   :  { %v5858_v23 = vpop.eup %4632  ;;  %v3770_v40 = vsub.f32 1.0, %v4631_v0 }
0x2a83   :  { %v5862_v34 = vpop.eup %4634  ;;  %v3771_v45 = vsub.f32 1.0, %v5858_v23 }
0x2a84   :  { %v3772_v57 = vsub.f32 1.0, %v5862_v34 }
0x2ad2   :  { %v3732_v1 = vpop.permute.xlu0 %3731  ;;  %v3730_v8 = vpop.permute.xlu1 %3729 }
0x2ad3   :  { %v3742_v50 = vmul.f32 %v4631_v0, %v3732_v1  ;;  %v3741_v29 = vmul.f32 %v5855_v15, %v3730_v8 }
0x2ad5   :  { %3751 = vrot.lane.b32.xlu0 %v3742_v50, %s4736_s25  ;;  %3749 = vrot.lane.b32.xlu1 %v3741_v29, %s4736_s25  ;;  %v3373_v50 = vsel %vm3358_vm2, %v5783_v43, 0.0 }
0x2ad6   :  { %v3736_v33 = vpop.permute.xlu0 %3735  ;;  %v3734_v48 = vpop.permute.xlu1 %3733 }
0x2ad7   :  { %v3744_v26 = vmul.f32 %v5862_v34, %v3736_v33  ;;  %v3743_v30 = vmul.f32 %v5858_v23, %v3734_v48 }
0x2ad9   :  { %3755 = vrot.lane.b32.xlu0 %v3744_v26, %s4736_s25  ;;  %3753 = vrot.lane.b32.xlu1 %v3743_v30, %s4736_s25 }
0x2add   :  { %3799 = vrot.lane.b32.xlu0 %v3794_v35, %s4737_s30  ;;  %3797 = vrot.lane.b32.xlu1 %v3793_v32, %s4737_s30 }
0x2ae1   :  { %3801 = vrot.lane.b32.xlu0 %v3795_v39, %s4737_s30 }
0x2b47   :  { %v3752_v12 = vpop.permute.xlu0 %3751  ;;  %v3750_v16 = vpop.permute.xlu1 %3749 }
0x2b48   :  { %v3762_v63 = vadd.f32 %v3752_v12, %v4839_v17  ;;  %v3761_v51 = vadd.f32 %v3750_v16, %v4843_v21  ;;  %v3796_v17 = vrot.slane %v5842_v25, 4 }
0x2b4a   :  { %4636 = vtanh.f32 %v3762_v63 }
0x2b4b   :  { %4638 = vtanh.f32 %v3761_v51  ;;  %v3754_v37 = vpop.permute.xlu1 %3753  ;;  %v3756_v46 = vpop.permute.xlu0 %3755 }
0x2b4c   :  { %v3763_v58 = vadd.f32 %v3754_v37, %v4845_v22  ;;  %v3764_v49 = vadd.f32 %v3756_v46, %v4841_v18  ;;  %v3820_v18 = vsel %vm3964_vm1, 1, %v4738_v59  ;;  %v2450_v22 = vsel %vm2436_vm8, %v5537_v38, 0.0 }
0x2b4d   :  { %v3769_v38 = vsub.f32 1.0, %v5855_v15  ;;  %vm2455_vm8 = vcmask 519424  }
0x2b4e   :  { %4640 = vtanh.f32 %v3763_v58 }
0x2b4f   :  { %4642 = vtanh.f32 %v3764_v49  ;;  %v3800_v59 = vpop.permute.xlu0 %3799  ;;  %v3798_v14 = vpop.permute.xlu1 %3797 }
0x2b50   :  { %v3810_v56 = vmul.f32 %v4631_v0, %v3800_v59  ;;  %v3809_v61 = vmul.f32 %v5855_v15, %v3798_v14 }
0x2b53   :  { %v3802_v24 = vpop.permute.xlu0 %3801 }
0x2b54   :  { %v3811_v10 = vmul.f32 %v5858_v23, %v3802_v24  ;;  %v3606_v23 = vsel %vm3591_vm7, %v5836_v36, 0.0 }
0x2b57   :  { %v4637_v41 = vpop.eup %4636 }
0x2b58   :  { %v4639_v31 = vpop.eup %4638  ;;  %3779 = vrot.lane.b32.xlu0 %v4637_v41, %s4739_s10 }
0x2b59   :  { %3777 = vrot.lane.b32.xlu1 %v4639_v31, %s4739_s10 }
0x2b5b   :  { %v4641_v55 = vpop.eup %4640 }
0x2b5c   :  { %3803 = vrot.lane.b32.xlu0 %v3796_v17, %s4737_s30  ;;  %v4643_v21 = vpop.eup %4642 }
0x2b5d   :  { %3781 = vrot.lane.b32.xlu1 %v4641_v55, %s4739_s10 }
0x2b61   :  { %3783 = vrot.lane.b32.xlu1 %v4643_v21, %s4739_s10 }
0x2b65   :  { %3822 = vperm.xlu1 %4450, %v3820_v18  }
0x2b69   :  { %2452 = vrot.lane.b32.xlu1 %v2450_v22, %s4737_s30 }
0x2b6d   :  { %2682 = vrot.lane.b32.xlu1 %v2680_v52, %s4736_s25 }
0x2b71   :  { %2912 = vrot.lane.b32.xlu1 %v2910_v6, %s4739_s10 }
0x2bca   :  { %v3780_v60 = vpop.permute.xlu0 %3779 }
0x2bcb   :  { %v3778_v44 = vpop.permute.xlu1 %3777  ;;  %v3790_v53 = vmul.f32 %v3780_v60, %v3770_v40 }
0x2bcc   :  { %v3789_v5 = vmul.f32 %v3778_v44, %v3769_v38 }
0x2bcd   :  { %v3814_v9 = vadd.f32 %v3810_v56, %v3790_v53 }
0x2bce   :  { %v3813_v11 = vadd.f32 %v3809_v61, %v3789_v5  ;;  %v3804_v7 = vpop.permute.xlu0 %3803 }
0x2bcf   :  { %v3782_v62 = vpop.permute.xlu1 %3781  ;;  %v3830_v20 = vrot.slane %v3814_v9, 6  ;;  %v3812_v19 = vmul.f32 %v5862_v34, %v3804_v7 }
0x2bd0   :  { %v3791_v47 = vmul.f32 %v3782_v62, %v3771_v45  ;;  %v3829_v4 = vrot.slane %v3813_v11, 7 }
0x2bd2   :  { %v3815_v28 = vadd.f32 %v3811_v10, %v3791_v47  ;;  %v3831_v15 = vsel %vm2213_vm3, %v3830_v20, %v3829_v4  ;;  %vm2685_vm3 = vcmask 781824  }
0x2bd3   :  { %v3784_v54 = vpop.permute.xlu1 %3783 }
0x2bd4   :  { %v3792_v27 = vmul.f32 %v3784_v54, %v3772_v57  ;;  %v3832_v3 = vrot.slane %v3815_v28, 5 }
0x2bd6   :  { %v3816_v2 = vadd.f32 %v3812_v19, %v3792_v27  ;;  %v3833_v1 = vsel %vm2216_vm4, %v3832_v3, %v3831_v15  ;;  %vm2915_vm4 = vcmask 1044224  }
0x2bd8   :  { %v3834_v0 = vrot.slane %v3816_v2, 4 }
0x2bda   :  { %v3835_v8 = vsel %vm2219_vm5, %v3834_v0, %v3833_v1 }
0x2bdb   :  { %3836 = vrot.lane.b32.xlu0 %v3835_v8, %s4739_s10 }
0x2bdf   :  { %3375 = vrot.lane.b32.xlu0 %v3373_v50, %s4737_s30 }
0x2be0   :  { %v3823_v29 = vpop.permute.xlu1 %3822 }
0x2be1   :  { %vm3824_vm5 = vcmp.eq.s32.totalorder %v3823_v29, 1 }
0x2be3   :  { %3608 = vrot.lane.b32.xlu0 %v3606_v23, %s4736_s25 }
0x2be4   :  { %v2453_v34 = vpop.permute.xlu1 %2452 }
0x2be5   :  { %2456 = vst.msk [vmem:[%s5950_s8] sm:$0xf] %vm2455_vm8, %v2453_v34 }
0x2be8   :  { %v2683_v33 = vpop.permute.xlu1 %2682 }
0x2be9   :  { %2686 = vst.msk [vmem:[%s5950_s8] sm:$0xf] %vm2685_vm3, %v2683_v33 }
0x2bec   :  { %v2913_v13 = vpop.permute.xlu1 %2912 }
0x2bed   :  { %2916 = vst.msk [vmem:[%s5950_s8] sm:$0xf] %vm2915_vm4, %v2913_v13 }
0x2c4d   :  { %v3837_v43 = vpop.permute.xlu0 %3836 }
0x2c4e   :  { %v3839_v42 = vsel %vm3824_vm5, %v3837_v43, 0.0  ;;  %v3845_v36 = vsel %vm3824_vm5, %v3837_v43, %v5842_v25 }
0x2c4f   :  { %3846 = vst.msk [vmem:[#allocation9] sm:$0xf] %vm69_vm0, %v3845_v36  ;;  %3841 = vrot.lane.b32.xlu0 %v3839_v42, %s4739_s10 }
0x2c51   :  { %v3376_v48 = vpop.permute.xlu0 %3375 }
0x2c52   :  { %3378 = vst.msk [vmem:[%s5950_s8 + $0x4] sm:$0xf] %vm2455_vm8, %v3376_v48 }
0x2c55   :  { %v3609_v26 = vpop.permute.xlu0 %3608 }
0x2c56   :  { %3611 = vst.msk [vmem:[%s5950_s8 + $0x4] sm:$0xf] %vm2685_vm3, %v3609_v26 }
0x2cc1   :  { %v3842_v30 = vpop.permute.xlu0 %3841 }
0x2cc2   :  { %3844 = vst.msk [vmem:[%s5950_s8 + $0x4] sm:$0xf] %vm2915_vm4, %v3842_v30 }
0x2cc3 PF:  { %s4740_s21 = smov [#allocation9]  }
0x2cc4   :  { %s3855_s22 = sshll.u32 %s4740_s21, 4  ;;  %s3856_s22 = int_to_ptr.vmem [resolvable:$true] %s3855_s22 }
0x2cc5   :  { %s4696_s23 = scalar_lea.vmem %s3856_s22, 64  ;;  %p4701_p7 = scmp.lt.s32.totalorder %s3856_s22, %s3856_s22 }
0x2cc6   :  { %p4697_p6 = scmp.ne.s32.totalorder %s3856_s22, %s4696_s23  ;;  %p4702_p8 = scmp.lt.s32.totalorder %s4696_s23, %s4696_s23 }
0x2cc8   :  { %p4703_p9 = por %p4702_p8, %p4701_p7 }
0x2cca   :  { %p4704_p10 = pnand %p4703_p9, %p4697_p6 }
0x2ccc   :  { %4707 = shalt.err (!%p4704_p10)
}
0x2ccd   :  { %3858 = dma.vmem_to_hbm [thread:$0]  %s3856_s22, 64, %s5951_s9, [#allocation6]  }
0x2cce   :  { %4722 = dma.done.wait [#allocation6], 64  }
0x2ccf   :  { %4723 = vsyncadd [#allocation6], 4294967232 }
0x2cd0   :  { %3864 = vsyncpa [#allocation5], 1 }
0x2cd1   :  { %3865 = vsyncpa [#allocation8], 1 }
0x2cd2   :  { %3866 = vsyncpa [#allocation6], 1 }

</bundles_post_ra>
